<compile_context>
chip_gen: v7x
topology: tpu7x:2x2x1
jax: 0.10.0
libtpu: 0.0.40
codegen_flags: <defaults>
</compile_context>

<pallas_src>
from functools import partial

import jax
import jax.numpy as jnp
import numpy as np
from jax.experimental import pallas as pl
from jax.experimental.pallas import tpu as pltpu

EPS = 1e-5  # torch BatchNorm2d default


# ----------------------------------------------------------------------------
# Pallas kernel: StarMlp forward for NB images, each laid out as (C, H*W).
# ----------------------------------------------------------------------------
def starmlp_kernel(x_ref, rowcol_ref, dww_ref, chb_ref, fw_ref, fb_ref, gw_ref,
                   out_ref, *, H, W, HID, NB):
    K = 7
    R = K // 2
    HW = H * W

    # Validity masks for the 7x7 depthwise convs, factored into 7 row (dy) and
    # 7 col (dx) conditions; computed once per grid step, shared by both convs
    # and all images in the step.
    row = rowcol_ref[0:1, :]                      # (1, HW) int32
    col = rowcol_ref[1:2, :]                      # (1, HW) int32
    row_ok = [jnp.logical_and(row + dy >= 0, row + dy < H)
              for dy in range(-R, R + 1)]
    col_ok = [jnp.logical_and(col + dx >= 0, col + dx < W)
              for dx in range(-R, R + 1)]

    def dwconv7(inp, conv_idx, bias):
        """7x7 depthwise conv (stride 1, pad 3) on a (C, H*W) tile."""
        w = dww_ref[conv_idx]                     # (C, 49) per-channel taps
        # dx-shifted (column-masked) copies of the input: 6 lane rolls (XLU).
        shifted = []
        for j, dx in enumerate(range(-R, R + 1)):
            if dx == 0:
                shifted.append(inp)
            else:
                s = pltpu.roll(inp, (-dx) % HW, axis=1)
                shifted.append(jnp.where(col_ok[j], s, 0.0))
        acc = None
        for i, dy in enumerate(range(-R, R + 1)):
            inner = None
            for j in range(K):
                t = i * K + j
                term = shifted[j] * w[:, t:t + 1]     # per-channel weight bcast
                inner = term if inner is None else inner + term
            if dy != 0:
                inner = jnp.where(row_ok[i],
                                  pltpu.roll(inner, (-dy * W) % HW, axis=1),
                                  0.0)
            acc = inner if acc is None else acc + inner
        return acc + bias

    dw1_b = chb_ref[0]                            # (C, 1) dwconv bias (BN folded)
    g_b = chb_ref[1]                              # (C, 1) g bias (BN folded)
    dw2_b = chb_ref[2]                            # (C, 1) dwconv2 bias

    fw = fw_ref[...]                              # (2*HID, C) fused f1;f2 weight
    fb = fb_ref[...]                              # (2*HID, 1) fused f1;f2 bias
    gw = gw_ref[...]                              # (C, HID)   g weight (BN folded)

    for b in range(NB):                           # images in this grid step
        x = x_ref[b]                              # (C, HW)
        z = dwconv7(x, 0, dw1_b)                  # dwconv + BN (folded)
        fz = jnp.dot(fw, z, preferred_element_type=jnp.float32) + fb   # MXU
        x1 = fz[:HID]                             # f1 output
        x2 = fz[HID:]                             # f2 output
        m = jnp.clip(x1, 0.0, 6.0) * x2           # relu6(f1) * f2
        gz = jnp.dot(gw, m, preferred_element_type=jnp.float32) + g_b  # MXU
        d2 = dwconv7(gz, 1, dw2_b)                # dwconv2 (bias only)
        out_ref[b] = x + d2                       # residual (drop_path = id)


# ----------------------------------------------------------------------------
# Parameter init (PyTorch-like shapes) and one-time folding/consolidation.
# ----------------------------------------------------------------------------
def init_raw_params(key, dim, hid):
    ks = jax.random.split(key, 18)

    def nrm(k, shape, s):
        return s * jax.random.normal(k, shape, jnp.float32)

    def bn(k0, k1, k2, k3):
        # (weight, bias, running_mean, running_var); randomized to exercise the
        # folding math (forward semantics are the same as eval-mode torch BN).
        return (1.0 + nrm(k0, (dim,), 0.1), nrm(k1, (dim,), 0.1),
                nrm(k2, (dim,), 0.1),
                0.5 + jax.random.uniform(k3, (dim,), jnp.float32))

    p = {}
    # StarMlp.dwconv = ConvBN(dim, dim, 7, groups=dim, with_bn=True)
    p['dw1_w'] = nrm(ks[0], (dim, 1, 7, 7), 0.1)
    p['dw1_b'] = nrm(ks[1], (dim,), 0.1)
    p['bn1'] = bn(ks[2], ks[3], ks[4], ks[5])
    # StarMlp.f1 / f2 = ConvBN(dim, hid, 1, with_bn=False)
    p['f1_w'] = nrm(ks[6], (hid, dim, 1, 1), 0.3)
    p['f1_b'] = nrm(ks[7], (hid,), 0.1)
    p['f2_w'] = nrm(ks[8], (hid, dim, 1, 1), 0.3)
    p['f2_b'] = nrm(ks[9], (hid,), 0.1)
    # StarMlp.g = ConvBN(hid, dim, 1, with_bn=True)
    p['g_w'] = nrm(ks[10], (dim, hid, 1, 1), 0.3)
    p['g_b'] = nrm(ks[11], (dim,), 0.1)
    p['bng'] = bn(ks[12], ks[13], ks[14], ks[15])
    # StarMlp.dwconv2 = ConvBN(dim, dim, 7, groups=dim, with_bn=False)
    p['dw2_w'] = nrm(ks[16], (dim, 1, 7, 7), 0.1)
    p['dw2_b'] = nrm(ks[17], (dim,), 0.1)
    return p


def fold_params(p):
    """Fold inference-mode BN + conv biases into 5 consolidated kernel arrays."""
    def bn_fold(bnp):
        w, b, rm, rv = bnp
        sc = w / jnp.sqrt(rv + EPS)
        return sc, b - rm * sc

    C = p['dw1_b'].shape[0]
    HID = p['f1_b'].shape[0]

    s1, h1 = bn_fold(p['bn1'])
    sg, hg = bn_fold(p['bng'])

    dw1_w = p['dw1_w'][:, 0].reshape(C, 49) * s1[:, None]          # BN folded
    dw2_w = p['dw2_w'][:, 0].reshape(C, 49)
    dww = jnp.stack([dw1_w, dw2_w], axis=0)                        # (2, C, 49)

    dw1_b = p['dw1_b'] * s1 + h1
    g_b = p['g_b'] * sg + hg
    chb = jnp.stack([dw1_b, g_b, p['dw2_b']], axis=0)[:, :, None]  # (3, C, 1)

    fw = jnp.concatenate([p['f1_w'][:, :, 0, 0],
                          p['f2_w'][:, :, 0, 0]], axis=0)          # (2*HID, C)
    fb = jnp.concatenate([p['f1_b'], p['f2_b']], axis=0)[:, None]  # (2*HID, 1)
    gw = p['g_w'][:, :, 0, 0] * sg[:, None]                        # (C, HID)

    f32 = jnp.float32
    return (dww.astype(f32), chb.astype(f32), fw.astype(f32),
            fb.astype(f32), gw.astype(f32))


# ----------------------------------------------------------------------------
# Wrapper: NCHW in/out, lane-dense (C, H*W) tiles inside the kernel.
# ----------------------------------------------------------------------------
def starmlp_pallas(x_nchw, kargs, *, images_per_step=1):
    dww, chb, fw, fb, gw = kargs
    N, C, H, W = x_nchw.shape
    HW = H * W
    HID2 = fw.shape[0]
    HID = HID2 // 2
    NB = min(images_per_step, N)
    if N % NB != 0:
        NB = 1

    # Free reshape (no transpose): channels stay on sublanes, H*W on lanes.
    x = x_nchw.reshape(N, C, HW).astype(jnp.float32)

    # Per-pixel (row, col) indices for the conv validity masks (compile-time
    # constant; avoids integer div/mod on the VPU).
    pix = np.arange(HW, dtype=np.int32)
    rowcol = jnp.asarray(np.stack([pix // W, pix % W], axis=0))    # (2, HW)

    kernel = partial(starmlp_kernel, H=H, W=W, HID=HID, NB=NB)

    grid_spec = pltpu.PrefetchScalarGridSpec(
        num_scalar_prefetch=0,
        grid=(N // NB,),
        in_specs=[
            pl.BlockSpec((NB, C, HW), lambda n: (n, 0, 0)),        # x
            pl.BlockSpec((2, HW), lambda n: (0, 0)),               # rowcol
            pl.BlockSpec((2, C, 49), lambda n: (0, 0, 0)),         # dw weights
            pl.BlockSpec((3, C, 1), lambda n: (0, 0, 0)),          # channel biases
            pl.BlockSpec((HID2, C), lambda n: (0, 0)),             # fused f1;f2 w
            pl.BlockSpec((HID2, 1), lambda n: (0, 0)),             # fused f1;f2 b
            pl.BlockSpec((C, HID), lambda n: (0, 0)),              # g weight
        ],
        out_specs=pl.BlockSpec((NB, C, HW), lambda n: (n, 0, 0)),
    )
    # NOTE: at these shapes everything fits the default scoped VMEM limit; at
    # production resolutions tile H with a 3-row halo (second grid axis) and
    # set pltpu.CompilerParams(vmem_limit_bytes=...) explicitly.
    out = pl.pallas_call(
        kernel,
        out_shape=jax.ShapeDtypeStruct((N, C, HW), jnp.float32),
        grid_spec=grid_spec,
        compiler_params=pltpu.CompilerParams(
            dimension_semantics=("parallel",)),     # batch axis -> v7x megacore
    )(x, rowcol, dww, chb, fw, fb, gw)
    return out.reshape(N, C, H, W)


# ----------------------------------------------------------------------------
# Plain-JAX reference (NCHW, lax convs) for a numerics check.
# ----------------------------------------------------------------------------
def _conv2d(x, w, b, groups=1, padding=0):
    out = jax.lax.conv_general_dilated(
        x, w, window_strides=(1, 1),
        padding=[(padding, padding), (padding, padding)],
        dimension_numbers=('NCHW', 'OIHW', 'NCHW'),
        feature_group_count=groups,
        precision=jax.lax.Precision.HIGHEST)
    return out + b[None, :, None, None]


def _bn(y, bnp):
    w, b, rm, rv = bnp
    sc = w / jnp.sqrt(rv + EPS)
    return y * sc[None, :, None, None] + (b - rm * sc)[None, :, None, None]


def reference_forward(x, p):
    dim = p['dw1_b'].shape[0]
    z = _bn(_conv2d(x, p['dw1_w'], p['dw1_b'], groups=dim, padding=3), p['bn1'])
    x1 = _conv2d(z, p['f1_w'], p['f1_b'])
    x2 = _conv2d(z, p['f2_w'], p['f2_b'])
    m = jnp.clip(x1, 0.0, 6.0) * x2                     # relu6(f1) * f2
    g = _bn(_conv2d(m, p['g_w'], p['g_b']), p['bng'])
    d2 = _conv2d(g, p['dw2_w'], p['dw2_b'], groups=dim, padding=3)
    return x + d2                                       # drop_path = identity


if __name__ == "__main__":
    dim, mlp_ratio = 4, 4
    hid = int(mlp_ratio * dim)          # StarMlp hidden width = 16
    N, H, W = 2, 16, 16

    key = jax.random.PRNGKey(0)
    kx, kp = jax.random.split(key)
    x = jax.random.normal(kx, (N, dim, H, W), jnp.float32)
    raw = init_raw_params(kp, dim, hid)

    # Folding is done once, outside the per-call forward path.
    kargs = fold_params(raw)

    fwd = jax.jit(starmlp_pallas, static_argnames=("images_per_step",))
    out = jax.block_until_ready(fwd(x, kargs, images_per_step=2))
    assert out.shape == (N, dim, H, W) and out.dtype == jnp.float32

    ref = reference_forward(x, raw)
    np.testing.assert_allclose(np.asarray(out), np.asarray(ref),
                               rtol=1e-4, atol=1e-4)

    print("KERNEL_OK")
</pallas_src>

<mosaic_0001>
module attributes {stable_mosaic.version = 11 : i64} {
  func.func @starmlp_kernel(%arg0: i32, %arg1: memref<2x4x256xf32, #tpu.memory_space<vmem>>, %arg2: memref<2x256xi32, #tpu.memory_space<vmem>>, %arg3: memref<2x4x49xf32, #tpu.memory_space<vmem>>, %arg4: memref<3x4x1xf32, #tpu.memory_space<vmem>>, %arg5: memref<32x4xf32, #tpu.memory_space<vmem>>, %arg6: memref<32x1xf32, #tpu.memory_space<vmem>>, %arg7: memref<4x16xf32, #tpu.memory_space<vmem>>, %arg8: memref<2x4x256xf32, #tpu.memory_space<vmem>>) attributes {dimension_semantics = [#tpu.dimension_semantics<parallel>], iteration_bounds = array<i64: 1>, scalar_prefetch = 0 : i64, scratch_operands = 0 : i64, tpu.core_type = #tpu.core_type<tc>, window_params = [{transform_indices = @transform_0, window_bounds = array<i64: 2, 4, 256>}, {pipeline_mode = #tpu.pipeline_mode<synchronous>, transform_indices = @transform_1, window_bounds = array<i64: 2, 256>}, {pipeline_mode = #tpu.pipeline_mode<synchronous>, transform_indices = @transform_2, window_bounds = array<i64: 2, 4, 49>}, {pipeline_mode = #tpu.pipeline_mode<synchronous>, transform_indices = @transform_3, window_bounds = array<i64: 3, 4, 1>}, {pipeline_mode = #tpu.pipeline_mode<synchronous>, transform_indices = @transform_4, window_bounds = array<i64: 32, 4>}, {pipeline_mode = #tpu.pipeline_mode<synchronous>, transform_indices = @transform_5, window_bounds = array<i64: 32, 1>}, {pipeline_mode = #tpu.pipeline_mode<synchronous>, transform_indices = @transform_6, window_bounds = array<i64: 4, 16>}, {transform_indices = @transform_7, window_bounds = array<i64: 2, 4, 256>}]} {
    %c0 = arith.constant 0 : index
    %c0_0 = arith.constant 0 : index
    %0 = vector.load %arg2[%c0, %c0_0] : memref<2x256xi32, #tpu.memory_space<vmem>>, vector<1x256xi32>
    %c1 = arith.constant 1 : index
    %c0_1 = arith.constant 0 : index
    %1 = vector.load %arg2[%c1, %c0_1] : memref<2x256xi32, #tpu.memory_space<vmem>>, vector<1x256xi32>
    %c-3_i32 = arith.constant -3 : i32
    %2 = vector.broadcast %c-3_i32 : i32 to vector<1x256xi32>
    %3 = arith.addi %0, %2 : vector<1x256xi32>
    %c0_i32 = arith.constant 0 : i32
    %4 = vector.broadcast %c0_i32 : i32 to vector<1x256xi32>
    %5 = arith.cmpi sge, %3, %4 : vector<1x256xi32>
    %c-3_i32_2 = arith.constant -3 : i32
    %6 = vector.broadcast %c-3_i32_2 : i32 to vector<1x256xi32>
    %7 = arith.addi %0, %6 : vector<1x256xi32>
    %c16_i32 = arith.constant 16 : i32
    %8 = vector.broadcast %c16_i32 : i32 to vector<1x256xi32>
    %9 = arith.cmpi slt, %7, %8 : vector<1x256xi32>
    %10 = arith.andi %5, %9 : vector<1x256xi1>
    %c-2_i32 = arith.constant -2 : i32
    %11 = vector.broadcast %c-2_i32 : i32 to vector<1x256xi32>
    %12 = arith.addi %0, %11 : vector<1x256xi32>
    %c0_i32_3 = arith.constant 0 : i32
    %13 = vector.broadcast %c0_i32_3 : i32 to vector<1x256xi32>
    %14 = arith.cmpi sge, %12, %13 : vector<1x256xi32>
    %c-2_i32_4 = arith.constant -2 : i32
    %15 = vector.broadcast %c-2_i32_4 : i32 to vector<1x256xi32>
    %16 = arith.addi %0, %15 : vector<1x256xi32>
    %c16_i32_5 = arith.constant 16 : i32
    %17 = vector.broadcast %c16_i32_5 : i32 to vector<1x256xi32>
    %18 = arith.cmpi slt, %16, %17 : vector<1x256xi32>
    %19 = arith.andi %14, %18 : vector<1x256xi1>
    %c-1_i32 = arith.constant -1 : i32
    %20 = vector.broadcast %c-1_i32 : i32 to vector<1x256xi32>
    %21 = arith.addi %0, %20 : vector<1x256xi32>
    %c0_i32_6 = arith.constant 0 : i32
    %22 = vector.broadcast %c0_i32_6 : i32 to vector<1x256xi32>
    %23 = arith.cmpi sge, %21, %22 : vector<1x256xi32>
    %c-1_i32_7 = arith.constant -1 : i32
    %24 = vector.broadcast %c-1_i32_7 : i32 to vector<1x256xi32>
    %25 = arith.addi %0, %24 : vector<1x256xi32>
    %c16_i32_8 = arith.constant 16 : i32
    %26 = vector.broadcast %c16_i32_8 : i32 to vector<1x256xi32>
    %27 = arith.cmpi slt, %25, %26 : vector<1x256xi32>
    %28 = arith.andi %23, %27 : vector<1x256xi1>
    %c1_i32 = arith.constant 1 : i32
    %29 = vector.broadcast %c1_i32 : i32 to vector<1x256xi32>
    %30 = arith.addi %0, %29 : vector<1x256xi32>
    %c0_i32_9 = arith.constant 0 : i32
    %31 = vector.broadcast %c0_i32_9 : i32 to vector<1x256xi32>
    %32 = arith.cmpi sge, %30, %31 : vector<1x256xi32>
    %c1_i32_10 = arith.constant 1 : i32
    %33 = vector.broadcast %c1_i32_10 : i32 to vector<1x256xi32>
    %34 = arith.addi %0, %33 : vector<1x256xi32>
    %c16_i32_11 = arith.constant 16 : i32
    %35 = vector.broadcast %c16_i32_11 : i32 to vector<1x256xi32>
    %36 = arith.cmpi slt, %34, %35 : vector<1x256xi32>
    %37 = arith.andi %32, %36 : vector<1x256xi1>
    %c2_i32 = arith.constant 2 : i32
    %38 = vector.broadcast %c2_i32 : i32 to vector<1x256xi32>
    %39 = arith.addi %0, %38 : vector<1x256xi32>
    %c0_i32_12 = arith.constant 0 : i32
    %40 = vector.broadcast %c0_i32_12 : i32 to vector<1x256xi32>
    %41 = arith.cmpi sge, %39, %40 : vector<1x256xi32>
    %c2_i32_13 = arith.constant 2 : i32
    %42 = vector.broadcast %c2_i32_13 : i32 to vector<1x256xi32>
    %43 = arith.addi %0, %42 : vector<1x256xi32>
    %c16_i32_14 = arith.constant 16 : i32
    %44 = vector.broadcast %c16_i32_14 : i32 to vector<1x256xi32>
    %45 = arith.cmpi slt, %43, %44 : vector<1x256xi32>
    %46 = arith.andi %41, %45 : vector<1x256xi1>
    %c3_i32 = arith.constant 3 : i32
    %47 = vector.broadcast %c3_i32 : i32 to vector<1x256xi32>
    %48 = arith.addi %0, %47 : vector<1x256xi32>
    %c0_i32_15 = arith.constant 0 : i32
    %49 = vector.broadcast %c0_i32_15 : i32 to vector<1x256xi32>
    %50 = arith.cmpi sge, %48, %49 : vector<1x256xi32>
    %c3_i32_16 = arith.constant 3 : i32
    %51 = vector.broadcast %c3_i32_16 : i32 to vector<1x256xi32>
    %52 = arith.addi %0, %51 : vector<1x256xi32>
    %c16_i32_17 = arith.constant 16 : i32
    %53 = vector.broadcast %c16_i32_17 : i32 to vector<1x256xi32>
    %54 = arith.cmpi slt, %52, %53 : vector<1x256xi32>
    %55 = arith.andi %50, %54 : vector<1x256xi1>
    %c-3_i32_18 = arith.constant -3 : i32
    %56 = vector.broadcast %c-3_i32_18 : i32 to vector<1x256xi32>
    %57 = arith.addi %1, %56 : vector<1x256xi32>
    %c0_i32_19 = arith.constant 0 : i32
    %58 = vector.broadcast %c0_i32_19 : i32 to vector<1x256xi32>
    %59 = arith.cmpi sge, %57, %58 : vector<1x256xi32>
    %c-3_i32_20 = arith.constant -3 : i32
    %60 = vector.broadcast %c-3_i32_20 : i32 to vector<1x256xi32>
    %61 = arith.addi %1, %60 : vector<1x256xi32>
    %c16_i32_21 = arith.constant 16 : i32
    %62 = vector.broadcast %c16_i32_21 : i32 to vector<1x256xi32>
    %63 = arith.cmpi slt, %61, %62 : vector<1x256xi32>
    %64 = arith.andi %59, %63 : vector<1x256xi1>
    %c-2_i32_22 = arith.constant -2 : i32
    %65 = vector.broadcast %c-2_i32_22 : i32 to vector<1x256xi32>
    %66 = arith.addi %1, %65 : vector<1x256xi32>
    %c0_i32_23 = arith.constant 0 : i32
    %67 = vector.broadcast %c0_i32_23 : i32 to vector<1x256xi32>
    %68 = arith.cmpi sge, %66, %67 : vector<1x256xi32>
    %c-2_i32_24 = arith.constant -2 : i32
    %69 = vector.broadcast %c-2_i32_24 : i32 to vector<1x256xi32>
    %70 = arith.addi %1, %69 : vector<1x256xi32>
    %c16_i32_25 = arith.constant 16 : i32
    %71 = vector.broadcast %c16_i32_25 : i32 to vector<1x256xi32>
    %72 = arith.cmpi slt, %70, %71 : vector<1x256xi32>
    %73 = arith.andi %68, %72 : vector<1x256xi1>
    %c-1_i32_26 = arith.constant -1 : i32
    %74 = vector.broadcast %c-1_i32_26 : i32 to vector<1x256xi32>
    %75 = arith.addi %1, %74 : vector<1x256xi32>
    %c0_i32_27 = arith.constant 0 : i32
    %76 = vector.broadcast %c0_i32_27 : i32 to vector<1x256xi32>
    %77 = arith.cmpi sge, %75, %76 : vector<1x256xi32>
    %c-1_i32_28 = arith.constant -1 : i32
    %78 = vector.broadcast %c-1_i32_28 : i32 to vector<1x256xi32>
    %79 = arith.addi %1, %78 : vector<1x256xi32>
    %c16_i32_29 = arith.constant 16 : i32
    %80 = vector.broadcast %c16_i32_29 : i32 to vector<1x256xi32>
    %81 = arith.cmpi slt, %79, %80 : vector<1x256xi32>
    %82 = arith.andi %77, %81 : vector<1x256xi1>
    %c1_i32_30 = arith.constant 1 : i32
    %83 = vector.broadcast %c1_i32_30 : i32 to vector<1x256xi32>
    %84 = arith.addi %1, %83 : vector<1x256xi32>
    %c0_i32_31 = arith.constant 0 : i32
    %85 = vector.broadcast %c0_i32_31 : i32 to vector<1x256xi32>
    %86 = arith.cmpi sge, %84, %85 : vector<1x256xi32>
    %c1_i32_32 = arith.constant 1 : i32
    %87 = vector.broadcast %c1_i32_32 : i32 to vector<1x256xi32>
    %88 = arith.addi %1, %87 : vector<1x256xi32>
    %c16_i32_33 = arith.constant 16 : i32
    %89 = vector.broadcast %c16_i32_33 : i32 to vector<1x256xi32>
    %90 = arith.cmpi slt, %88, %89 : vector<1x256xi32>
    %91 = arith.andi %86, %90 : vector<1x256xi1>
    %c2_i32_34 = arith.constant 2 : i32
    %92 = vector.broadcast %c2_i32_34 : i32 to vector<1x256xi32>
    %93 = arith.addi %1, %92 : vector<1x256xi32>
    %c0_i32_35 = arith.constant 0 : i32
    %94 = vector.broadcast %c0_i32_35 : i32 to vector<1x256xi32>
    %95 = arith.cmpi sge, %93, %94 : vector<1x256xi32>
    %c2_i32_36 = arith.constant 2 : i32
    %96 = vector.broadcast %c2_i32_36 : i32 to vector<1x256xi32>
    %97 = arith.addi %1, %96 : vector<1x256xi32>
    %c16_i32_37 = arith.constant 16 : i32
    %98 = vector.broadcast %c16_i32_37 : i32 to vector<1x256xi32>
    %99 = arith.cmpi slt, %97, %98 : vector<1x256xi32>
    %100 = arith.andi %95, %99 : vector<1x256xi1>
    %c3_i32_38 = arith.constant 3 : i32
    %101 = vector.broadcast %c3_i32_38 : i32 to vector<1x256xi32>
    %102 = arith.addi %1, %101 : vector<1x256xi32>
    %c0_i32_39 = arith.constant 0 : i32
    %103 = vector.broadcast %c0_i32_39 : i32 to vector<1x256xi32>
    %104 = arith.cmpi sge, %102, %103 : vector<1x256xi32>
    %c3_i32_40 = arith.constant 3 : i32
    %105 = vector.broadcast %c3_i32_40 : i32 to vector<1x256xi32>
    %106 = arith.addi %1, %105 : vector<1x256xi32>
    %c16_i32_41 = arith.constant 16 : i32
    %107 = vector.broadcast %c16_i32_41 : i32 to vector<1x256xi32>
    %108 = arith.cmpi slt, %106, %107 : vector<1x256xi32>
    %109 = arith.andi %104, %108 : vector<1x256xi1>
    %c0_42 = arith.constant 0 : index
    %c0_43 = arith.constant 0 : index
    %c0_44 = arith.constant 0 : index
    %110 = vector.load %arg4[%c0_42, %c0_43, %c0_44] : memref<3x4x1xf32, #tpu.memory_space<vmem>>, vector<1x4x1xf32>
    %111 = vector.shape_cast %110 : vector<1x4x1xf32> to vector<4x1xf32>
    %c1_45 = arith.constant 1 : index
    %c0_46 = arith.constant 0 : index
    %c0_47 = arith.constant 0 : index
    %112 = vector.load %arg4[%c1_45, %c0_46, %c0_47] : memref<3x4x1xf32, #tpu.memory_space<vmem>>, vector<1x4x1xf32>
    %113 = vector.shape_cast %112 : vector<1x4x1xf32> to vector<4x1xf32>
    %c2 = arith.constant 2 : index
    %c0_48 = arith.constant 0 : index
    %c0_49 = arith.constant 0 : index
    %114 = vector.load %arg4[%c2, %c0_48, %c0_49] : memref<3x4x1xf32, #tpu.memory_space<vmem>>, vector<1x4x1xf32>
    %115 = vector.shape_cast %114 : vector<1x4x1xf32> to vector<4x1xf32>
    %c0_50 = arith.constant 0 : index
    %c0_51 = arith.constant 0 : index
    %116 = vector.load %arg5[%c0_50, %c0_51] : memref<32x4xf32, #tpu.memory_space<vmem>>, vector<32x4xf32>
    %c0_52 = arith.constant 0 : index
    %c0_53 = arith.constant 0 : index
    %117 = vector.load %arg6[%c0_52, %c0_53] : memref<32x1xf32, #tpu.memory_space<vmem>>, vector<32x1xf32>
    %c0_54 = arith.constant 0 : index
    %c0_55 = arith.constant 0 : index
    %118 = vector.load %arg7[%c0_54, %c0_55] : memref<4x16xf32, #tpu.memory_space<vmem>>, vector<4x16xf32>
    %c0_56 = arith.constant 0 : index
    %c0_57 = arith.constant 0 : index
    %c0_58 = arith.constant 0 : index
    %119 = vector.load %arg1[%c0_56, %c0_57, %c0_58] : memref<2x4x256xf32, #tpu.memory_space<vmem>>, vector<1x4x256xf32>
    %120 = vector.shape_cast %119 : vector<1x4x256xf32> to vector<4x256xf32>
    %c0_59 = arith.constant 0 : index
    %c0_60 = arith.constant 0 : index
    %c0_61 = arith.constant 0 : index
    %121 = vector.load %arg3[%c0_59, %c0_60, %c0_61] : memref<2x4x49xf32, #tpu.memory_space<vmem>>, vector<1x4x49xf32>
    %122 = vector.shape_cast %121 : vector<1x4x49xf32> to vector<4x49xf32>
    %c3_i32_62 = arith.constant 3 : i32
    %123 = tpu.dynamic_rotate %120 by %c3_i32_62 dim 1 : vector<4x256xf32>, i32 -> vector<4x256xf32>
    %cst = arith.constant 0.000000e+00 : f32
    %124 = vector.shape_cast %64 : vector<1x256xi1> to vector<1x256xi1>
    %125 = vector.broadcast %124 : vector<1x256xi1> to vector<4x256xi1>
    %126 = vector.broadcast %cst : f32 to vector<4x256xf32>
    %127 = arith.select %125, %123, %126 : vector<4x256xi1>, vector<4x256xf32>
    %c2_i32_63 = arith.constant 2 : i32
    %128 = tpu.dynamic_rotate %120 by %c2_i32_63 dim 1 : vector<4x256xf32>, i32 -> vector<4x256xf32>
    %cst_64 = arith.constant 0.000000e+00 : f32
    %129 = vector.shape_cast %73 : vector<1x256xi1> to vector<1x256xi1>
    %130 = vector.broadcast %129 : vector<1x256xi1> to vector<4x256xi1>
    %131 = vector.broadcast %cst_64 : f32 to vector<4x256xf32>
    %132 = arith.select %130, %128, %131 : vector<4x256xi1>, vector<4x256xf32>
    %c1_i32_65 = arith.constant 1 : i32
    %133 = tpu.dynamic_rotate %120 by %c1_i32_65 dim 1 : vector<4x256xf32>, i32 -> vector<4x256xf32>
    %cst_66 = arith.constant 0.000000e+00 : f32
    %134 = vector.shape_cast %82 : vector<1x256xi1> to vector<1x256xi1>
    %135 = vector.broadcast %134 : vector<1x256xi1> to vector<4x256xi1>
    %136 = vector.broadcast %cst_66 : f32 to vector<4x256xf32>
    %137 = arith.select %135, %133, %136 : vector<4x256xi1>, vector<4x256xf32>
    %c255_i32 = arith.constant 255 : i32
    %138 = tpu.dynamic_rotate %120 by %c255_i32 dim 1 : vector<4x256xf32>, i32 -> vector<4x256xf32>
    %cst_67 = arith.constant 0.000000e+00 : f32
    %139 = vector.shape_cast %91 : vector<1x256xi1> to vector<1x256xi1>
    %140 = vector.broadcast %139 : vector<1x256xi1> to vector<4x256xi1>
    %141 = vector.broadcast %cst_67 : f32 to vector<4x256xf32>
    %142 = arith.select %140, %138, %141 : vector<4x256xi1>, vector<4x256xf32>
    %c254_i32 = arith.constant 254 : i32
    %143 = tpu.dynamic_rotate %120 by %c254_i32 dim 1 : vector<4x256xf32>, i32 -> vector<4x256xf32>
    %cst_68 = arith.constant 0.000000e+00 : f32
    %144 = vector.shape_cast %100 : vector<1x256xi1> to vector<1x256xi1>
    %145 = vector.broadcast %144 : vector<1x256xi1> to vector<4x256xi1>
    %146 = vector.broadcast %cst_68 : f32 to vector<4x256xf32>
    %147 = arith.select %145, %143, %146 : vector<4x256xi1>, vector<4x256xf32>
    %c253_i32 = arith.constant 253 : i32
    %148 = tpu.dynamic_rotate %120 by %c253_i32 dim 1 : vector<4x256xf32>, i32 -> vector<4x256xf32>
    %cst_69 = arith.constant 0.000000e+00 : f32
    %149 = vector.shape_cast %109 : vector<1x256xi1> to vector<1x256xi1>
    %150 = vector.broadcast %149 : vector<1x256xi1> to vector<4x256xi1>
    %151 = vector.broadcast %cst_69 : f32 to vector<4x256xf32>
    %152 = arith.select %150, %148, %151 : vector<4x256xi1>, vector<4x256xf32>
    %153 = vector.extract_strided_slice %122 {offsets = [0, 0], sizes = [4, 1], strides = [1, 1]} : vector<4x49xf32> to vector<4x1xf32>
    %154 = vector.broadcast %153 : vector<4x1xf32> to vector<4x256xf32>
    %155 = arith.mulf %127, %154 : vector<4x256xf32>
    %156 = vector.extract_strided_slice %122 {offsets = [0, 1], sizes = [4, 1], strides = [1, 1]} : vector<4x49xf32> to vector<4x1xf32>
    %157 = vector.broadcast %156 : vector<4x1xf32> to vector<4x256xf32>
    %158 = arith.mulf %132, %157 : vector<4x256xf32>
    %159 = arith.addf %155, %158 : vector<4x256xf32>
    %160 = vector.extract_strided_slice %122 {offsets = [0, 2], sizes = [4, 1], strides = [1, 1]} : vector<4x49xf32> to vector<4x1xf32>
    %161 = vector.broadcast %160 : vector<4x1xf32> to vector<4x256xf32>
    %162 = arith.mulf %137, %161 : vector<4x256xf32>
    %163 = arith.addf %159, %162 : vector<4x256xf32>
    %164 = vector.extract_strided_slice %122 {offsets = [0, 3], sizes = [4, 1], strides = [1, 1]} : vector<4x49xf32> to vector<4x1xf32>
    %165 = vector.broadcast %164 : vector<4x1xf32> to vector<4x256xf32>
    %166 = arith.mulf %120, %165 : vector<4x256xf32>
    %167 = arith.addf %163, %166 : vector<4x256xf32>
    %168 = vector.extract_strided_slice %122 {offsets = [0, 4], sizes = [4, 1], strides = [1, 1]} : vector<4x49xf32> to vector<4x1xf32>
    %169 = vector.broadcast %168 : vector<4x1xf32> to vector<4x256xf32>
    %170 = arith.mulf %142, %169 : vector<4x256xf32>
    %171 = arith.addf %167, %170 : vector<4x256xf32>
    %172 = vector.extract_strided_slice %122 {offsets = [0, 5], sizes = [4, 1], strides = [1, 1]} : vector<4x49xf32> to vector<4x1xf32>
    %173 = vector.broadcast %172 : vector<4x1xf32> to vector<4x256xf32>
    %174 = arith.mulf %147, %173 : vector<4x256xf32>
    %175 = arith.addf %171, %174 : vector<4x256xf32>
    %176 = vector.extract_strided_slice %122 {offsets = [0, 6], sizes = [4, 1], strides = [1, 1]} : vector<4x49xf32> to vector<4x1xf32>
    %177 = vector.broadcast %176 : vector<4x1xf32> to vector<4x256xf32>
    %178 = arith.mulf %152, %177 : vector<4x256xf32>
    %179 = arith.addf %175, %178 : vector<4x256xf32>
    %c48_i32 = arith.constant 48 : i32
    %180 = tpu.dynamic_rotate %179 by %c48_i32 dim 1 : vector<4x256xf32>, i32 -> vector<4x256xf32>
    %cst_70 = arith.constant 0.000000e+00 : f32
    %181 = vector.shape_cast %10 : vector<1x256xi1> to vector<1x256xi1>
    %182 = vector.broadcast %181 : vector<1x256xi1> to vector<4x256xi1>
    %183 = vector.broadcast %cst_70 : f32 to vector<4x256xf32>
    %184 = arith.select %182, %180, %183 : vector<4x256xi1>, vector<4x256xf32>
    %185 = vector.extract_strided_slice %122 {offsets = [0, 7], sizes = [4, 1], strides = [1, 1]} : vector<4x49xf32> to vector<4x1xf32>
    %186 = vector.broadcast %185 : vector<4x1xf32> to vector<4x256xf32>
    %187 = arith.mulf %127, %186 : vector<4x256xf32>
    %188 = vector.extract_strided_slice %122 {offsets = [0, 8], sizes = [4, 1], strides = [1, 1]} : vector<4x49xf32> to vector<4x1xf32>
    %189 = vector.broadcast %188 : vector<4x1xf32> to vector<4x256xf32>
    %190 = arith.mulf %132, %189 : vector<4x256xf32>
    %191 = arith.addf %187, %190 : vector<4x256xf32>
    %192 = vector.extract_strided_slice %122 {offsets = [0, 9], sizes = [4, 1], strides = [1, 1]} : vector<4x49xf32> to vector<4x1xf32>
    %193 = vector.broadcast %192 : vector<4x1xf32> to vector<4x256xf32>
    %194 = arith.mulf %137, %193 : vector<4x256xf32>
    %195 = arith.addf %191, %194 : vector<4x256xf32>
    %196 = vector.extract_strided_slice %122 {offsets = [0, 10], sizes = [4, 1], strides = [1, 1]} : vector<4x49xf32> to vector<4x1xf32>
    %197 = vector.broadcast %196 : vector<4x1xf32> to vector<4x256xf32>
    %198 = arith.mulf %120, %197 : vector<4x256xf32>
    %199 = arith.addf %195, %198 : vector<4x256xf32>
    %200 = vector.extract_strided_slice %122 {offsets = [0, 11], sizes = [4, 1], strides = [1, 1]} : vector<4x49xf32> to vector<4x1xf32>
    %201 = vector.broadcast %200 : vector<4x1xf32> to vector<4x256xf32>
    %202 = arith.mulf %142, %201 : vector<4x256xf32>
    %203 = arith.addf %199, %202 : vector<4x256xf32>
    %204 = vector.extract_strided_slice %122 {offsets = [0, 12], sizes = [4, 1], strides = [1, 1]} : vector<4x49xf32> to vector<4x1xf32>
    %205 = vector.broadcast %204 : vector<4x1xf32> to vector<4x256xf32>
    %206 = arith.mulf %147, %205 : vector<4x256xf32>
    %207 = arith.addf %203, %206 : vector<4x256xf32>
    %208 = vector.extract_strided_slice %122 {offsets = [0, 13], sizes = [4, 1], strides = [1, 1]} : vector<4x49xf32> to vector<4x1xf32>
    %209 = vector.broadcast %208 : vector<4x1xf32> to vector<4x256xf32>
    %210 = arith.mulf %152, %209 : vector<4x256xf32>
    %211 = arith.addf %207, %210 : vector<4x256xf32>
    %c32_i32 = arith.constant 32 : i32
    %212 = tpu.dynamic_rotate %211 by %c32_i32 dim 1 : vector<4x256xf32>, i32 -> vector<4x256xf32>
    %cst_71 = arith.constant 0.000000e+00 : f32
    %213 = vector.shape_cast %19 : vector<1x256xi1> to vector<1x256xi1>
    %214 = vector.broadcast %213 : vector<1x256xi1> to vector<4x256xi1>
    %215 = vector.broadcast %cst_71 : f32 to vector<4x256xf32>
    %216 = arith.select %214, %212, %215 : vector<4x256xi1>, vector<4x256xf32>
    %217 = arith.addf %184, %216 : vector<4x256xf32>
    %218 = vector.extract_strided_slice %122 {offsets = [0, 14], sizes = [4, 1], strides = [1, 1]} : vector<4x49xf32> to vector<4x1xf32>
    %219 = vector.broadcast %218 : vector<4x1xf32> to vector<4x256xf32>
    %220 = arith.mulf %127, %219 : vector<4x256xf32>
    %221 = vector.extract_strided_slice %122 {offsets = [0, 15], sizes = [4, 1], strides = [1, 1]} : vector<4x49xf32> to vector<4x1xf32>
    %222 = vector.broadcast %221 : vector<4x1xf32> to vector<4x256xf32>
    %223 = arith.mulf %132, %222 : vector<4x256xf32>
    %224 = arith.addf %220, %223 : vector<4x256xf32>
    %225 = vector.extract_strided_slice %122 {offsets = [0, 16], sizes = [4, 1], strides = [1, 1]} : vector<4x49xf32> to vector<4x1xf32>
    %226 = vector.broadcast %225 : vector<4x1xf32> to vector<4x256xf32>
    %227 = arith.mulf %137, %226 : vector<4x256xf32>
    %228 = arith.addf %224, %227 : vector<4x256xf32>
    %229 = vector.extract_strided_slice %122 {offsets = [0, 17], sizes = [4, 1], strides = [1, 1]} : vector<4x49xf32> to vector<4x1xf32>
    %230 = vector.broadcast %229 : vector<4x1xf32> to vector<4x256xf32>
    %231 = arith.mulf %120, %230 : vector<4x256xf32>
    %232 = arith.addf %228, %231 : vector<4x256xf32>
    %233 = vector.extract_strided_slice %122 {offsets = [0, 18], sizes = [4, 1], strides = [1, 1]} : vector<4x49xf32> to vector<4x1xf32>
    %234 = vector.broadcast %233 : vector<4x1xf32> to vector<4x256xf32>
    %235 = arith.mulf %142, %234 : vector<4x256xf32>
    %236 = arith.addf %232, %235 : vector<4x256xf32>
    %237 = vector.extract_strided_slice %122 {offsets = [0, 19], sizes = [4, 1], strides = [1, 1]} : vector<4x49xf32> to vector<4x1xf32>
    %238 = vector.broadcast %237 : vector<4x1xf32> to vector<4x256xf32>
    %239 = arith.mulf %147, %238 : vector<4x256xf32>
    %240 = arith.addf %236, %239 : vector<4x256xf32>
    %241 = vector.extract_strided_slice %122 {offsets = [0, 20], sizes = [4, 1], strides = [1, 1]} : vector<4x49xf32> to vector<4x1xf32>
    %242 = vector.broadcast %241 : vector<4x1xf32> to vector<4x256xf32>
    %243 = arith.mulf %152, %242 : vector<4x256xf32>
    %244 = arith.addf %240, %243 : vector<4x256xf32>
    %c16_i32_72 = arith.constant 16 : i32
    %245 = tpu.dynamic_rotate %244 by %c16_i32_72 dim 1 : vector<4x256xf32>, i32 -> vector<4x256xf32>
    %cst_73 = arith.constant 0.000000e+00 : f32
    %246 = vector.shape_cast %28 : vector<1x256xi1> to vector<1x256xi1>
    %247 = vector.broadcast %246 : vector<1x256xi1> to vector<4x256xi1>
    %248 = vector.broadcast %cst_73 : f32 to vector<4x256xf32>
    %249 = arith.select %247, %245, %248 : vector<4x256xi1>, vector<4x256xf32>
    %250 = arith.addf %217, %249 : vector<4x256xf32>
    %251 = vector.extract_strided_slice %122 {offsets = [0, 21], sizes = [4, 1], strides = [1, 1]} : vector<4x49xf32> to vector<4x1xf32>
    %252 = vector.broadcast %251 : vector<4x1xf32> to vector<4x256xf32>
    %253 = arith.mulf %127, %252 : vector<4x256xf32>
    %254 = vector.extract_strided_slice %122 {offsets = [0, 22], sizes = [4, 1], strides = [1, 1]} : vector<4x49xf32> to vector<4x1xf32>
    %255 = vector.broadcast %254 : vector<4x1xf32> to vector<4x256xf32>
    %256 = arith.mulf %132, %255 : vector<4x256xf32>
    %257 = arith.addf %253, %256 : vector<4x256xf32>
    %258 = vector.extract_strided_slice %122 {offsets = [0, 23], sizes = [4, 1], strides = [1, 1]} : vector<4x49xf32> to vector<4x1xf32>
    %259 = vector.broadcast %258 : vector<4x1xf32> to vector<4x256xf32>
    %260 = arith.mulf %137, %259 : vector<4x256xf32>
    %261 = arith.addf %257, %260 : vector<4x256xf32>
    %262 = vector.extract_strided_slice %122 {offsets = [0, 24], sizes = [4, 1], strides = [1, 1]} : vector<4x49xf32> to vector<4x1xf32>
    %263 = vector.broadcast %262 : vector<4x1xf32> to vector<4x256xf32>
    %264 = arith.mulf %120, %263 : vector<4x256xf32>
    %265 = arith.addf %261, %264 : vector<4x256xf32>
    %266 = vector.extract_strided_slice %122 {offsets = [0, 25], sizes = [4, 1], strides = [1, 1]} : vector<4x49xf32> to vector<4x1xf32>
    %267 = vector.broadcast %266 : vector<4x1xf32> to vector<4x256xf32>
    %268 = arith.mulf %142, %267 : vector<4x256xf32>
    %269 = arith.addf %265, %268 : vector<4x256xf32>
    %270 = vector.extract_strided_slice %122 {offsets = [0, 26], sizes = [4, 1], strides = [1, 1]} : vector<4x49xf32> to vector<4x1xf32>
    %271 = vector.broadcast %270 : vector<4x1xf32> to vector<4x256xf32>
    %272 = arith.mulf %147, %271 : vector<4x256xf32>
    %273 = arith.addf %269, %272 : vector<4x256xf32>
    %274 = vector.extract_strided_slice %122 {offsets = [0, 27], sizes = [4, 1], strides = [1, 1]} : vector<4x49xf32> to vector<4x1xf32>
    %275 = vector.broadcast %274 : vector<4x1xf32> to vector<4x256xf32>
    %276 = arith.mulf %152, %275 : vector<4x256xf32>
    %277 = arith.addf %273, %276 : vector<4x256xf32>
    %278 = arith.addf %250, %277 : vector<4x256xf32>
    %279 = vector.extract_strided_slice %122 {offsets = [0, 28], sizes = [4, 1], strides = [1, 1]} : vector<4x49xf32> to vector<4x1xf32>
    %280 = vector.broadcast %279 : vector<4x1xf32> to vector<4x256xf32>
    %281 = arith.mulf %127, %280 : vector<4x256xf32>
    %282 = vector.extract_strided_slice %122 {offsets = [0, 29], sizes = [4, 1], strides = [1, 1]} : vector<4x49xf32> to vector<4x1xf32>
    %283 = vector.broadcast %282 : vector<4x1xf32> to vector<4x256xf32>
    %284 = arith.mulf %132, %283 : vector<4x256xf32>
    %285 = arith.addf %281, %284 : vector<4x256xf32>
    %286 = vector.extract_strided_slice %122 {offsets = [0, 30], sizes = [4, 1], strides = [1, 1]} : vector<4x49xf32> to vector<4x1xf32>
    %287 = vector.broadcast %286 : vector<4x1xf32> to vector<4x256xf32>
    %288 = arith.mulf %137, %287 : vector<4x256xf32>
    %289 = arith.addf %285, %288 : vector<4x256xf32>
    %290 = vector.extract_strided_slice %122 {offsets = [0, 31], sizes = [4, 1], strides = [1, 1]} : vector<4x49xf32> to vector<4x1xf32>
    %291 = vector.broadcast %290 : vector<4x1xf32> to vector<4x256xf32>
    %292 = arith.mulf %120, %291 : vector<4x256xf32>
    %293 = arith.addf %289, %292 : vector<4x256xf32>
    %294 = vector.extract_strided_slice %122 {offsets = [0, 32], sizes = [4, 1], strides = [1, 1]} : vector<4x49xf32> to vector<4x1xf32>
    %295 = vector.broadcast %294 : vector<4x1xf32> to vector<4x256xf32>
    %296 = arith.mulf %142, %295 : vector<4x256xf32>
    %297 = arith.addf %293, %296 : vector<4x256xf32>
    %298 = vector.extract_strided_slice %122 {offsets = [0, 33], sizes = [4, 1], strides = [1, 1]} : vector<4x49xf32> to vector<4x1xf32>
    %299 = vector.broadcast %298 : vector<4x1xf32> to vector<4x256xf32>
    %300 = arith.mulf %147, %299 : vector<4x256xf32>
    %301 = arith.addf %297, %300 : vector<4x256xf32>
    %302 = vector.extract_strided_slice %122 {offsets = [0, 34], sizes = [4, 1], strides = [1, 1]} : vector<4x49xf32> to vector<4x1xf32>
    %303 = vector.broadcast %302 : vector<4x1xf32> to vector<4x256xf32>
    %304 = arith.mulf %152, %303 : vector<4x256xf32>
    %305 = arith.addf %301, %304 : vector<4x256xf32>
    %c240_i32 = arith.constant 240 : i32
    %306 = tpu.dynamic_rotate %305 by %c240_i32 dim 1 : vector<4x256xf32>, i32 -> vector<4x256xf32>
    %cst_74 = arith.constant 0.000000e+00 : f32
    %307 = vector.shape_cast %37 : vector<1x256xi1> to vector<1x256xi1>
    %308 = vector.broadcast %307 : vector<1x256xi1> to vector<4x256xi1>
    %309 = vector.broadcast %cst_74 : f32 to vector<4x256xf32>
    %310 = arith.select %308, %306, %309 : vector<4x256xi1>, vector<4x256xf32>
    %311 = arith.addf %278, %310 : vector<4x256xf32>
    %312 = vector.extract_strided_slice %122 {offsets = [0, 35], sizes = [4, 1], strides = [1, 1]} : vector<4x49xf32> to vector<4x1xf32>
    %313 = vector.broadcast %312 : vector<4x1xf32> to vector<4x256xf32>
    %314 = arith.mulf %127, %313 : vector<4x256xf32>
    %315 = vector.extract_strided_slice %122 {offsets = [0, 36], sizes = [4, 1], strides = [1, 1]} : vector<4x49xf32> to vector<4x1xf32>
    %316 = vector.broadcast %315 : vector<4x1xf32> to vector<4x256xf32>
    %317 = arith.mulf %132, %316 : vector<4x256xf32>
    %318 = arith.addf %314, %317 : vector<4x256xf32>
    %319 = vector.extract_strided_slice %122 {offsets = [0, 37], sizes = [4, 1], strides = [1, 1]} : vector<4x49xf32> to vector<4x1xf32>
    %320 = vector.broadcast %319 : vector<4x1xf32> to vector<4x256xf32>
    %321 = arith.mulf %137, %320 : vector<4x256xf32>
    %322 = arith.addf %318, %321 : vector<4x256xf32>
    %323 = vector.extract_strided_slice %122 {offsets = [0, 38], sizes = [4, 1], strides = [1, 1]} : vector<4x49xf32> to vector<4x1xf32>
    %324 = vector.broadcast %323 : vector<4x1xf32> to vector<4x256xf32>
    %325 = arith.mulf %120, %324 : vector<4x256xf32>
    %326 = arith.addf %322, %325 : vector<4x256xf32>
    %327 = vector.extract_strided_slice %122 {offsets = [0, 39], sizes = [4, 1], strides = [1, 1]} : vector<4x49xf32> to vector<4x1xf32>
    %328 = vector.broadcast %327 : vector<4x1xf32> to vector<4x256xf32>
    %329 = arith.mulf %142, %328 : vector<4x256xf32>
    %330 = arith.addf %326, %329 : vector<4x256xf32>
    %331 = vector.extract_strided_slice %122 {offsets = [0, 40], sizes = [4, 1], strides = [1, 1]} : vector<4x49xf32> to vector<4x1xf32>
    %332 = vector.broadcast %331 : vector<4x1xf32> to vector<4x256xf32>
    %333 = arith.mulf %147, %332 : vector<4x256xf32>
    %334 = arith.addf %330, %333 : vector<4x256xf32>
    %335 = vector.extract_strided_slice %122 {offsets = [0, 41], sizes = [4, 1], strides = [1, 1]} : vector<4x49xf32> to vector<4x1xf32>
    %336 = vector.broadcast %335 : vector<4x1xf32> to vector<4x256xf32>
    %337 = arith.mulf %152, %336 : vector<4x256xf32>
    %338 = arith.addf %334, %337 : vector<4x256xf32>
    %c224_i32 = arith.constant 224 : i32
    %339 = tpu.dynamic_rotate %338 by %c224_i32 dim 1 : vector<4x256xf32>, i32 -> vector<4x256xf32>
    %cst_75 = arith.constant 0.000000e+00 : f32
    %340 = vector.shape_cast %46 : vector<1x256xi1> to vector<1x256xi1>
    %341 = vector.broadcast %340 : vector<1x256xi1> to vector<4x256xi1>
    %342 = vector.broadcast %cst_75 : f32 to vector<4x256xf32>
    %343 = arith.select %341, %339, %342 : vector<4x256xi1>, vector<4x256xf32>
    %344 = arith.addf %311, %343 : vector<4x256xf32>
    %345 = vector.extract_strided_slice %122 {offsets = [0, 42], sizes = [4, 1], strides = [1, 1]} : vector<4x49xf32> to vector<4x1xf32>
    %346 = vector.broadcast %345 : vector<4x1xf32> to vector<4x256xf32>
    %347 = arith.mulf %127, %346 : vector<4x256xf32>
    %348 = vector.extract_strided_slice %122 {offsets = [0, 43], sizes = [4, 1], strides = [1, 1]} : vector<4x49xf32> to vector<4x1xf32>
    %349 = vector.broadcast %348 : vector<4x1xf32> to vector<4x256xf32>
    %350 = arith.mulf %132, %349 : vector<4x256xf32>
    %351 = arith.addf %347, %350 : vector<4x256xf32>
    %352 = vector.extract_strided_slice %122 {offsets = [0, 44], sizes = [4, 1], strides = [1, 1]} : vector<4x49xf32> to vector<4x1xf32>
    %353 = vector.broadcast %352 : vector<4x1xf32> to vector<4x256xf32>
    %354 = arith.mulf %137, %353 : vector<4x256xf32>
    %355 = arith.addf %351, %354 : vector<4x256xf32>
    %356 = vector.extract_strided_slice %122 {offsets = [0, 45], sizes = [4, 1], strides = [1, 1]} : vector<4x49xf32> to vector<4x1xf32>
    %357 = vector.broadcast %356 : vector<4x1xf32> to vector<4x256xf32>
    %358 = arith.mulf %120, %357 : vector<4x256xf32>
    %359 = arith.addf %355, %358 : vector<4x256xf32>
    %360 = vector.extract_strided_slice %122 {offsets = [0, 46], sizes = [4, 1], strides = [1, 1]} : vector<4x49xf32> to vector<4x1xf32>
    %361 = vector.broadcast %360 : vector<4x1xf32> to vector<4x256xf32>
    %362 = arith.mulf %142, %361 : vector<4x256xf32>
    %363 = arith.addf %359, %362 : vector<4x256xf32>
    %364 = vector.extract_strided_slice %122 {offsets = [0, 47], sizes = [4, 1], strides = [1, 1]} : vector<4x49xf32> to vector<4x1xf32>
    %365 = vector.broadcast %364 : vector<4x1xf32> to vector<4x256xf32>
    %366 = arith.mulf %147, %365 : vector<4x256xf32>
    %367 = arith.addf %363, %366 : vector<4x256xf32>
    %368 = vector.extract_strided_slice %122 {offsets = [0, 48], sizes = [4, 1], strides = [1, 1]} : vector<4x49xf32> to vector<4x1xf32>
    %369 = vector.broadcast %368 : vector<4x1xf32> to vector<4x256xf32>
    %370 = arith.mulf %152, %369 : vector<4x256xf32>
    %371 = arith.addf %367, %370 : vector<4x256xf32>
    %c208_i32 = arith.constant 208 : i32
    %372 = tpu.dynamic_rotate %371 by %c208_i32 dim 1 : vector<4x256xf32>, i32 -> vector<4x256xf32>
    %cst_76 = arith.constant 0.000000e+00 : f32
    %373 = vector.shape_cast %55 : vector<1x256xi1> to vector<1x256xi1>
    %374 = vector.broadcast %373 : vector<1x256xi1> to vector<4x256xi1>
    %375 = vector.broadcast %cst_76 : f32 to vector<4x256xf32>
    %376 = arith.select %374, %372, %375 : vector<4x256xi1>, vector<4x256xf32>
    %377 = arith.addf %344, %376 : vector<4x256xf32>
    %378 = vector.broadcast %111 : vector<4x1xf32> to vector<4x256xf32>
    %379 = arith.addf %377, %378 : vector<4x256xf32>
    %cst_77 = arith.constant dense<0.000000e+00> : vector<32x256xf32>
    %380 = tpu.matmul %116, %379, %cst_77 {dimension_numbers = #tpu.dot_dimension_numbers<[1], [0], [0], [1], [0, 0, 1, 1], [], []>} : vector<32x4xf32>, vector<4x256xf32>, vector<32x256xf32> -> vector<32x256xf32>
    %381 = vector.broadcast %117 : vector<32x1xf32> to vector<32x256xf32>
    %382 = arith.addf %380, %381 : vector<32x256xf32>
    %383 = vector.extract_strided_slice %382 {offsets = [0, 0], sizes = [16, 256], strides = [1, 1]} : vector<32x256xf32> to vector<16x256xf32>
    %384 = vector.extract_strided_slice %382 {offsets = [16, 0], sizes = [16, 256], strides = [1, 1]} : vector<32x256xf32> to vector<16x256xf32>
    %cst_78 = arith.constant 0.000000e+00 : f32
    %cst_79 = arith.constant 6.000000e+00 : f32
    %385 = vector.broadcast %cst_78 : f32 to vector<16x256xf32>
    %386 = arith.maximumf %385, %383 : vector<16x256xf32>
    %387 = vector.broadcast %cst_79 : f32 to vector<16x256xf32>
    %388 = arith.minimumf %387, %386 : vector<16x256xf32>
    %389 = arith.mulf %388, %384 : vector<16x256xf32>
    %cst_80 = arith.constant dense<0.000000e+00> : vector<4x256xf32>
    %390 = tpu.matmul %118, %389, %cst_80 {dimension_numbers = #tpu.dot_dimension_numbers<[1], [0], [0], [1], [0, 0, 1, 1], [], []>} : vector<4x16xf32>, vector<16x256xf32>, vector<4x256xf32> -> vector<4x256xf32>
    %391 = vector.broadcast %113 : vector<4x1xf32> to vector<4x256xf32>
    %392 = arith.addf %390, %391 : vector<4x256xf32>
    %c1_81 = arith.constant 1 : index
    %c0_82 = arith.constant 0 : index
    %c0_83 = arith.constant 0 : index
    %393 = vector.load %arg3[%c1_81, %c0_82, %c0_83] : memref<2x4x49xf32, #tpu.memory_space<vmem>>, vector<1x4x49xf32>
    %394 = vector.shape_cast %393 : vector<1x4x49xf32> to vector<4x49xf32>
    %c3_i32_84 = arith.constant 3 : i32
    %395 = tpu.dynamic_rotate %392 by %c3_i32_84 dim 1 : vector<4x256xf32>, i32 -> vector<4x256xf32>
    %cst_85 = arith.constant 0.000000e+00 : f32
    %396 = vector.shape_cast %64 : vector<1x256xi1> to vector<1x256xi1>
    %397 = vector.broadcast %396 : vector<1x256xi1> to vector<4x256xi1>
    %398 = vector.broadcast %cst_85 : f32 to vector<4x256xf32>
    %399 = arith.select %397, %395, %398 : vector<4x256xi1>, vector<4x256xf32>
    %c2_i32_86 = arith.constant 2 : i32
    %400 = tpu.dynamic_rotate %392 by %c2_i32_86 dim 1 : vector<4x256xf32>, i32 -> vector<4x256xf32>
    %cst_87 = arith.constant 0.000000e+00 : f32
    %401 = vector.shape_cast %73 : vector<1x256xi1> to vector<1x256xi1>
    %402 = vector.broadcast %401 : vector<1x256xi1> to vector<4x256xi1>
    %403 = vector.broadcast %cst_87 : f32 to vector<4x256xf32>
    %404 = arith.select %402, %400, %403 : vector<4x256xi1>, vector<4x256xf32>
    %c1_i32_88 = arith.constant 1 : i32
    %405 = tpu.dynamic_rotate %392 by %c1_i32_88 dim 1 : vector<4x256xf32>, i32 -> vector<4x256xf32>
    %cst_89 = arith.constant 0.000000e+00 : f32
    %406 = vector.shape_cast %82 : vector<1x256xi1> to vector<1x256xi1>
    %407 = vector.broadcast %406 : vector<1x256xi1> to vector<4x256xi1>
    %408 = vector.broadcast %cst_89 : f32 to vector<4x256xf32>
    %409 = arith.select %407, %405, %408 : vector<4x256xi1>, vector<4x256xf32>
    %c255_i32_90 = arith.constant 255 : i32
    %410 = tpu.dynamic_rotate %392 by %c255_i32_90 dim 1 : vector<4x256xf32>, i32 -> vector<4x256xf32>
    %cst_91 = arith.constant 0.000000e+00 : f32
    %411 = vector.shape_cast %91 : vector<1x256xi1> to vector<1x256xi1>
    %412 = vector.broadcast %411 : vector<1x256xi1> to vector<4x256xi1>
    %413 = vector.broadcast %cst_91 : f32 to vector<4x256xf32>
    %414 = arith.select %412, %410, %413 : vector<4x256xi1>, vector<4x256xf32>
    %c254_i32_92 = arith.constant 254 : i32
    %415 = tpu.dynamic_rotate %392 by %c254_i32_92 dim 1 : vector<4x256xf32>, i32 -> vector<4x256xf32>
    %cst_93 = arith.constant 0.000000e+00 : f32
    %416 = vector.shape_cast %100 : vector<1x256xi1> to vector<1x256xi1>
    %417 = vector.broadcast %416 : vector<1x256xi1> to vector<4x256xi1>
    %418 = vector.broadcast %cst_93 : f32 to vector<4x256xf32>
    %419 = arith.select %417, %415, %418 : vector<4x256xi1>, vector<4x256xf32>
    %c253_i32_94 = arith.constant 253 : i32
    %420 = tpu.dynamic_rotate %392 by %c253_i32_94 dim 1 : vector<4x256xf32>, i32 -> vector<4x256xf32>
    %cst_95 = arith.constant 0.000000e+00 : f32
    %421 = vector.shape_cast %109 : vector<1x256xi1> to vector<1x256xi1>
    %422 = vector.broadcast %421 : vector<1x256xi1> to vector<4x256xi1>
    %423 = vector.broadcast %cst_95 : f32 to vector<4x256xf32>
    %424 = arith.select %422, %420, %423 : vector<4x256xi1>, vector<4x256xf32>
    %425 = vector.extract_strided_slice %394 {offsets = [0, 0], sizes = [4, 1], strides = [1, 1]} : vector<4x49xf32> to vector<4x1xf32>
    %426 = vector.broadcast %425 : vector<4x1xf32> to vector<4x256xf32>
    %427 = arith.mulf %399, %426 : vector<4x256xf32>
    %428 = vector.extract_strided_slice %394 {offsets = [0, 1], sizes = [4, 1], strides = [1, 1]} : vector<4x49xf32> to vector<4x1xf32>
    %429 = vector.broadcast %428 : vector<4x1xf32> to vector<4x256xf32>
    %430 = arith.mulf %404, %429 : vector<4x256xf32>
    %431 = arith.addf %427, %430 : vector<4x256xf32>
    %432 = vector.extract_strided_slice %394 {offsets = [0, 2], sizes = [4, 1], strides = [1, 1]} : vector<4x49xf32> to vector<4x1xf32>
    %433 = vector.broadcast %432 : vector<4x1xf32> to vector<4x256xf32>
    %434 = arith.mulf %409, %433 : vector<4x256xf32>
    %435 = arith.addf %431, %434 : vector<4x256xf32>
    %436 = vector.extract_strided_slice %394 {offsets = [0, 3], sizes = [4, 1], strides = [1, 1]} : vector<4x49xf32> to vector<4x1xf32>
    %437 = vector.broadcast %436 : vector<4x1xf32> to vector<4x256xf32>
    %438 = arith.mulf %392, %437 : vector<4x256xf32>
    %439 = arith.addf %435, %438 : vector<4x256xf32>
    %440 = vector.extract_strided_slice %394 {offsets = [0, 4], sizes = [4, 1], strides = [1, 1]} : vector<4x49xf32> to vector<4x1xf32>
    %441 = vector.broadcast %440 : vector<4x1xf32> to vector<4x256xf32>
    %442 = arith.mulf %414, %441 : vector<4x256xf32>
    %443 = arith.addf %439, %442 : vector<4x256xf32>
    %444 = vector.extract_strided_slice %394 {offsets = [0, 5], sizes = [4, 1], strides = [1, 1]} : vector<4x49xf32> to vector<4x1xf32>
    %445 = vector.broadcast %444 : vector<4x1xf32> to vector<4x256xf32>
    %446 = arith.mulf %419, %445 : vector<4x256xf32>
    %447 = arith.addf %443, %446 : vector<4x256xf32>
    %448 = vector.extract_strided_slice %394 {offsets = [0, 6], sizes = [4, 1], strides = [1, 1]} : vector<4x49xf32> to vector<4x1xf32>
    %449 = vector.broadcast %448 : vector<4x1xf32> to vector<4x256xf32>
    %450 = arith.mulf %424, %449 : vector<4x256xf32>
    %451 = arith.addf %447, %450 : vector<4x256xf32>
    %c48_i32_96 = arith.constant 48 : i32
    %452 = tpu.dynamic_rotate %451 by %c48_i32_96 dim 1 : vector<4x256xf32>, i32 -> vector<4x256xf32>
    %cst_97 = arith.constant 0.000000e+00 : f32
    %453 = vector.shape_cast %10 : vector<1x256xi1> to vector<1x256xi1>
    %454 = vector.broadcast %453 : vector<1x256xi1> to vector<4x256xi1>
    %455 = vector.broadcast %cst_97 : f32 to vector<4x256xf32>
    %456 = arith.select %454, %452, %455 : vector<4x256xi1>, vector<4x256xf32>
    %457 = vector.extract_strided_slice %394 {offsets = [0, 7], sizes = [4, 1], strides = [1, 1]} : vector<4x49xf32> to vector<4x1xf32>
    %458 = vector.broadcast %457 : vector<4x1xf32> to vector<4x256xf32>
    %459 = arith.mulf %399, %458 : vector<4x256xf32>
    %460 = vector.extract_strided_slice %394 {offsets = [0, 8], sizes = [4, 1], strides = [1, 1]} : vector<4x49xf32> to vector<4x1xf32>
    %461 = vector.broadcast %460 : vector<4x1xf32> to vector<4x256xf32>
    %462 = arith.mulf %404, %461 : vector<4x256xf32>
    %463 = arith.addf %459, %462 : vector<4x256xf32>
    %464 = vector.extract_strided_slice %394 {offsets = [0, 9], sizes = [4, 1], strides = [1, 1]} : vector<4x49xf32> to vector<4x1xf32>
    %465 = vector.broadcast %464 : vector<4x1xf32> to vector<4x256xf32>
    %466 = arith.mulf %409, %465 : vector<4x256xf32>
    %467 = arith.addf %463, %466 : vector<4x256xf32>
    %468 = vector.extract_strided_slice %394 {offsets = [0, 10], sizes = [4, 1], strides = [1, 1]} : vector<4x49xf32> to vector<4x1xf32>
    %469 = vector.broadcast %468 : vector<4x1xf32> to vector<4x256xf32>
    %470 = arith.mulf %392, %469 : vector<4x256xf32>
    %471 = arith.addf %467, %470 : vector<4x256xf32>
    %472 = vector.extract_strided_slice %394 {offsets = [0, 11], sizes = [4, 1], strides = [1, 1]} : vector<4x49xf32> to vector<4x1xf32>
    %473 = vector.broadcast %472 : vector<4x1xf32> to vector<4x256xf32>
    %474 = arith.mulf %414, %473 : vector<4x256xf32>
    %475 = arith.addf %471, %474 : vector<4x256xf32>
    %476 = vector.extract_strided_slice %394 {offsets = [0, 12], sizes = [4, 1], strides = [1, 1]} : vector<4x49xf32> to vector<4x1xf32>
    %477 = vector.broadcast %476 : vector<4x1xf32> to vector<4x256xf32>
    %478 = arith.mulf %419, %477 : vector<4x256xf32>
    %479 = arith.addf %475, %478 : vector<4x256xf32>
    %480 = vector.extract_strided_slice %394 {offsets = [0, 13], sizes = [4, 1], strides = [1, 1]} : vector<4x49xf32> to vector<4x1xf32>
    %481 = vector.broadcast %480 : vector<4x1xf32> to vector<4x256xf32>
    %482 = arith.mulf %424, %481 : vector<4x256xf32>
    %483 = arith.addf %479, %482 : vector<4x256xf32>
    %c32_i32_98 = arith.constant 32 : i32
    %484 = tpu.dynamic_rotate %483 by %c32_i32_98 dim 1 : vector<4x256xf32>, i32 -> vector<4x256xf32>
    %cst_99 = arith.constant 0.000000e+00 : f32
    %485 = vector.shape_cast %19 : vector<1x256xi1> to vector<1x256xi1>
    %486 = vector.broadcast %485 : vector<1x256xi1> to vector<4x256xi1>
    %487 = vector.broadcast %cst_99 : f32 to vector<4x256xf32>
    %488 = arith.select %486, %484, %487 : vector<4x256xi1>, vector<4x256xf32>
    %489 = arith.addf %456, %488 : vector<4x256xf32>
    %490 = vector.extract_strided_slice %394 {offsets = [0, 14], sizes = [4, 1], strides = [1, 1]} : vector<4x49xf32> to vector<4x1xf32>
    %491 = vector.broadcast %490 : vector<4x1xf32> to vector<4x256xf32>
    %492 = arith.mulf %399, %491 : vector<4x256xf32>
    %493 = vector.extract_strided_slice %394 {offsets = [0, 15], sizes = [4, 1], strides = [1, 1]} : vector<4x49xf32> to vector<4x1xf32>
    %494 = vector.broadcast %493 : vector<4x1xf32> to vector<4x256xf32>
    %495 = arith.mulf %404, %494 : vector<4x256xf32>
    %496 = arith.addf %492, %495 : vector<4x256xf32>
    %497 = vector.extract_strided_slice %394 {offsets = [0, 16], sizes = [4, 1], strides = [1, 1]} : vector<4x49xf32> to vector<4x1xf32>
    %498 = vector.broadcast %497 : vector<4x1xf32> to vector<4x256xf32>
    %499 = arith.mulf %409, %498 : vector<4x256xf32>
    %500 = arith.addf %496, %499 : vector<4x256xf32>
    %501 = vector.extract_strided_slice %394 {offsets = [0, 17], sizes = [4, 1], strides = [1, 1]} : vector<4x49xf32> to vector<4x1xf32>
    %502 = vector.broadcast %501 : vector<4x1xf32> to vector<4x256xf32>
    %503 = arith.mulf %392, %502 : vector<4x256xf32>
    %504 = arith.addf %500, %503 : vector<4x256xf32>
    %505 = vector.extract_strided_slice %394 {offsets = [0, 18], sizes = [4, 1], strides = [1, 1]} : vector<4x49xf32> to vector<4x1xf32>
    %506 = vector.broadcast %505 : vector<4x1xf32> to vector<4x256xf32>
    %507 = arith.mulf %414, %506 : vector<4x256xf32>
    %508 = arith.addf %504, %507 : vector<4x256xf32>
    %509 = vector.extract_strided_slice %394 {offsets = [0, 19], sizes = [4, 1], strides = [1, 1]} : vector<4x49xf32> to vector<4x1xf32>
    %510 = vector.broadcast %509 : vector<4x1xf32> to vector<4x256xf32>
    %511 = arith.mulf %419, %510 : vector<4x256xf32>
    %512 = arith.addf %508, %511 : vector<4x256xf32>
    %513 = vector.extract_strided_slice %394 {offsets = [0, 20], sizes = [4, 1], strides = [1, 1]} : vector<4x49xf32> to vector<4x1xf32>
    %514 = vector.broadcast %513 : vector<4x1xf32> to vector<4x256xf32>
    %515 = arith.mulf %424, %514 : vector<4x256xf32>
    %516 = arith.addf %512, %515 : vector<4x256xf32>
    %c16_i32_100 = arith.constant 16 : i32
    %517 = tpu.dynamic_rotate %516 by %c16_i32_100 dim 1 : vector<4x256xf32>, i32 -> vector<4x256xf32>
    %cst_101 = arith.constant 0.000000e+00 : f32
    %518 = vector.shape_cast %28 : vector<1x256xi1> to vector<1x256xi1>
    %519 = vector.broadcast %518 : vector<1x256xi1> to vector<4x256xi1>
    %520 = vector.broadcast %cst_101 : f32 to vector<4x256xf32>
    %521 = arith.select %519, %517, %520 : vector<4x256xi1>, vector<4x256xf32>
    %522 = arith.addf %489, %521 : vector<4x256xf32>
    %523 = vector.extract_strided_slice %394 {offsets = [0, 21], sizes = [4, 1], strides = [1, 1]} : vector<4x49xf32> to vector<4x1xf32>
    %524 = vector.broadcast %523 : vector<4x1xf32> to vector<4x256xf32>
    %525 = arith.mulf %399, %524 : vector<4x256xf32>
    %526 = vector.extract_strided_slice %394 {offsets = [0, 22], sizes = [4, 1], strides = [1, 1]} : vector<4x49xf32> to vector<4x1xf32>
    %527 = vector.broadcast %526 : vector<4x1xf32> to vector<4x256xf32>
    %528 = arith.mulf %404, %527 : vector<4x256xf32>
    %529 = arith.addf %525, %528 : vector<4x256xf32>
    %530 = vector.extract_strided_slice %394 {offsets = [0, 23], sizes = [4, 1], strides = [1, 1]} : vector<4x49xf32> to vector<4x1xf32>
    %531 = vector.broadcast %530 : vector<4x1xf32> to vector<4x256xf32>
    %532 = arith.mulf %409, %531 : vector<4x256xf32>
    %533 = arith.addf %529, %532 : vector<4x256xf32>
    %534 = vector.extract_strided_slice %394 {offsets = [0, 24], sizes = [4, 1], strides = [1, 1]} : vector<4x49xf32> to vector<4x1xf32>
    %535 = vector.broadcast %534 : vector<4x1xf32> to vector<4x256xf32>
    %536 = arith.mulf %392, %535 : vector<4x256xf32>
    %537 = arith.addf %533, %536 : vector<4x256xf32>
    %538 = vector.extract_strided_slice %394 {offsets = [0, 25], sizes = [4, 1], strides = [1, 1]} : vector<4x49xf32> to vector<4x1xf32>
    %539 = vector.broadcast %538 : vector<4x1xf32> to vector<4x256xf32>
    %540 = arith.mulf %414, %539 : vector<4x256xf32>
    %541 = arith.addf %537, %540 : vector<4x256xf32>
    %542 = vector.extract_strided_slice %394 {offsets = [0, 26], sizes = [4, 1], strides = [1, 1]} : vector<4x49xf32> to vector<4x1xf32>
    %543 = vector.broadcast %542 : vector<4x1xf32> to vector<4x256xf32>
    %544 = arith.mulf %419, %543 : vector<4x256xf32>
    %545 = arith.addf %541, %544 : vector<4x256xf32>
    %546 = vector.extract_strided_slice %394 {offsets = [0, 27], sizes = [4, 1], strides = [1, 1]} : vector<4x49xf32> to vector<4x1xf32>
    %547 = vector.broadcast %546 : vector<4x1xf32> to vector<4x256xf32>
    %548 = arith.mulf %424, %547 : vector<4x256xf32>
    %549 = arith.addf %545, %548 : vector<4x256xf32>
    %550 = arith.addf %522, %549 : vector<4x256xf32>
    %551 = vector.extract_strided_slice %394 {offsets = [0, 28], sizes = [4, 1], strides = [1, 1]} : vector<4x49xf32> to vector<4x1xf32>
    %552 = vector.broadcast %551 : vector<4x1xf32> to vector<4x256xf32>
    %553 = arith.mulf %399, %552 : vector<4x256xf32>
    %554 = vector.extract_strided_slice %394 {offsets = [0, 29], sizes = [4, 1], strides = [1, 1]} : vector<4x49xf32> to vector<4x1xf32>
    %555 = vector.broadcast %554 : vector<4x1xf32> to vector<4x256xf32>
    %556 = arith.mulf %404, %555 : vector<4x256xf32>
    %557 = arith.addf %553, %556 : vector<4x256xf32>
    %558 = vector.extract_strided_slice %394 {offsets = [0, 30], sizes = [4, 1], strides = [1, 1]} : vector<4x49xf32> to vector<4x1xf32>
    %559 = vector.broadcast %558 : vector<4x1xf32> to vector<4x256xf32>
    %560 = arith.mulf %409, %559 : vector<4x256xf32>
    %561 = arith.addf %557, %560 : vector<4x256xf32>
    %562 = vector.extract_strided_slice %394 {offsets = [0, 31], sizes = [4, 1], strides = [1, 1]} : vector<4x49xf32> to vector<4x1xf32>
    %563 = vector.broadcast %562 : vector<4x1xf32> to vector<4x256xf32>
    %564 = arith.mulf %392, %563 : vector<4x256xf32>
    %565 = arith.addf %561, %564 : vector<4x256xf32>
    %566 = vector.extract_strided_slice %394 {offsets = [0, 32], sizes = [4, 1], strides = [1, 1]} : vector<4x49xf32> to vector<4x1xf32>
    %567 = vector.broadcast %566 : vector<4x1xf32> to vector<4x256xf32>
    %568 = arith.mulf %414, %567 : vector<4x256xf32>
    %569 = arith.addf %565, %568 : vector<4x256xf32>
    %570 = vector.extract_strided_slice %394 {offsets = [0, 33], sizes = [4, 1], strides = [1, 1]} : vector<4x49xf32> to vector<4x1xf32>
    %571 = vector.broadcast %570 : vector<4x1xf32> to vector<4x256xf32>
    %572 = arith.mulf %419, %571 : vector<4x256xf32>
    %573 = arith.addf %569, %572 : vector<4x256xf32>
    %574 = vector.extract_strided_slice %394 {offsets = [0, 34], sizes = [4, 1], strides = [1, 1]} : vector<4x49xf32> to vector<4x1xf32>
    %575 = vector.broadcast %574 : vector<4x1xf32> to vector<4x256xf32>
    %576 = arith.mulf %424, %575 : vector<4x256xf32>
    %577 = arith.addf %573, %576 : vector<4x256xf32>
    %c240_i32_102 = arith.constant 240 : i32
    %578 = tpu.dynamic_rotate %577 by %c240_i32_102 dim 1 : vector<4x256xf32>, i32 -> vector<4x256xf32>
    %cst_103 = arith.constant 0.000000e+00 : f32
    %579 = vector.shape_cast %37 : vector<1x256xi1> to vector<1x256xi1>
    %580 = vector.broadcast %579 : vector<1x256xi1> to vector<4x256xi1>
    %581 = vector.broadcast %cst_103 : f32 to vector<4x256xf32>
    %582 = arith.select %580, %578, %581 : vector<4x256xi1>, vector<4x256xf32>
    %583 = arith.addf %550, %582 : vector<4x256xf32>
    %584 = vector.extract_strided_slice %394 {offsets = [0, 35], sizes = [4, 1], strides = [1, 1]} : vector<4x49xf32> to vector<4x1xf32>
    %585 = vector.broadcast %584 : vector<4x1xf32> to vector<4x256xf32>
    %586 = arith.mulf %399, %585 : vector<4x256xf32>
    %587 = vector.extract_strided_slice %394 {offsets = [0, 36], sizes = [4, 1], strides = [1, 1]} : vector<4x49xf32> to vector<4x1xf32>
    %588 = vector.broadcast %587 : vector<4x1xf32> to vector<4x256xf32>
    %589 = arith.mulf %404, %588 : vector<4x256xf32>
    %590 = arith.addf %586, %589 : vector<4x256xf32>
    %591 = vector.extract_strided_slice %394 {offsets = [0, 37], sizes = [4, 1], strides = [1, 1]} : vector<4x49xf32> to vector<4x1xf32>
    %592 = vector.broadcast %591 : vector<4x1xf32> to vector<4x256xf32>
    %593 = arith.mulf %409, %592 : vector<4x256xf32>
    %594 = arith.addf %590, %593 : vector<4x256xf32>
    %595 = vector.extract_strided_slice %394 {offsets = [0, 38], sizes = [4, 1], strides = [1, 1]} : vector<4x49xf32> to vector<4x1xf32>
    %596 = vector.broadcast %595 : vector<4x1xf32> to vector<4x256xf32>
    %597 = arith.mulf %392, %596 : vector<4x256xf32>
    %598 = arith.addf %594, %597 : vector<4x256xf32>
    %599 = vector.extract_strided_slice %394 {offsets = [0, 39], sizes = [4, 1], strides = [1, 1]} : vector<4x49xf32> to vector<4x1xf32>
    %600 = vector.broadcast %599 : vector<4x1xf32> to vector<4x256xf32>
    %601 = arith.mulf %414, %600 : vector<4x256xf32>
    %602 = arith.addf %598, %601 : vector<4x256xf32>
    %603 = vector.extract_strided_slice %394 {offsets = [0, 40], sizes = [4, 1], strides = [1, 1]} : vector<4x49xf32> to vector<4x1xf32>
    %604 = vector.broadcast %603 : vector<4x1xf32> to vector<4x256xf32>
    %605 = arith.mulf %419, %604 : vector<4x256xf32>
    %606 = arith.addf %602, %605 : vector<4x256xf32>
    %607 = vector.extract_strided_slice %394 {offsets = [0, 41], sizes = [4, 1], strides = [1, 1]} : vector<4x49xf32> to vector<4x1xf32>
    %608 = vector.broadcast %607 : vector<4x1xf32> to vector<4x256xf32>
    %609 = arith.mulf %424, %608 : vector<4x256xf32>
    %610 = arith.addf %606, %609 : vector<4x256xf32>
    %c224_i32_104 = arith.constant 224 : i32
    %611 = tpu.dynamic_rotate %610 by %c224_i32_104 dim 1 : vector<4x256xf32>, i32 -> vector<4x256xf32>
    %cst_105 = arith.constant 0.000000e+00 : f32
    %612 = vector.shape_cast %46 : vector<1x256xi1> to vector<1x256xi1>
    %613 = vector.broadcast %612 : vector<1x256xi1> to vector<4x256xi1>
    %614 = vector.broadcast %cst_105 : f32 to vector<4x256xf32>
    %615 = arith.select %613, %611, %614 : vector<4x256xi1>, vector<4x256xf32>
    %616 = arith.addf %583, %615 : vector<4x256xf32>
    %617 = vector.extract_strided_slice %394 {offsets = [0, 42], sizes = [4, 1], strides = [1, 1]} : vector<4x49xf32> to vector<4x1xf32>
    %618 = vector.broadcast %617 : vector<4x1xf32> to vector<4x256xf32>
    %619 = arith.mulf %399, %618 : vector<4x256xf32>
    %620 = vector.extract_strided_slice %394 {offsets = [0, 43], sizes = [4, 1], strides = [1, 1]} : vector<4x49xf32> to vector<4x1xf32>
    %621 = vector.broadcast %620 : vector<4x1xf32> to vector<4x256xf32>
    %622 = arith.mulf %404, %621 : vector<4x256xf32>
    %623 = arith.addf %619, %622 : vector<4x256xf32>
    %624 = vector.extract_strided_slice %394 {offsets = [0, 44], sizes = [4, 1], strides = [1, 1]} : vector<4x49xf32> to vector<4x1xf32>
    %625 = vector.broadcast %624 : vector<4x1xf32> to vector<4x256xf32>
    %626 = arith.mulf %409, %625 : vector<4x256xf32>
    %627 = arith.addf %623, %626 : vector<4x256xf32>
    %628 = vector.extract_strided_slice %394 {offsets = [0, 45], sizes = [4, 1], strides = [1, 1]} : vector<4x49xf32> to vector<4x1xf32>
    %629 = vector.broadcast %628 : vector<4x1xf32> to vector<4x256xf32>
    %630 = arith.mulf %392, %629 : vector<4x256xf32>
    %631 = arith.addf %627, %630 : vector<4x256xf32>
    %632 = vector.extract_strided_slice %394 {offsets = [0, 46], sizes = [4, 1], strides = [1, 1]} : vector<4x49xf32> to vector<4x1xf32>
    %633 = vector.broadcast %632 : vector<4x1xf32> to vector<4x256xf32>
    %634 = arith.mulf %414, %633 : vector<4x256xf32>
    %635 = arith.addf %631, %634 : vector<4x256xf32>
    %636 = vector.extract_strided_slice %394 {offsets = [0, 47], sizes = [4, 1], strides = [1, 1]} : vector<4x49xf32> to vector<4x1xf32>
    %637 = vector.broadcast %636 : vector<4x1xf32> to vector<4x256xf32>
    %638 = arith.mulf %419, %637 : vector<4x256xf32>
    %639 = arith.addf %635, %638 : vector<4x256xf32>
    %640 = vector.extract_strided_slice %394 {offsets = [0, 48], sizes = [4, 1], strides = [1, 1]} : vector<4x49xf32> to vector<4x1xf32>
    %641 = vector.broadcast %640 : vector<4x1xf32> to vector<4x256xf32>
    %642 = arith.mulf %424, %641 : vector<4x256xf32>
    %643 = arith.addf %639, %642 : vector<4x256xf32>
    %c208_i32_106 = arith.constant 208 : i32
    %644 = tpu.dynamic_rotate %643 by %c208_i32_106 dim 1 : vector<4x256xf32>, i32 -> vector<4x256xf32>
    %cst_107 = arith.constant 0.000000e+00 : f32
    %645 = vector.shape_cast %55 : vector<1x256xi1> to vector<1x256xi1>
    %646 = vector.broadcast %645 : vector<1x256xi1> to vector<4x256xi1>
    %647 = vector.broadcast %cst_107 : f32 to vector<4x256xf32>
    %648 = arith.select %646, %644, %647 : vector<4x256xi1>, vector<4x256xf32>
    %649 = arith.addf %616, %648 : vector<4x256xf32>
    %650 = vector.broadcast %115 : vector<4x1xf32> to vector<4x256xf32>
    %651 = arith.addf %649, %650 : vector<4x256xf32>
    %652 = arith.addf %120, %651 : vector<4x256xf32>
    %c0_108 = arith.constant 0 : index
    %c0_109 = arith.constant 0 : index
    %c0_110 = arith.constant 0 : index
    %653 = vector.load %arg8[%c0_108, %c0_109, %c0_110] : memref<2x4x256xf32, #tpu.memory_space<vmem>>, vector<1x4x256xf32>
    %654 = vector.shape_cast %653 : vector<1x4x256xf32> to vector<4x256xf32>
    %655 = vector.shape_cast %652 : vector<4x256xf32> to vector<1x4x256xf32>
    tpu.vector_store %arg8[%c0_108, %c0_109, %c0_110], %655 {strides = array<i32>} : memref<2x4x256xf32, #tpu.memory_space<vmem>>, vector<1x4x256xf32>,
    %c1_111 = arith.constant 1 : index
    %c0_112 = arith.constant 0 : index
    %c0_113 = arith.constant 0 : index
    %656 = vector.load %arg1[%c1_111, %c0_112, %c0_113] : memref<2x4x256xf32, #tpu.memory_space<vmem>>, vector<1x4x256xf32>
    %657 = vector.shape_cast %656 : vector<1x4x256xf32> to vector<4x256xf32>
    %c0_114 = arith.constant 0 : index
    %c0_115 = arith.constant 0 : index
    %c0_116 = arith.constant 0 : index
    %658 = vector.load %arg3[%c0_114, %c0_115, %c0_116] : memref<2x4x49xf32, #tpu.memory_space<vmem>>, vector<1x4x49xf32>
    %659 = vector.shape_cast %658 : vector<1x4x49xf32> to vector<4x49xf32>
    %c3_i32_117 = arith.constant 3 : i32
    %660 = tpu.dynamic_rotate %657 by %c3_i32_117 dim 1 : vector<4x256xf32>, i32 -> vector<4x256xf32>
    %cst_118 = arith.constant 0.000000e+00 : f32
    %661 = vector.shape_cast %64 : vector<1x256xi1> to vector<1x256xi1>
    %662 = vector.broadcast %661 : vector<1x256xi1> to vector<4x256xi1>
    %663 = vector.broadcast %cst_118 : f32 to vector<4x256xf32>
    %664 = arith.select %662, %660, %663 : vector<4x256xi1>, vector<4x256xf32>
    %c2_i32_119 = arith.constant 2 : i32
    %665 = tpu.dynamic_rotate %657 by %c2_i32_119 dim 1 : vector<4x256xf32>, i32 -> vector<4x256xf32>
    %cst_120 = arith.constant 0.000000e+00 : f32
    %666 = vector.shape_cast %73 : vector<1x256xi1> to vector<1x256xi1>
    %667 = vector.broadcast %666 : vector<1x256xi1> to vector<4x256xi1>
    %668 = vector.broadcast %cst_120 : f32 to vector<4x256xf32>
    %669 = arith.select %667, %665, %668 : vector<4x256xi1>, vector<4x256xf32>
    %c1_i32_121 = arith.constant 1 : i32
    %670 = tpu.dynamic_rotate %657 by %c1_i32_121 dim 1 : vector<4x256xf32>, i32 -> vector<4x256xf32>
    %cst_122 = arith.constant 0.000000e+00 : f32
    %671 = vector.shape_cast %82 : vector<1x256xi1> to vector<1x256xi1>
    %672 = vector.broadcast %671 : vector<1x256xi1> to vector<4x256xi1>
    %673 = vector.broadcast %cst_122 : f32 to vector<4x256xf32>
    %674 = arith.select %672, %670, %673 : vector<4x256xi1>, vector<4x256xf32>
    %c255_i32_123 = arith.constant 255 : i32
    %675 = tpu.dynamic_rotate %657 by %c255_i32_123 dim 1 : vector<4x256xf32>, i32 -> vector<4x256xf32>
    %cst_124 = arith.constant 0.000000e+00 : f32
    %676 = vector.shape_cast %91 : vector<1x256xi1> to vector<1x256xi1>
    %677 = vector.broadcast %676 : vector<1x256xi1> to vector<4x256xi1>
    %678 = vector.broadcast %cst_124 : f32 to vector<4x256xf32>
    %679 = arith.select %677, %675, %678 : vector<4x256xi1>, vector<4x256xf32>
    %c254_i32_125 = arith.constant 254 : i32
    %680 = tpu.dynamic_rotate %657 by %c254_i32_125 dim 1 : vector<4x256xf32>, i32 -> vector<4x256xf32>
    %cst_126 = arith.constant 0.000000e+00 : f32
    %681 = vector.shape_cast %100 : vector<1x256xi1> to vector<1x256xi1>
    %682 = vector.broadcast %681 : vector<1x256xi1> to vector<4x256xi1>
    %683 = vector.broadcast %cst_126 : f32 to vector<4x256xf32>
    %684 = arith.select %682, %680, %683 : vector<4x256xi1>, vector<4x256xf32>
    %c253_i32_127 = arith.constant 253 : i32
    %685 = tpu.dynamic_rotate %657 by %c253_i32_127 dim 1 : vector<4x256xf32>, i32 -> vector<4x256xf32>
    %cst_128 = arith.constant 0.000000e+00 : f32
    %686 = vector.shape_cast %109 : vector<1x256xi1> to vector<1x256xi1>
    %687 = vector.broadcast %686 : vector<1x256xi1> to vector<4x256xi1>
    %688 = vector.broadcast %cst_128 : f32 to vector<4x256xf32>
    %689 = arith.select %687, %685, %688 : vector<4x256xi1>, vector<4x256xf32>
    %690 = vector.extract_strided_slice %659 {offsets = [0, 0], sizes = [4, 1], strides = [1, 1]} : vector<4x49xf32> to vector<4x1xf32>
    %691 = vector.broadcast %690 : vector<4x1xf32> to vector<4x256xf32>
    %692 = arith.mulf %664, %691 : vector<4x256xf32>
    %693 = vector.extract_strided_slice %659 {offsets = [0, 1], sizes = [4, 1], strides = [1, 1]} : vector<4x49xf32> to vector<4x1xf32>
    %694 = vector.broadcast %693 : vector<4x1xf32> to vector<4x256xf32>
    %695 = arith.mulf %669, %694 : vector<4x256xf32>
    %696 = arith.addf %692, %695 : vector<4x256xf32>
    %697 = vector.extract_strided_slice %659 {offsets = [0, 2], sizes = [4, 1], strides = [1, 1]} : vector<4x49xf32> to vector<4x1xf32>
    %698 = vector.broadcast %697 : vector<4x1xf32> to vector<4x256xf32>
    %699 = arith.mulf %674, %698 : vector<4x256xf32>
    %700 = arith.addf %696, %699 : vector<4x256xf32>
    %701 = vector.extract_strided_slice %659 {offsets = [0, 3], sizes = [4, 1], strides = [1, 1]} : vector<4x49xf32> to vector<4x1xf32>
    %702 = vector.broadcast %701 : vector<4x1xf32> to vector<4x256xf32>
    %703 = arith.mulf %657, %702 : vector<4x256xf32>
    %704 = arith.addf %700, %703 : vector<4x256xf32>
    %705 = vector.extract_strided_slice %659 {offsets = [0, 4], sizes = [4, 1], strides = [1, 1]} : vector<4x49xf32> to vector<4x1xf32>
    %706 = vector.broadcast %705 : vector<4x1xf32> to vector<4x256xf32>
    %707 = arith.mulf %679, %706 : vector<4x256xf32>
    %708 = arith.addf %704, %707 : vector<4x256xf32>
    %709 = vector.extract_strided_slice %659 {offsets = [0, 5], sizes = [4, 1], strides = [1, 1]} : vector<4x49xf32> to vector<4x1xf32>
    %710 = vector.broadcast %709 : vector<4x1xf32> to vector<4x256xf32>
    %711 = arith.mulf %684, %710 : vector<4x256xf32>
    %712 = arith.addf %708, %711 : vector<4x256xf32>
    %713 = vector.extract_strided_slice %659 {offsets = [0, 6], sizes = [4, 1], strides = [1, 1]} : vector<4x49xf32> to vector<4x1xf32>
    %714 = vector.broadcast %713 : vector<4x1xf32> to vector<4x256xf32>
    %715 = arith.mulf %689, %714 : vector<4x256xf32>
    %716 = arith.addf %712, %715 : vector<4x256xf32>
    %c48_i32_129 = arith.constant 48 : i32
    %717 = tpu.dynamic_rotate %716 by %c48_i32_129 dim 1 : vector<4x256xf32>, i32 -> vector<4x256xf32>
    %cst_130 = arith.constant 0.000000e+00 : f32
    %718 = vector.shape_cast %10 : vector<1x256xi1> to vector<1x256xi1>
    %719 = vector.broadcast %718 : vector<1x256xi1> to vector<4x256xi1>
    %720 = vector.broadcast %cst_130 : f32 to vector<4x256xf32>
    %721 = arith.select %719, %717, %720 : vector<4x256xi1>, vector<4x256xf32>
    %722 = vector.extract_strided_slice %659 {offsets = [0, 7], sizes = [4, 1], strides = [1, 1]} : vector<4x49xf32> to vector<4x1xf32>
    %723 = vector.broadcast %722 : vector<4x1xf32> to vector<4x256xf32>
    %724 = arith.mulf %664, %723 : vector<4x256xf32>
    %725 = vector.extract_strided_slice %659 {offsets = [0, 8], sizes = [4, 1], strides = [1, 1]} : vector<4x49xf32> to vector<4x1xf32>
    %726 = vector.broadcast %725 : vector<4x1xf32> to vector<4x256xf32>
    %727 = arith.mulf %669, %726 : vector<4x256xf32>
    %728 = arith.addf %724, %727 : vector<4x256xf32>
    %729 = vector.extract_strided_slice %659 {offsets = [0, 9], sizes = [4, 1], strides = [1, 1]} : vector<4x49xf32> to vector<4x1xf32>
    %730 = vector.broadcast %729 : vector<4x1xf32> to vector<4x256xf32>
    %731 = arith.mulf %674, %730 : vector<4x256xf32>
    %732 = arith.addf %728, %731 : vector<4x256xf32>
    %733 = vector.extract_strided_slice %659 {offsets = [0, 10], sizes = [4, 1], strides = [1, 1]} : vector<4x49xf32> to vector<4x1xf32>
    %734 = vector.broadcast %733 : vector<4x1xf32> to vector<4x256xf32>
    %735 = arith.mulf %657, %734 : vector<4x256xf32>
    %736 = arith.addf %732, %735 : vector<4x256xf32>
    %737 = vector.extract_strided_slice %659 {offsets = [0, 11], sizes = [4, 1], strides = [1, 1]} : vector<4x49xf32> to vector<4x1xf32>
    %738 = vector.broadcast %737 : vector<4x1xf32> to vector<4x256xf32>
    %739 = arith.mulf %679, %738 : vector<4x256xf32>
    %740 = arith.addf %736, %739 : vector<4x256xf32>
    %741 = vector.extract_strided_slice %659 {offsets = [0, 12], sizes = [4, 1], strides = [1, 1]} : vector<4x49xf32> to vector<4x1xf32>
    %742 = vector.broadcast %741 : vector<4x1xf32> to vector<4x256xf32>
    %743 = arith.mulf %684, %742 : vector<4x256xf32>
    %744 = arith.addf %740, %743 : vector<4x256xf32>
    %745 = vector.extract_strided_slice %659 {offsets = [0, 13], sizes = [4, 1], strides = [1, 1]} : vector<4x49xf32> to vector<4x1xf32>
    %746 = vector.broadcast %745 : vector<4x1xf32> to vector<4x256xf32>
    %747 = arith.mulf %689, %746 : vector<4x256xf32>
    %748 = arith.addf %744, %747 : vector<4x256xf32>
    %c32_i32_131 = arith.constant 32 : i32
    %749 = tpu.dynamic_rotate %748 by %c32_i32_131 dim 1 : vector<4x256xf32>, i32 -> vector<4x256xf32>
    %cst_132 = arith.constant 0.000000e+00 : f32
    %750 = vector.shape_cast %19 : vector<1x256xi1> to vector<1x256xi1>
    %751 = vector.broadcast %750 : vector<1x256xi1> to vector<4x256xi1>
    %752 = vector.broadcast %cst_132 : f32 to vector<4x256xf32>
    %753 = arith.select %751, %749, %752 : vector<4x256xi1>, vector<4x256xf32>
    %754 = arith.addf %721, %753 : vector<4x256xf32>
    %755 = vector.extract_strided_slice %659 {offsets = [0, 14], sizes = [4, 1], strides = [1, 1]} : vector<4x49xf32> to vector<4x1xf32>
    %756 = vector.broadcast %755 : vector<4x1xf32> to vector<4x256xf32>
    %757 = arith.mulf %664, %756 : vector<4x256xf32>
    %758 = vector.extract_strided_slice %659 {offsets = [0, 15], sizes = [4, 1], strides = [1, 1]} : vector<4x49xf32> to vector<4x1xf32>
    %759 = vector.broadcast %758 : vector<4x1xf32> to vector<4x256xf32>
    %760 = arith.mulf %669, %759 : vector<4x256xf32>
    %761 = arith.addf %757, %760 : vector<4x256xf32>
    %762 = vector.extract_strided_slice %659 {offsets = [0, 16], sizes = [4, 1], strides = [1, 1]} : vector<4x49xf32> to vector<4x1xf32>
    %763 = vector.broadcast %762 : vector<4x1xf32> to vector<4x256xf32>
    %764 = arith.mulf %674, %763 : vector<4x256xf32>
    %765 = arith.addf %761, %764 : vector<4x256xf32>
    %766 = vector.extract_strided_slice %659 {offsets = [0, 17], sizes = [4, 1], strides = [1, 1]} : vector<4x49xf32> to vector<4x1xf32>
    %767 = vector.broadcast %766 : vector<4x1xf32> to vector<4x256xf32>
    %768 = arith.mulf %657, %767 : vector<4x256xf32>
    %769 = arith.addf %765, %768 : vector<4x256xf32>
    %770 = vector.extract_strided_slice %659 {offsets = [0, 18], sizes = [4, 1], strides = [1, 1]} : vector<4x49xf32> to vector<4x1xf32>
    %771 = vector.broadcast %770 : vector<4x1xf32> to vector<4x256xf32>
    %772 = arith.mulf %679, %771 : vector<4x256xf32>
    %773 = arith.addf %769, %772 : vector<4x256xf32>
    %774 = vector.extract_strided_slice %659 {offsets = [0, 19], sizes = [4, 1], strides = [1, 1]} : vector<4x49xf32> to vector<4x1xf32>
    %775 = vector.broadcast %774 : vector<4x1xf32> to vector<4x256xf32>
    %776 = arith.mulf %684, %775 : vector<4x256xf32>
    %777 = arith.addf %773, %776 : vector<4x256xf32>
    %778 = vector.extract_strided_slice %659 {offsets = [0, 20], sizes = [4, 1], strides = [1, 1]} : vector<4x49xf32> to vector<4x1xf32>
    %779 = vector.broadcast %778 : vector<4x1xf32> to vector<4x256xf32>
    %780 = arith.mulf %689, %779 : vector<4x256xf32>
    %781 = arith.addf %777, %780 : vector<4x256xf32>
    %c16_i32_133 = arith.constant 16 : i32
    %782 = tpu.dynamic_rotate %781 by %c16_i32_133 dim 1 : vector<4x256xf32>, i32 -> vector<4x256xf32>
    %cst_134 = arith.constant 0.000000e+00 : f32
    %783 = vector.shape_cast %28 : vector<1x256xi1> to vector<1x256xi1>
    %784 = vector.broadcast %783 : vector<1x256xi1> to vector<4x256xi1>
    %785 = vector.broadcast %cst_134 : f32 to vector<4x256xf32>
    %786 = arith.select %784, %782, %785 : vector<4x256xi1>, vector<4x256xf32>
    %787 = arith.addf %754, %786 : vector<4x256xf32>
    %788 = vector.extract_strided_slice %659 {offsets = [0, 21], sizes = [4, 1], strides = [1, 1]} : vector<4x49xf32> to vector<4x1xf32>
    %789 = vector.broadcast %788 : vector<4x1xf32> to vector<4x256xf32>
    %790 = arith.mulf %664, %789 : vector<4x256xf32>
    %791 = vector.extract_strided_slice %659 {offsets = [0, 22], sizes = [4, 1], strides = [1, 1]} : vector<4x49xf32> to vector<4x1xf32>
    %792 = vector.broadcast %791 : vector<4x1xf32> to vector<4x256xf32>
    %793 = arith.mulf %669, %792 : vector<4x256xf32>
    %794 = arith.addf %790, %793 : vector<4x256xf32>
    %795 = vector.extract_strided_slice %659 {offsets = [0, 23], sizes = [4, 1], strides = [1, 1]} : vector<4x49xf32> to vector<4x1xf32>
    %796 = vector.broadcast %795 : vector<4x1xf32> to vector<4x256xf32>
    %797 = arith.mulf %674, %796 : vector<4x256xf32>
    %798 = arith.addf %794, %797 : vector<4x256xf32>
    %799 = vector.extract_strided_slice %659 {offsets = [0, 24], sizes = [4, 1], strides = [1, 1]} : vector<4x49xf32> to vector<4x1xf32>
    %800 = vector.broadcast %799 : vector<4x1xf32> to vector<4x256xf32>
    %801 = arith.mulf %657, %800 : vector<4x256xf32>
    %802 = arith.addf %798, %801 : vector<4x256xf32>
    %803 = vector.extract_strided_slice %659 {offsets = [0, 25], sizes = [4, 1], strides = [1, 1]} : vector<4x49xf32> to vector<4x1xf32>
    %804 = vector.broadcast %803 : vector<4x1xf32> to vector<4x256xf32>
    %805 = arith.mulf %679, %804 : vector<4x256xf32>
    %806 = arith.addf %802, %805 : vector<4x256xf32>
    %807 = vector.extract_strided_slice %659 {offsets = [0, 26], sizes = [4, 1], strides = [1, 1]} : vector<4x49xf32> to vector<4x1xf32>
    %808 = vector.broadcast %807 : vector<4x1xf32> to vector<4x256xf32>
    %809 = arith.mulf %684, %808 : vector<4x256xf32>
    %810 = arith.addf %806, %809 : vector<4x256xf32>
    %811 = vector.extract_strided_slice %659 {offsets = [0, 27], sizes = [4, 1], strides = [1, 1]} : vector<4x49xf32> to vector<4x1xf32>
    %812 = vector.broadcast %811 : vector<4x1xf32> to vector<4x256xf32>
    %813 = arith.mulf %689, %812 : vector<4x256xf32>
    %814 = arith.addf %810, %813 : vector<4x256xf32>
    %815 = arith.addf %787, %814 : vector<4x256xf32>
    %816 = vector.extract_strided_slice %659 {offsets = [0, 28], sizes = [4, 1], strides = [1, 1]} : vector<4x49xf32> to vector<4x1xf32>
    %817 = vector.broadcast %816 : vector<4x1xf32> to vector<4x256xf32>
    %818 = arith.mulf %664, %817 : vector<4x256xf32>
    %819 = vector.extract_strided_slice %659 {offsets = [0, 29], sizes = [4, 1], strides = [1, 1]} : vector<4x49xf32> to vector<4x1xf32>
    %820 = vector.broadcast %819 : vector<4x1xf32> to vector<4x256xf32>
    %821 = arith.mulf %669, %820 : vector<4x256xf32>
    %822 = arith.addf %818, %821 : vector<4x256xf32>
    %823 = vector.extract_strided_slice %659 {offsets = [0, 30], sizes = [4, 1], strides = [1, 1]} : vector<4x49xf32> to vector<4x1xf32>
    %824 = vector.broadcast %823 : vector<4x1xf32> to vector<4x256xf32>
    %825 = arith.mulf %674, %824 : vector<4x256xf32>
    %826 = arith.addf %822, %825 : vector<4x256xf32>
    %827 = vector.extract_strided_slice %659 {offsets = [0, 31], sizes = [4, 1], strides = [1, 1]} : vector<4x49xf32> to vector<4x1xf32>
    %828 = vector.broadcast %827 : vector<4x1xf32> to vector<4x256xf32>
    %829 = arith.mulf %657, %828 : vector<4x256xf32>
    %830 = arith.addf %826, %829 : vector<4x256xf32>
    %831 = vector.extract_strided_slice %659 {offsets = [0, 32], sizes = [4, 1], strides = [1, 1]} : vector<4x49xf32> to vector<4x1xf32>
    %832 = vector.broadcast %831 : vector<4x1xf32> to vector<4x256xf32>
    %833 = arith.mulf %679, %832 : vector<4x256xf32>
    %834 = arith.addf %830, %833 : vector<4x256xf32>
    %835 = vector.extract_strided_slice %659 {offsets = [0, 33], sizes = [4, 1], strides = [1, 1]} : vector<4x49xf32> to vector<4x1xf32>
    %836 = vector.broadcast %835 : vector<4x1xf32> to vector<4x256xf32>
    %837 = arith.mulf %684, %836 : vector<4x256xf32>
    %838 = arith.addf %834, %837 : vector<4x256xf32>
    %839 = vector.extract_strided_slice %659 {offsets = [0, 34], sizes = [4, 1], strides = [1, 1]} : vector<4x49xf32> to vector<4x1xf32>
    %840 = vector.broadcast %839 : vector<4x1xf32> to vector<4x256xf32>
    %841 = arith.mulf %689, %840 : vector<4x256xf32>
    %842 = arith.addf %838, %841 : vector<4x256xf32>
    %c240_i32_135 = arith.constant 240 : i32
    %843 = tpu.dynamic_rotate %842 by %c240_i32_135 dim 1 : vector<4x256xf32>, i32 -> vector<4x256xf32>
    %cst_136 = arith.constant 0.000000e+00 : f32
    %844 = vector.shape_cast %37 : vector<1x256xi1> to vector<1x256xi1>
    %845 = vector.broadcast %844 : vector<1x256xi1> to vector<4x256xi1>
    %846 = vector.broadcast %cst_136 : f32 to vector<4x256xf32>
    %847 = arith.select %845, %843, %846 : vector<4x256xi1>, vector<4x256xf32>
    %848 = arith.addf %815, %847 : vector<4x256xf32>
    %849 = vector.extract_strided_slice %659 {offsets = [0, 35], sizes = [4, 1], strides = [1, 1]} : vector<4x49xf32> to vector<4x1xf32>
    %850 = vector.broadcast %849 : vector<4x1xf32> to vector<4x256xf32>
    %851 = arith.mulf %664, %850 : vector<4x256xf32>
    %852 = vector.extract_strided_slice %659 {offsets = [0, 36], sizes = [4, 1], strides = [1, 1]} : vector<4x49xf32> to vector<4x1xf32>
    %853 = vector.broadcast %852 : vector<4x1xf32> to vector<4x256xf32>
    %854 = arith.mulf %669, %853 : vector<4x256xf32>
    %855 = arith.addf %851, %854 : vector<4x256xf32>
    %856 = vector.extract_strided_slice %659 {offsets = [0, 37], sizes = [4, 1], strides = [1, 1]} : vector<4x49xf32> to vector<4x1xf32>
    %857 = vector.broadcast %856 : vector<4x1xf32> to vector<4x256xf32>
    %858 = arith.mulf %674, %857 : vector<4x256xf32>
    %859 = arith.addf %855, %858 : vector<4x256xf32>
    %860 = vector.extract_strided_slice %659 {offsets = [0, 38], sizes = [4, 1], strides = [1, 1]} : vector<4x49xf32> to vector<4x1xf32>
    %861 = vector.broadcast %860 : vector<4x1xf32> to vector<4x256xf32>
    %862 = arith.mulf %657, %861 : vector<4x256xf32>
    %863 = arith.addf %859, %862 : vector<4x256xf32>
    %864 = vector.extract_strided_slice %659 {offsets = [0, 39], sizes = [4, 1], strides = [1, 1]} : vector<4x49xf32> to vector<4x1xf32>
    %865 = vector.broadcast %864 : vector<4x1xf32> to vector<4x256xf32>
    %866 = arith.mulf %679, %865 : vector<4x256xf32>
    %867 = arith.addf %863, %866 : vector<4x256xf32>
    %868 = vector.extract_strided_slice %659 {offsets = [0, 40], sizes = [4, 1], strides = [1, 1]} : vector<4x49xf32> to vector<4x1xf32>
    %869 = vector.broadcast %868 : vector<4x1xf32> to vector<4x256xf32>
    %870 = arith.mulf %684, %869 : vector<4x256xf32>
    %871 = arith.addf %867, %870 : vector<4x256xf32>
    %872 = vector.extract_strided_slice %659 {offsets = [0, 41], sizes = [4, 1], strides = [1, 1]} : vector<4x49xf32> to vector<4x1xf32>
    %873 = vector.broadcast %872 : vector<4x1xf32> to vector<4x256xf32>
    %874 = arith.mulf %689, %873 : vector<4x256xf32>
    %875 = arith.addf %871, %874 : vector<4x256xf32>
    %c224_i32_137 = arith.constant 224 : i32
    %876 = tpu.dynamic_rotate %875 by %c224_i32_137 dim 1 : vector<4x256xf32>, i32 -> vector<4x256xf32>
    %cst_138 = arith.constant 0.000000e+00 : f32
    %877 = vector.shape_cast %46 : vector<1x256xi1> to vector<1x256xi1>
    %878 = vector.broadcast %877 : vector<1x256xi1> to vector<4x256xi1>
    %879 = vector.broadcast %cst_138 : f32 to vector<4x256xf32>
    %880 = arith.select %878, %876, %879 : vector<4x256xi1>, vector<4x256xf32>
    %881 = arith.addf %848, %880 : vector<4x256xf32>
    %882 = vector.extract_strided_slice %659 {offsets = [0, 42], sizes = [4, 1], strides = [1, 1]} : vector<4x49xf32> to vector<4x1xf32>
    %883 = vector.broadcast %882 : vector<4x1xf32> to vector<4x256xf32>
    %884 = arith.mulf %664, %883 : vector<4x256xf32>
    %885 = vector.extract_strided_slice %659 {offsets = [0, 43], sizes = [4, 1], strides = [1, 1]} : vector<4x49xf32> to vector<4x1xf32>
    %886 = vector.broadcast %885 : vector<4x1xf32> to vector<4x256xf32>
    %887 = arith.mulf %669, %886 : vector<4x256xf32>
    %888 = arith.addf %884, %887 : vector<4x256xf32>
    %889 = vector.extract_strided_slice %659 {offsets = [0, 44], sizes = [4, 1], strides = [1, 1]} : vector<4x49xf32> to vector<4x1xf32>
    %890 = vector.broadcast %889 : vector<4x1xf32> to vector<4x256xf32>
    %891 = arith.mulf %674, %890 : vector<4x256xf32>
    %892 = arith.addf %888, %891 : vector<4x256xf32>
    %893 = vector.extract_strided_slice %659 {offsets = [0, 45], sizes = [4, 1], strides = [1, 1]} : vector<4x49xf32> to vector<4x1xf32>
    %894 = vector.broadcast %893 : vector<4x1xf32> to vector<4x256xf32>
    %895 = arith.mulf %657, %894 : vector<4x256xf32>
    %896 = arith.addf %892, %895 : vector<4x256xf32>
    %897 = vector.extract_strided_slice %659 {offsets = [0, 46], sizes = [4, 1], strides = [1, 1]} : vector<4x49xf32> to vector<4x1xf32>
    %898 = vector.broadcast %897 : vector<4x1xf32> to vector<4x256xf32>
    %899 = arith.mulf %679, %898 : vector<4x256xf32>
    %900 = arith.addf %896, %899 : vector<4x256xf32>
    %901 = vector.extract_strided_slice %659 {offsets = [0, 47], sizes = [4, 1], strides = [1, 1]} : vector<4x49xf32> to vector<4x1xf32>
    %902 = vector.broadcast %901 : vector<4x1xf32> to vector<4x256xf32>
    %903 = arith.mulf %684, %902 : vector<4x256xf32>
    %904 = arith.addf %900, %903 : vector<4x256xf32>
    %905 = vector.extract_strided_slice %659 {offsets = [0, 48], sizes = [4, 1], strides = [1, 1]} : vector<4x49xf32> to vector<4x1xf32>
    %906 = vector.broadcast %905 : vector<4x1xf32> to vector<4x256xf32>
    %907 = arith.mulf %689, %906 : vector<4x256xf32>
    %908 = arith.addf %904, %907 : vector<4x256xf32>
    %c208_i32_139 = arith.constant 208 : i32
    %909 = tpu.dynamic_rotate %908 by %c208_i32_139 dim 1 : vector<4x256xf32>, i32 -> vector<4x256xf32>
    %cst_140 = arith.constant 0.000000e+00 : f32
    %910 = vector.shape_cast %55 : vector<1x256xi1> to vector<1x256xi1>
    %911 = vector.broadcast %910 : vector<1x256xi1> to vector<4x256xi1>
    %912 = vector.broadcast %cst_140 : f32 to vector<4x256xf32>
    %913 = arith.select %911, %909, %912 : vector<4x256xi1>, vector<4x256xf32>
    %914 = arith.addf %881, %913 : vector<4x256xf32>
    %915 = vector.broadcast %111 : vector<4x1xf32> to vector<4x256xf32>
    %916 = arith.addf %914, %915 : vector<4x256xf32>
    %cst_141 = arith.constant dense<0.000000e+00> : vector<32x256xf32>
    %917 = tpu.matmul %116, %916, %cst_141 {dimension_numbers = #tpu.dot_dimension_numbers<[1], [0], [0], [1], [0, 0, 1, 1], [], []>} : vector<32x4xf32>, vector<4x256xf32>, vector<32x256xf32> -> vector<32x256xf32>
    %918 = vector.broadcast %117 : vector<32x1xf32> to vector<32x256xf32>
    %919 = arith.addf %917, %918 : vector<32x256xf32>
    %920 = vector.extract_strided_slice %919 {offsets = [0, 0], sizes = [16, 256], strides = [1, 1]} : vector<32x256xf32> to vector<16x256xf32>
    %921 = vector.extract_strided_slice %919 {offsets = [16, 0], sizes = [16, 256], strides = [1, 1]} : vector<32x256xf32> to vector<16x256xf32>
    %cst_142 = arith.constant 0.000000e+00 : f32
    %cst_143 = arith.constant 6.000000e+00 : f32
    %922 = vector.broadcast %cst_142 : f32 to vector<16x256xf32>
    %923 = arith.maximumf %922, %920 : vector<16x256xf32>
    %924 = vector.broadcast %cst_143 : f32 to vector<16x256xf32>
    %925 = arith.minimumf %924, %923 : vector<16x256xf32>
    %926 = arith.mulf %925, %921 : vector<16x256xf32>
    %cst_144 = arith.constant dense<0.000000e+00> : vector<4x256xf32>
    %927 = tpu.matmul %118, %926, %cst_144 {dimension_numbers = #tpu.dot_dimension_numbers<[1], [0], [0], [1], [0, 0, 1, 1], [], []>} : vector<4x16xf32>, vector<16x256xf32>, vector<4x256xf32> -> vector<4x256xf32>
    %928 = vector.broadcast %113 : vector<4x1xf32> to vector<4x256xf32>
    %929 = arith.addf %927, %928 : vector<4x256xf32>
    %c1_145 = arith.constant 1 : index
    %c0_146 = arith.constant 0 : index
    %c0_147 = arith.constant 0 : index
    %930 = vector.load %arg3[%c1_145, %c0_146, %c0_147] : memref<2x4x49xf32, #tpu.memory_space<vmem>>, vector<1x4x49xf32>
    %931 = vector.shape_cast %930 : vector<1x4x49xf32> to vector<4x49xf32>
    %c3_i32_148 = arith.constant 3 : i32
    %932 = tpu.dynamic_rotate %929 by %c3_i32_148 dim 1 : vector<4x256xf32>, i32 -> vector<4x256xf32>
    %cst_149 = arith.constant 0.000000e+00 : f32
    %933 = vector.shape_cast %64 : vector<1x256xi1> to vector<1x256xi1>
    %934 = vector.broadcast %933 : vector<1x256xi1> to vector<4x256xi1>
    %935 = vector.broadcast %cst_149 : f32 to vector<4x256xf32>
    %936 = arith.select %934, %932, %935 : vector<4x256xi1>, vector<4x256xf32>
    %c2_i32_150 = arith.constant 2 : i32
    %937 = tpu.dynamic_rotate %929 by %c2_i32_150 dim 1 : vector<4x256xf32>, i32 -> vector<4x256xf32>
    %cst_151 = arith.constant 0.000000e+00 : f32
    %938 = vector.shape_cast %73 : vector<1x256xi1> to vector<1x256xi1>
    %939 = vector.broadcast %938 : vector<1x256xi1> to vector<4x256xi1>
    %940 = vector.broadcast %cst_151 : f32 to vector<4x256xf32>
    %941 = arith.select %939, %937, %940 : vector<4x256xi1>, vector<4x256xf32>
    %c1_i32_152 = arith.constant 1 : i32
    %942 = tpu.dynamic_rotate %929 by %c1_i32_152 dim 1 : vector<4x256xf32>, i32 -> vector<4x256xf32>
    %cst_153 = arith.constant 0.000000e+00 : f32
    %943 = vector.shape_cast %82 : vector<1x256xi1> to vector<1x256xi1>
    %944 = vector.broadcast %943 : vector<1x256xi1> to vector<4x256xi1>
    %945 = vector.broadcast %cst_153 : f32 to vector<4x256xf32>
    %946 = arith.select %944, %942, %945 : vector<4x256xi1>, vector<4x256xf32>
    %c255_i32_154 = arith.constant 255 : i32
    %947 = tpu.dynamic_rotate %929 by %c255_i32_154 dim 1 : vector<4x256xf32>, i32 -> vector<4x256xf32>
    %cst_155 = arith.constant 0.000000e+00 : f32
    %948 = vector.shape_cast %91 : vector<1x256xi1> to vector<1x256xi1>
    %949 = vector.broadcast %948 : vector<1x256xi1> to vector<4x256xi1>
    %950 = vector.broadcast %cst_155 : f32 to vector<4x256xf32>
    %951 = arith.select %949, %947, %950 : vector<4x256xi1>, vector<4x256xf32>
    %c254_i32_156 = arith.constant 254 : i32
    %952 = tpu.dynamic_rotate %929 by %c254_i32_156 dim 1 : vector<4x256xf32>, i32 -> vector<4x256xf32>
    %cst_157 = arith.constant 0.000000e+00 : f32
    %953 = vector.shape_cast %100 : vector<1x256xi1> to vector<1x256xi1>
    %954 = vector.broadcast %953 : vector<1x256xi1> to vector<4x256xi1>
    %955 = vector.broadcast %cst_157 : f32 to vector<4x256xf32>
    %956 = arith.select %954, %952, %955 : vector<4x256xi1>, vector<4x256xf32>
    %c253_i32_158 = arith.constant 253 : i32
    %957 = tpu.dynamic_rotate %929 by %c253_i32_158 dim 1 : vector<4x256xf32>, i32 -> vector<4x256xf32>
    %cst_159 = arith.constant 0.000000e+00 : f32
    %958 = vector.shape_cast %109 : vector<1x256xi1> to vector<1x256xi1>
    %959 = vector.broadcast %958 : vector<1x256xi1> to vector<4x256xi1>
    %960 = vector.broadcast %cst_159 : f32 to vector<4x256xf32>
    %961 = arith.select %959, %957, %960 : vector<4x256xi1>, vector<4x256xf32>
    %962 = vector.extract_strided_slice %931 {offsets = [0, 0], sizes = [4, 1], strides = [1, 1]} : vector<4x49xf32> to vector<4x1xf32>
    %963 = vector.broadcast %962 : vector<4x1xf32> to vector<4x256xf32>
    %964 = arith.mulf %936, %963 : vector<4x256xf32>
    %965 = vector.extract_strided_slice %931 {offsets = [0, 1], sizes = [4, 1], strides = [1, 1]} : vector<4x49xf32> to vector<4x1xf32>
    %966 = vector.broadcast %965 : vector<4x1xf32> to vector<4x256xf32>
    %967 = arith.mulf %941, %966 : vector<4x256xf32>
    %968 = arith.addf %964, %967 : vector<4x256xf32>
    %969 = vector.extract_strided_slice %931 {offsets = [0, 2], sizes = [4, 1], strides = [1, 1]} : vector<4x49xf32> to vector<4x1xf32>
    %970 = vector.broadcast %969 : vector<4x1xf32> to vector<4x256xf32>
    %971 = arith.mulf %946, %970 : vector<4x256xf32>
    %972 = arith.addf %968, %971 : vector<4x256xf32>
    %973 = vector.extract_strided_slice %931 {offsets = [0, 3], sizes = [4, 1], strides = [1, 1]} : vector<4x49xf32> to vector<4x1xf32>
    %974 = vector.broadcast %973 : vector<4x1xf32> to vector<4x256xf32>
    %975 = arith.mulf %929, %974 : vector<4x256xf32>
    %976 = arith.addf %972, %975 : vector<4x256xf32>
    %977 = vector.extract_strided_slice %931 {offsets = [0, 4], sizes = [4, 1], strides = [1, 1]} : vector<4x49xf32> to vector<4x1xf32>
    %978 = vector.broadcast %977 : vector<4x1xf32> to vector<4x256xf32>
    %979 = arith.mulf %951, %978 : vector<4x256xf32>
    %980 = arith.addf %976, %979 : vector<4x256xf32>
    %981 = vector.extract_strided_slice %931 {offsets = [0, 5], sizes = [4, 1], strides = [1, 1]} : vector<4x49xf32> to vector<4x1xf32>
    %982 = vector.broadcast %981 : vector<4x1xf32> to vector<4x256xf32>
    %983 = arith.mulf %956, %982 : vector<4x256xf32>
    %984 = arith.addf %980, %983 : vector<4x256xf32>
    %985 = vector.extract_strided_slice %931 {offsets = [0, 6], sizes = [4, 1], strides = [1, 1]} : vector<4x49xf32> to vector<4x1xf32>
    %986 = vector.broadcast %985 : vector<4x1xf32> to vector<4x256xf32>
    %987 = arith.mulf %961, %986 : vector<4x256xf32>
    %988 = arith.addf %984, %987 : vector<4x256xf32>
    %c48_i32_160 = arith.constant 48 : i32
    %989 = tpu.dynamic_rotate %988 by %c48_i32_160 dim 1 : vector<4x256xf32>, i32 -> vector<4x256xf32>
    %cst_161 = arith.constant 0.000000e+00 : f32
    %990 = vector.shape_cast %10 : vector<1x256xi1> to vector<1x256xi1>
    %991 = vector.broadcast %990 : vector<1x256xi1> to vector<4x256xi1>
    %992 = vector.broadcast %cst_161 : f32 to vector<4x256xf32>
    %993 = arith.select %991, %989, %992 : vector<4x256xi1>, vector<4x256xf32>
    %994 = vector.extract_strided_slice %931 {offsets = [0, 7], sizes = [4, 1], strides = [1, 1]} : vector<4x49xf32> to vector<4x1xf32>
    %995 = vector.broadcast %994 : vector<4x1xf32> to vector<4x256xf32>
    %996 = arith.mulf %936, %995 : vector<4x256xf32>
    %997 = vector.extract_strided_slice %931 {offsets = [0, 8], sizes = [4, 1], strides = [1, 1]} : vector<4x49xf32> to vector<4x1xf32>
    %998 = vector.broadcast %997 : vector<4x1xf32> to vector<4x256xf32>
    %999 = arith.mulf %941, %998 : vector<4x256xf32>
    %1000 = arith.addf %996, %999 : vector<4x256xf32>
    %1001 = vector.extract_strided_slice %931 {offsets = [0, 9], sizes = [4, 1], strides = [1, 1]} : vector<4x49xf32> to vector<4x1xf32>
    %1002 = vector.broadcast %1001 : vector<4x1xf32> to vector<4x256xf32>
    %1003 = arith.mulf %946, %1002 : vector<4x256xf32>
    %1004 = arith.addf %1000, %1003 : vector<4x256xf32>
    %1005 = vector.extract_strided_slice %931 {offsets = [0, 10], sizes = [4, 1], strides = [1, 1]} : vector<4x49xf32> to vector<4x1xf32>
    %1006 = vector.broadcast %1005 : vector<4x1xf32> to vector<4x256xf32>
    %1007 = arith.mulf %929, %1006 : vector<4x256xf32>
    %1008 = arith.addf %1004, %1007 : vector<4x256xf32>
    %1009 = vector.extract_strided_slice %931 {offsets = [0, 11], sizes = [4, 1], strides = [1, 1]} : vector<4x49xf32> to vector<4x1xf32>
    %1010 = vector.broadcast %1009 : vector<4x1xf32> to vector<4x256xf32>
    %1011 = arith.mulf %951, %1010 : vector<4x256xf32>
    %1012 = arith.addf %1008, %1011 : vector<4x256xf32>
    %1013 = vector.extract_strided_slice %931 {offsets = [0, 12], sizes = [4, 1], strides = [1, 1]} : vector<4x49xf32> to vector<4x1xf32>
    %1014 = vector.broadcast %1013 : vector<4x1xf32> to vector<4x256xf32>
    %1015 = arith.mulf %956, %1014 : vector<4x256xf32>
    %1016 = arith.addf %1012, %1015 : vector<4x256xf32>
    %1017 = vector.extract_strided_slice %931 {offsets = [0, 13], sizes = [4, 1], strides = [1, 1]} : vector<4x49xf32> to vector<4x1xf32>
    %1018 = vector.broadcast %1017 : vector<4x1xf32> to vector<4x256xf32>
    %1019 = arith.mulf %961, %1018 : vector<4x256xf32>
    %1020 = arith.addf %1016, %1019 : vector<4x256xf32>
    %c32_i32_162 = arith.constant 32 : i32
    %1021 = tpu.dynamic_rotate %1020 by %c32_i32_162 dim 1 : vector<4x256xf32>, i32 -> vector<4x256xf32>
    %cst_163 = arith.constant 0.000000e+00 : f32
    %1022 = vector.shape_cast %19 : vector<1x256xi1> to vector<1x256xi1>
    %1023 = vector.broadcast %1022 : vector<1x256xi1> to vector<4x256xi1>
    %1024 = vector.broadcast %cst_163 : f32 to vector<4x256xf32>
    %1025 = arith.select %1023, %1021, %1024 : vector<4x256xi1>, vector<4x256xf32>
    %1026 = arith.addf %993, %1025 : vector<4x256xf32>
    %1027 = vector.extract_strided_slice %931 {offsets = [0, 14], sizes = [4, 1], strides = [1, 1]} : vector<4x49xf32> to vector<4x1xf32>
    %1028 = vector.broadcast %1027 : vector<4x1xf32> to vector<4x256xf32>
    %1029 = arith.mulf %936, %1028 : vector<4x256xf32>
    %1030 = vector.extract_strided_slice %931 {offsets = [0, 15], sizes = [4, 1], strides = [1, 1]} : vector<4x49xf32> to vector<4x1xf32>
    %1031 = vector.broadcast %1030 : vector<4x1xf32> to vector<4x256xf32>
    %1032 = arith.mulf %941, %1031 : vector<4x256xf32>
    %1033 = arith.addf %1029, %1032 : vector<4x256xf32>
    %1034 = vector.extract_strided_slice %931 {offsets = [0, 16], sizes = [4, 1], strides = [1, 1]} : vector<4x49xf32> to vector<4x1xf32>
    %1035 = vector.broadcast %1034 : vector<4x1xf32> to vector<4x256xf32>
    %1036 = arith.mulf %946, %1035 : vector<4x256xf32>
    %1037 = arith.addf %1033, %1036 : vector<4x256xf32>
    %1038 = vector.extract_strided_slice %931 {offsets = [0, 17], sizes = [4, 1], strides = [1, 1]} : vector<4x49xf32> to vector<4x1xf32>
    %1039 = vector.broadcast %1038 : vector<4x1xf32> to vector<4x256xf32>
    %1040 = arith.mulf %929, %1039 : vector<4x256xf32>
    %1041 = arith.addf %1037, %1040 : vector<4x256xf32>
    %1042 = vector.extract_strided_slice %931 {offsets = [0, 18], sizes = [4, 1], strides = [1, 1]} : vector<4x49xf32> to vector<4x1xf32>
    %1043 = vector.broadcast %1042 : vector<4x1xf32> to vector<4x256xf32>
    %1044 = arith.mulf %951, %1043 : vector<4x256xf32>
    %1045 = arith.addf %1041, %1044 : vector<4x256xf32>
    %1046 = vector.extract_strided_slice %931 {offsets = [0, 19], sizes = [4, 1], strides = [1, 1]} : vector<4x49xf32> to vector<4x1xf32>
    %1047 = vector.broadcast %1046 : vector<4x1xf32> to vector<4x256xf32>
    %1048 = arith.mulf %956, %1047 : vector<4x256xf32>
    %1049 = arith.addf %1045, %1048 : vector<4x256xf32>
    %1050 = vector.extract_strided_slice %931 {offsets = [0, 20], sizes = [4, 1], strides = [1, 1]} : vector<4x49xf32> to vector<4x1xf32>
    %1051 = vector.broadcast %1050 : vector<4x1xf32> to vector<4x256xf32>
    %1052 = arith.mulf %961, %1051 : vector<4x256xf32>
    %1053 = arith.addf %1049, %1052 : vector<4x256xf32>
    %c16_i32_164 = arith.constant 16 : i32
    %1054 = tpu.dynamic_rotate %1053 by %c16_i32_164 dim 1 : vector<4x256xf32>, i32 -> vector<4x256xf32>
    %cst_165 = arith.constant 0.000000e+00 : f32
    %1055 = vector.shape_cast %28 : vector<1x256xi1> to vector<1x256xi1>
    %1056 = vector.broadcast %1055 : vector<1x256xi1> to vector<4x256xi1>
    %1057 = vector.broadcast %cst_165 : f32 to vector<4x256xf32>
    %1058 = arith.select %1056, %1054, %1057 : vector<4x256xi1>, vector<4x256xf32>
    %1059 = arith.addf %1026, %1058 : vector<4x256xf32>
    %1060 = vector.extract_strided_slice %931 {offsets = [0, 21], sizes = [4, 1], strides = [1, 1]} : vector<4x49xf32> to vector<4x1xf32>
    %1061 = vector.broadcast %1060 : vector<4x1xf32> to vector<4x256xf32>
    %1062 = arith.mulf %936, %1061 : vector<4x256xf32>
    %1063 = vector.extract_strided_slice %931 {offsets = [0, 22], sizes = [4, 1], strides = [1, 1]} : vector<4x49xf32> to vector<4x1xf32>
    %1064 = vector.broadcast %1063 : vector<4x1xf32> to vector<4x256xf32>
    %1065 = arith.mulf %941, %1064 : vector<4x256xf32>
    %1066 = arith.addf %1062, %1065 : vector<4x256xf32>
    %1067 = vector.extract_strided_slice %931 {offsets = [0, 23], sizes = [4, 1], strides = [1, 1]} : vector<4x49xf32> to vector<4x1xf32>
    %1068 = vector.broadcast %1067 : vector<4x1xf32> to vector<4x256xf32>
    %1069 = arith.mulf %946, %1068 : vector<4x256xf32>
    %1070 = arith.addf %1066, %1069 : vector<4x256xf32>
    %1071 = vector.extract_strided_slice %931 {offsets = [0, 24], sizes = [4, 1], strides = [1, 1]} : vector<4x49xf32> to vector<4x1xf32>
    %1072 = vector.broadcast %1071 : vector<4x1xf32> to vector<4x256xf32>
    %1073 = arith.mulf %929, %1072 : vector<4x256xf32>
    %1074 = arith.addf %1070, %1073 : vector<4x256xf32>
    %1075 = vector.extract_strided_slice %931 {offsets = [0, 25], sizes = [4, 1], strides = [1, 1]} : vector<4x49xf32> to vector<4x1xf32>
    %1076 = vector.broadcast %1075 : vector<4x1xf32> to vector<4x256xf32>
    %1077 = arith.mulf %951, %1076 : vector<4x256xf32>
    %1078 = arith.addf %1074, %1077 : vector<4x256xf32>
    %1079 = vector.extract_strided_slice %931 {offsets = [0, 26], sizes = [4, 1], strides = [1, 1]} : vector<4x49xf32> to vector<4x1xf32>
    %1080 = vector.broadcast %1079 : vector<4x1xf32> to vector<4x256xf32>
    %1081 = arith.mulf %956, %1080 : vector<4x256xf32>
    %1082 = arith.addf %1078, %1081 : vector<4x256xf32>
    %1083 = vector.extract_strided_slice %931 {offsets = [0, 27], sizes = [4, 1], strides = [1, 1]} : vector<4x49xf32> to vector<4x1xf32>
    %1084 = vector.broadcast %1083 : vector<4x1xf32> to vector<4x256xf32>
    %1085 = arith.mulf %961, %1084 : vector<4x256xf32>
    %1086 = arith.addf %1082, %1085 : vector<4x256xf32>
    %1087 = arith.addf %1059, %1086 : vector<4x256xf32>
    %1088 = vector.extract_strided_slice %931 {offsets = [0, 28], sizes = [4, 1], strides = [1, 1]} : vector<4x49xf32> to vector<4x1xf32>
    %1089 = vector.broadcast %1088 : vector<4x1xf32> to vector<4x256xf32>
    %1090 = arith.mulf %936, %1089 : vector<4x256xf32>
    %1091 = vector.extract_strided_slice %931 {offsets = [0, 29], sizes = [4, 1], strides = [1, 1]} : vector<4x49xf32> to vector<4x1xf32>
    %1092 = vector.broadcast %1091 : vector<4x1xf32> to vector<4x256xf32>
    %1093 = arith.mulf %941, %1092 : vector<4x256xf32>
    %1094 = arith.addf %1090, %1093 : vector<4x256xf32>
    %1095 = vector.extract_strided_slice %931 {offsets = [0, 30], sizes = [4, 1], strides = [1, 1]} : vector<4x49xf32> to vector<4x1xf32>
    %1096 = vector.broadcast %1095 : vector<4x1xf32> to vector<4x256xf32>
    %1097 = arith.mulf %946, %1096 : vector<4x256xf32>
    %1098 = arith.addf %1094, %1097 : vector<4x256xf32>
    %1099 = vector.extract_strided_slice %931 {offsets = [0, 31], sizes = [4, 1], strides = [1, 1]} : vector<4x49xf32> to vector<4x1xf32>
    %1100 = vector.broadcast %1099 : vector<4x1xf32> to vector<4x256xf32>
    %1101 = arith.mulf %929, %1100 : vector<4x256xf32>
    %1102 = arith.addf %1098, %1101 : vector<4x256xf32>
    %1103 = vector.extract_strided_slice %931 {offsets = [0, 32], sizes = [4, 1], strides = [1, 1]} : vector<4x49xf32> to vector<4x1xf32>
    %1104 = vector.broadcast %1103 : vector<4x1xf32> to vector<4x256xf32>
    %1105 = arith.mulf %951, %1104 : vector<4x256xf32>
    %1106 = arith.addf %1102, %1105 : vector<4x256xf32>
    %1107 = vector.extract_strided_slice %931 {offsets = [0, 33], sizes = [4, 1], strides = [1, 1]} : vector<4x49xf32> to vector<4x1xf32>
    %1108 = vector.broadcast %1107 : vector<4x1xf32> to vector<4x256xf32>
    %1109 = arith.mulf %956, %1108 : vector<4x256xf32>
    %1110 = arith.addf %1106, %1109 : vector<4x256xf32>
    %1111 = vector.extract_strided_slice %931 {offsets = [0, 34], sizes = [4, 1], strides = [1, 1]} : vector<4x49xf32> to vector<4x1xf32>
    %1112 = vector.broadcast %1111 : vector<4x1xf32> to vector<4x256xf32>
    %1113 = arith.mulf %961, %1112 : vector<4x256xf32>
    %1114 = arith.addf %1110, %1113 : vector<4x256xf32>
    %c240_i32_166 = arith.constant 240 : i32
    %1115 = tpu.dynamic_rotate %1114 by %c240_i32_166 dim 1 : vector<4x256xf32>, i32 -> vector<4x256xf32>
    %cst_167 = arith.constant 0.000000e+00 : f32
    %1116 = vector.shape_cast %37 : vector<1x256xi1> to vector<1x256xi1>
    %1117 = vector.broadcast %1116 : vector<1x256xi1> to vector<4x256xi1>
    %1118 = vector.broadcast %cst_167 : f32 to vector<4x256xf32>
    %1119 = arith.select %1117, %1115, %1118 : vector<4x256xi1>, vector<4x256xf32>
    %1120 = arith.addf %1087, %1119 : vector<4x256xf32>
    %1121 = vector.extract_strided_slice %931 {offsets = [0, 35], sizes = [4, 1], strides = [1, 1]} : vector<4x49xf32> to vector<4x1xf32>
    %1122 = vector.broadcast %1121 : vector<4x1xf32> to vector<4x256xf32>
    %1123 = arith.mulf %936, %1122 : vector<4x256xf32>
    %1124 = vector.extract_strided_slice %931 {offsets = [0, 36], sizes = [4, 1], strides = [1, 1]} : vector<4x49xf32> to vector<4x1xf32>
    %1125 = vector.broadcast %1124 : vector<4x1xf32> to vector<4x256xf32>
    %1126 = arith.mulf %941, %1125 : vector<4x256xf32>
    %1127 = arith.addf %1123, %1126 : vector<4x256xf32>
    %1128 = vector.extract_strided_slice %931 {offsets = [0, 37], sizes = [4, 1], strides = [1, 1]} : vector<4x49xf32> to vector<4x1xf32>
    %1129 = vector.broadcast %1128 : vector<4x1xf32> to vector<4x256xf32>
    %1130 = arith.mulf %946, %1129 : vector<4x256xf32>
    %1131 = arith.addf %1127, %1130 : vector<4x256xf32>
    %1132 = vector.extract_strided_slice %931 {offsets = [0, 38], sizes = [4, 1], strides = [1, 1]} : vector<4x49xf32> to vector<4x1xf32>
    %1133 = vector.broadcast %1132 : vector<4x1xf32> to vector<4x256xf32>
    %1134 = arith.mulf %929, %1133 : vector<4x256xf32>
    %1135 = arith.addf %1131, %1134 : vector<4x256xf32>
    %1136 = vector.extract_strided_slice %931 {offsets = [0, 39], sizes = [4, 1], strides = [1, 1]} : vector<4x49xf32> to vector<4x1xf32>
    %1137 = vector.broadcast %1136 : vector<4x1xf32> to vector<4x256xf32>
    %1138 = arith.mulf %951, %1137 : vector<4x256xf32>
    %1139 = arith.addf %1135, %1138 : vector<4x256xf32>
    %1140 = vector.extract_strided_slice %931 {offsets = [0, 40], sizes = [4, 1], strides = [1, 1]} : vector<4x49xf32> to vector<4x1xf32>
    %1141 = vector.broadcast %1140 : vector<4x1xf32> to vector<4x256xf32>
    %1142 = arith.mulf %956, %1141 : vector<4x256xf32>
    %1143 = arith.addf %1139, %1142 : vector<4x256xf32>
    %1144 = vector.extract_strided_slice %931 {offsets = [0, 41], sizes = [4, 1], strides = [1, 1]} : vector<4x49xf32> to vector<4x1xf32>
    %1145 = vector.broadcast %1144 : vector<4x1xf32> to vector<4x256xf32>
    %1146 = arith.mulf %961, %1145 : vector<4x256xf32>
    %1147 = arith.addf %1143, %1146 : vector<4x256xf32>
    %c224_i32_168 = arith.constant 224 : i32
    %1148 = tpu.dynamic_rotate %1147 by %c224_i32_168 dim 1 : vector<4x256xf32>, i32 -> vector<4x256xf32>
    %cst_169 = arith.constant 0.000000e+00 : f32
    %1149 = vector.shape_cast %46 : vector<1x256xi1> to vector<1x256xi1>
    %1150 = vector.broadcast %1149 : vector<1x256xi1> to vector<4x256xi1>
    %1151 = vector.broadcast %cst_169 : f32 to vector<4x256xf32>
    %1152 = arith.select %1150, %1148, %1151 : vector<4x256xi1>, vector<4x256xf32>
    %1153 = arith.addf %1120, %1152 : vector<4x256xf32>
    %1154 = vector.extract_strided_slice %931 {offsets = [0, 42], sizes = [4, 1], strides = [1, 1]} : vector<4x49xf32> to vector<4x1xf32>
    %1155 = vector.broadcast %1154 : vector<4x1xf32> to vector<4x256xf32>
    %1156 = arith.mulf %936, %1155 : vector<4x256xf32>
    %1157 = vector.extract_strided_slice %931 {offsets = [0, 43], sizes = [4, 1], strides = [1, 1]} : vector<4x49xf32> to vector<4x1xf32>
    %1158 = vector.broadcast %1157 : vector<4x1xf32> to vector<4x256xf32>
    %1159 = arith.mulf %941, %1158 : vector<4x256xf32>
    %1160 = arith.addf %1156, %1159 : vector<4x256xf32>
    %1161 = vector.extract_strided_slice %931 {offsets = [0, 44], sizes = [4, 1], strides = [1, 1]} : vector<4x49xf32> to vector<4x1xf32>
    %1162 = vector.broadcast %1161 : vector<4x1xf32> to vector<4x256xf32>
    %1163 = arith.mulf %946, %1162 : vector<4x256xf32>
    %1164 = arith.addf %1160, %1163 : vector<4x256xf32>
    %1165 = vector.extract_strided_slice %931 {offsets = [0, 45], sizes = [4, 1], strides = [1, 1]} : vector<4x49xf32> to vector<4x1xf32>
    %1166 = vector.broadcast %1165 : vector<4x1xf32> to vector<4x256xf32>
    %1167 = arith.mulf %929, %1166 : vector<4x256xf32>
    %1168 = arith.addf %1164, %1167 : vector<4x256xf32>
    %1169 = vector.extract_strided_slice %931 {offsets = [0, 46], sizes = [4, 1], strides = [1, 1]} : vector<4x49xf32> to vector<4x1xf32>
    %1170 = vector.broadcast %1169 : vector<4x1xf32> to vector<4x256xf32>
    %1171 = arith.mulf %951, %1170 : vector<4x256xf32>
    %1172 = arith.addf %1168, %1171 : vector<4x256xf32>
    %1173 = vector.extract_strided_slice %931 {offsets = [0, 47], sizes = [4, 1], strides = [1, 1]} : vector<4x49xf32> to vector<4x1xf32>
    %1174 = vector.broadcast %1173 : vector<4x1xf32> to vector<4x256xf32>
    %1175 = arith.mulf %956, %1174 : vector<4x256xf32>
    %1176 = arith.addf %1172, %1175 : vector<4x256xf32>
    %1177 = vector.extract_strided_slice %931 {offsets = [0, 48], sizes = [4, 1], strides = [1, 1]} : vector<4x49xf32> to vector<4x1xf32>
    %1178 = vector.broadcast %1177 : vector<4x1xf32> to vector<4x256xf32>
    %1179 = arith.mulf %961, %1178 : vector<4x256xf32>
    %1180 = arith.addf %1176, %1179 : vector<4x256xf32>
    %c208_i32_170 = arith.constant 208 : i32
    %1181 = tpu.dynamic_rotate %1180 by %c208_i32_170 dim 1 : vector<4x256xf32>, i32 -> vector<4x256xf32>
    %cst_171 = arith.constant 0.000000e+00 : f32
    %1182 = vector.shape_cast %55 : vector<1x256xi1> to vector<1x256xi1>
    %1183 = vector.broadcast %1182 : vector<1x256xi1> to vector<4x256xi1>
    %1184 = vector.broadcast %cst_171 : f32 to vector<4x256xf32>
    %1185 = arith.select %1183, %1181, %1184 : vector<4x256xi1>, vector<4x256xf32>
    %1186 = arith.addf %1153, %1185 : vector<4x256xf32>
    %1187 = vector.broadcast %115 : vector<4x1xf32> to vector<4x256xf32>
    %1188 = arith.addf %1186, %1187 : vector<4x256xf32>
    %1189 = arith.addf %657, %1188 : vector<4x256xf32>
    %c1_172 = arith.constant 1 : index
    %c0_173 = arith.constant 0 : index
    %c0_174 = arith.constant 0 : index
    %1190 = vector.load %arg8[%c1_172, %c0_173, %c0_174] : memref<2x4x256xf32, #tpu.memory_space<vmem>>, vector<1x4x256xf32>
    %1191 = vector.shape_cast %1190 : vector<1x4x256xf32> to vector<4x256xf32>
    %1192 = vector.shape_cast %1189 : vector<4x256xf32> to vector<1x4x256xf32>
    tpu.vector_store %arg8[%c1_172, %c0_173, %c0_174], %1192 {strides = array<i32>} : memref<2x4x256xf32, #tpu.memory_space<vmem>>, vector<1x4x256xf32>,
    return
  }
  func.func @transform_0(%arg0: i32) -> (i32, i32, i32) {
    %c0_i32 = arith.constant 0 : i32
    %c0_i32_0 = arith.constant 0 : i32
    %c0_i32_1 = arith.constant 0 : i32
    return %arg0, %c0_i32, %c0_i32_0 : i32, i32, i32
  }
  func.func @transform_1(%arg0: i32) -> (i32, i32) {
    %c0_i32 = arith.constant 0 : i32
    %c0_i32_0 = arith.constant 0 : i32
    %c0_i32_1 = arith.constant 0 : i32
    return %c0_i32, %c0_i32_0 : i32, i32
  }
  func.func @transform_2(%arg0: i32) -> (i32, i32, i32) {
    %c0_i32 = arith.constant 0 : i32
    %c0_i32_0 = arith.constant 0 : i32
    %c0_i32_1 = arith.constant 0 : i32
    %c0_i32_2 = arith.constant 0 : i32
    return %c0_i32, %c0_i32_0, %c0_i32_1 : i32, i32, i32
  }
  func.func @transform_3(%arg0: i32) -> (i32, i32, i32) {
    %c0_i32 = arith.constant 0 : i32
    %c0_i32_0 = arith.constant 0 : i32
    %c0_i32_1 = arith.constant 0 : i32
    %c0_i32_2 = arith.constant 0 : i32
    return %c0_i32, %c0_i32_0, %c0_i32_1 : i32, i32, i32
  }
  func.func @transform_4(%arg0: i32) -> (i32, i32) {
    %c0_i32 = arith.constant 0 : i32
    %c0_i32_0 = arith.constant 0 : i32
    %c0_i32_1 = arith.constant 0 : i32
    return %c0_i32, %c0_i32_0 : i32, i32
  }
  func.func @transform_5(%arg0: i32) -> (i32, i32) {
    %c0_i32 = arith.constant 0 : i32
    %c0_i32_0 = arith.constant 0 : i32
    %c0_i32_1 = arith.constant 0 : i32
    return %c0_i32, %c0_i32_0 : i32, i32
  }
  func.func @transform_6(%arg0: i32) -> (i32, i32) {
    %c0_i32 = arith.constant 0 : i32
    %c0_i32_0 = arith.constant 0 : i32
    %c0_i32_1 = arith.constant 0 : i32
    return %c0_i32, %c0_i32_0 : i32, i32
  }
  func.func @transform_7(%arg0: i32) -> (i32, i32, i32) {
    %c0_i32 = arith.constant 0 : i32
    %c0_i32_0 = arith.constant 0 : i32
    %c0_i32_1 = arith.constant 0 : i32
    return %arg0, %c0_i32, %c0_i32_0 : i32, i32, i32
  }
}

</mosaic_0001>

<bundles_post_ra>
// kernel: starmlp_pallas.1
= control target key start
LH: loop header
LB: loop body
LE: loop exit
PB: predicated region body
PF: predicated region fallthrough
CT: control target
= control target key end

     0   :  { %v5856_v1 = vmov 1   ;;  %v5926_v2 = vmov 0   ;;  %s3056_s26 = smov 2   ;;  %s3057_s27 = smov 3   ;;  %v5928_v5 = vmov 3   ;;  %v5924_v6 = vmov 7   ;;  %s5824_s0 = inlined_call_operand.vmem [shape: f32[2,4,256], index: 0, kind: input, shape index: {}]   ;;  %s5825_s2 = inlined_call_operand.vmem [shape: f32[2,4,49], index: 2, kind: input, shape index: {}]   ;;  %s5826_s1 = inlined_call_operand.vmem [shape: s32[2,256], index: 1, kind: input, shape index: {}]   ;;  %s5827_s3 = inlined_call_operand.vmem [shape: f32[3,4,1], index: 3, kind: input, shape index: {}]   ;;  %s5828_s5 = inlined_call_operand.vmem [shape: f32[32,1], index: 5, kind: input, shape index: {}]   ;;  %s5829_s4 = inlined_call_operand.vmem [shape: f32[32,4], index: 4, kind: input, shape index: {}]   ;;  %s5830_s6 = inlined_call_operand.vmem [shape: f32[4,16], index: 6, kind: input, shape index: {}]   ;;  %s5831_s7 = inlined_call_operand.vmem [shape: f32[2,4,256], index: 7, kind: output, shape index: {}]  }
   0x1   :  { %v3160_v0 = vld [vmem:[%s5824_s0] sm:$0xff]  ;;  %2852 = vset.pattern.permute.xlu1 %v5856_v1  ;;  %2851 = vset.pattern.permute.xlu0 %v5926_v2  ;;  %v5920_v7 = vmov 8   ;;  %v5916_v8 = vmov 2   ;;  %v5922_v9 = vmov 10   ;;  %v5908_v10 = vmov 15   ;;  %s3069_s30 = smov 1  }
   0x2   :  { %118 = vrot.lane.b32.xlu1 %v3160_v0, %s3056_s26  ;;  %96 = vrot.lane.b32.xlu0 %v3160_v0, %s3057_s27  ;;  %v3170_v3 = vcombine.high %v3160_v0, %v3160_v0  ;;  %v3179_v4 = vld [vmem:[%s5825_s2] sm:$0xf]  ;;  %v5912_v11 = vmov 9   ;;  %v5910_v12 = vmov 4   ;;  %v5918_v13 = vmov 14   ;;  %s3082_s8 = smov 126  }
   0x3   :  { %v5906_v14 = vmov 29   ;;  %v5904_v15 = vmov 17   ;;  %v5902_v16 = vmov 12   ;;  %v5914_v17 = vmov 16   ;;  %s3085_s9 = smov 125   ;;  %s3096_s10 = smov 127  }
   0x4   :  { %v5898_v18 = vmov 35   ;;  %v5900_v19 = vmov 11   ;;  %v5896_v20 = vmov 6   ;;  %v5894_v21 = vmov 28   ;;  %s3110_s13 = smov 48   ;;  %s3111_s14 = smov 32  }
   0x5   :  { %v5892_v22 = vmov 37   ;;  %v5890_v23 = vmov 31   ;;  %v5888_v24 = vmov 45   ;;  %v5884_v25 = vmov 5   ;;  %s3112_s15 = smov 16   ;;  %s3113_s16 = smov 112  }
   0x6   :  { %120 = vrot.lane.b32.xlu1 %v3170_v3, %s3056_s26  ;;  %98 = vrot.lane.b32.xlu0 %v3170_v3, %s3057_s27  ;;  %v5886_v26 = vmov 20   ;;  %v5880_v27 = vmov 18   ;;  %v5882_v28 = vmov 33   ;;  %v5878_v29 = vmov 30   ;;  %s3114_s19 = smov 96   ;;  %s3115_s20 = smov 80  }
   0x7   :  { %v5876_v30 = vmov 40   ;;  %v5874_v31 = vmov 36   ;;  %v5870_v32 = vmov 38   ;;  %v5872_v33 = vmov 47  }
   0x8   :  { %v5866_v34 = vmov 13   ;;  %v5868_v35 = vmov 22   ;;  %v5862_v36 = vmov 19   ;;  %v5864_v37 = vmov 25  }
   0x9   :  { %v5858_v38 = vmov 42   ;;  %v5854_v39 = vmov 43   ;;  %v5852_v40 = vmov 32   ;;  %v5848_v41 = vmov 44  }
   0xa   :  { %226 = vperm.xlu1 %2852, %v3179_v4   ;;  %220 = vperm.xlu0 %2851, %v3179_v4   ;;  %v5846_v43 = vmov 39   ;;  %v5844_v46 = vmov 34   ;;  %v5842_v48 = vmov 46   ;;  %v5840_v50 = vmov 41  }
   0xb   :  { %v5838_v52 = vmov 48   ;;  %v5836_v54 = vmov 21   ;;  %v5832_v56 = vmov 24   ;;  %v5834_v59 = vmov 23  }
   0xc   :  { %v5860_v62 = vmov 26  }
   0xe   :  { %2853 = vset.pattern.permute.xlu1 %v5928_v5  ;;  %2854 = vset.pattern.permute.xlu0 %v5924_v6 }
   0xf   :  { %242 = vperm.xlu1 %2853, %v3179_v4   ;;  %303 = vperm.xlu0 %2854, %v3179_v4  }
  0x13   :  { %2855 = vset.pattern.permute.xlu1 %v5920_v7  ;;  %2857 = vset.pattern.permute.xlu0 %v5916_v8 }
  0x14   :  { %309 = vperm.xlu1 %2855, %v3179_v4   ;;  %234 = vperm.xlu0 %2857, %v3179_v4  }
  0x18   :  { %2856 = vset.pattern.permute.xlu1 %v5922_v9  ;;  %2860 = vset.pattern.permute.xlu0 %v5908_v10 }
  0x19   :  { %325 = vperm.xlu1 %2856, %v3179_v4   ;;  %394 = vperm.xlu0 %2860, %v3179_v4  }
  0x1d   :  { %2858 = vset.pattern.permute.xlu1 %v5912_v11  ;;  %2863 = vset.pattern.permute.xlu0 %v5910_v12 }
  0x1e   :  { %317 = vperm.xlu1 %2858, %v3179_v4   ;;  %259 = vperm.xlu0 %2863, %v3179_v4  }
  0x22   :  { %2859 = vset.pattern.permute.xlu1 %v5918_v13  ;;  %2866 = vset.pattern.permute.xlu0 %v5906_v14 }
  0x23   :  { %388 = vperm.xlu1 %2859, %v3179_v4   ;;  %544 = vperm.xlu0 %2866, %v3179_v4  }
  0x27   :  { %2861 = vset.pattern.permute.xlu1 %v5904_v15  ;;  %140 = vrot.lane.b32.xlu0 %v3170_v3, %s3069_s30 }
  0x28   :  { %410 = vperm.xlu1 %2861, %v3179_v4   ;;  %2869 = vset.pattern.permute.xlu0 %v5902_v16 }
  0x2b   :  { %350 = vperm.xlu0 %2869, %v3179_v4  }
  0x2c   :  { %2862 = vset.pattern.permute.xlu1 %v5914_v17 }
  0x2d   :  { %402 = vperm.xlu1 %2862, %v3179_v4  }
  0x2f   :  { %2872 = vset.pattern.permute.xlu0 %v5898_v18 }
  0x30   :  { %623 = vperm.xlu0 %2872, %v3179_v4  }
  0x31   :  { %2864 = vset.pattern.permute.xlu1 %v5900_v19 }
  0x32   :  { %342 = vperm.xlu1 %2864, %v3179_v4  }
  0x34   :  { %2875 = vset.pattern.permute.xlu0 %v5896_v20 }
  0x35   :  { %275 = vperm.xlu0 %2875, %v3179_v4  }
  0x36   :  { %2865 = vset.pattern.permute.xlu1 %v5894_v21 }
  0x37   :  { %538 = vperm.xlu1 %2865, %v3179_v4  }
  0x39   :  { %2878 = vset.pattern.permute.xlu0 %v5892_v22 }
  0x3a   :  { %637 = vperm.xlu0 %2878, %v3179_v4  }
  0x3b   :  { %2867 = vset.pattern.permute.xlu1 %v5890_v23 }
  0x3c   :  { %560 = vperm.xlu1 %2867, %v3179_v4  }
  0x3e   :  { %2881 = vset.pattern.permute.xlu0 %v5888_v24 }
  0x3f   :  { %730 = vperm.xlu0 %2881, %v3179_v4  }
  0x40   :  { %138 = vrot.lane.b32.xlu1 %v3160_v0, %s3069_s30 }
  0x41   :  { %2868 = vset.pattern.permute.xlu1 %v5884_v25 }
  0x43   :  { %2882 = vset.pattern.permute.xlu0 %v5886_v26 }
  0x44   :  { %267 = vperm.xlu1 %2868, %v3179_v4   ;;  %443 = vperm.xlu0 %2882, %v3179_v4  }
  0x48   :  { %2870 = vset.pattern.permute.xlu1 %v5880_v27  ;;  %178 = vrot.lane.b32.xlu0 %v3160_v0, %s3082_s8 }
  0x49   :  { %427 = vperm.xlu1 %2870, %v3179_v4   ;;  %2885 = vset.pattern.permute.xlu0 %v5882_v28 }
  0x4c   :  { %585 = vperm.xlu0 %2885, %v3179_v4  }
  0x4d   :  { %2871 = vset.pattern.permute.xlu1 %v5878_v29  ;;  %v3109_v29 = vmov 839922192  }
  0x4e   :  { %552 = vperm.xlu1 %2871, %v3179_v4   ;;  %v245_v27 = vunpack.c.l.s4 %v3109_v29 }
  0x50   :  { %200 = vrot.lane.b32.xlu0 %v3170_v3, %s3085_s9  ;;  %v246_v29 = vunpack.c.0.s8 %v245_v27 }
  0x51   :  { %2888 = vset.pattern.permute.xlu0 %v5876_v30 }
  0x52   :  { %2873 = vset.pattern.permute.xlu1 %v5874_v31 }
  0x53   :  { %629 = vperm.xlu1 %2873, %v3179_v4  }
  0x54   :  { %670 = vperm.xlu0 %2888, %v3179_v4  }
  0x57   :  { %2874 = vset.pattern.permute.xlu1 %v5870_v32 }
  0x58   :  { %645 = vperm.xlu1 %2874, %v3179_v4   ;;  %2891 = vset.pattern.permute.xlu0 %v5872_v33 }
  0x59   :  { %755 = vperm.xlu0 %2891, %v3179_v4  }
  0x5c   :  { %2876 = vset.pattern.permute.xlu1 %v5866_v34 }
  0x5d   :  { %358 = vperm.xlu1 %2876, %v3179_v4   ;;  %2894 = vset.pattern.permute.xlu0 %v5868_v35  ;;  %v100_v35 = vlaneseq }
  0x5e   :  { %479 = vperm.xlu0 %2894, %v3179_v4  }
  0x5f   :  { %v107_v31 = vshrl.u32 %v100_v35, 7  ;;  %v3363_v24 = vand.u32 127, %v100_v35 }
  0x61   :  { %2877 = vset.pattern.permute.xlu1 %v5862_v36  ;;  %6112 = vst [vmem:[#allocation4_spill] sm:$0xff] %v3363_v24  ;;  %v3367_v23 = vsub.s32 1, %v107_v31  ;;  %vm5966_vm11 = vcmp.lt.s32.totalorder %v3363_v24, 3  ;;  %vm5949_vm12 = vcmp.lt.s32.totalorder %v3363_v24, 2  ;;  %v3381_v15 = vsub.s32 %v246_v29, %v107_v31 }
  0x62   :  { %435 = vperm.xlu1 %2877, %v3179_v4   ;;  %2897 = vset.pattern.permute.xlu0 %v5864_v37 }
  0x63   :  { %512 = vperm.xlu0 %2897, %v3179_v4   ;;  %6114 = vst [vmem:[#allocation6_spill] sm:$0xff] %v3367_v23  ;;  %6115 = vst [vmem:[#allocation7_spill] sm:$0xff] %v3381_v15 }
  0x66   :  { %2879 = vset.pattern.permute.xlu1 %v5858_v38 }
  0x67   :  { %708 = vperm.xlu1 %2879, %v3179_v4   ;;  %2900 = vset.pattern.permute.xlu0 %v5926_v2 }
  0x6b   :  { %2880 = vset.pattern.permute.xlu1 %v5854_v39 }
  0x6c   :  { %714 = vperm.xlu1 %2880, %v3179_v4  }
  0x70   :  { %158 = vrot.lane.b32.xlu1 %v3160_v0, %s3096_s10 }
  0x71   :  { %2883 = vset.pattern.permute.xlu1 %v5852_v40 }
  0x74   :  { %160 = vrot.lane.b32.xlu1 %v3170_v3, %s3096_s10  ;;  %v3270_v42 = vpop.permute.xlu1 %118  ;;  %v3306_v58 = vpop.permute.xlu0 %96 }
  0x78   :  { %577 = vperm.xlu1 %2883, %v3179_v4   ;;  %v3275_v44 = vpop.permute.xlu1 %120  ;;  %v3312_v61 = vpop.permute.xlu0 %98 }
  0x79   :  { %v124_v10 = vsel %vm5949_vm12, %v3275_v44, %v3270_v42 }
  0x7c   :  { %2884 = vset.pattern.permute.xlu1 %v5848_v41 }
  0x7d   :  { %722 = vperm.xlu1 %2884, %v3179_v4  }
  0x81   :  { %180 = vrot.lane.b32.xlu1 %v3170_v3, %s3082_s8 }
  0x82   :  { %2886 = vset.pattern.permute.xlu1 %v5846_v43 }
  0x85   :  { %662 = vperm.xlu1 %2886, %v3179_v4  }
  0x89   :  { %198 = vrot.lane.b32.xlu1 %v3160_v0, %s3085_s9  ;;  %v3280_v45 = vpop.permute.xlu1 %226  ;;  %v3318_v3 = vpop.permute.xlu0 %220 }
  0x8a   :  { %2887 = vset.pattern.permute.xlu1 %v5844_v46 }
  0x8d   :  { %593 = vperm.xlu1 %2887, %v3179_v4  }
  0x8e   :  { %v3284_v47 = vpop.permute.xlu1 %242 }
  0x91   :  { %2889 = vset.pattern.permute.xlu1 %v5842_v48 }
  0x92   :  { %747 = vperm.xlu1 %2889, %v3179_v4  }
  0x93   :  { %v3288_v49 = vpop.permute.xlu1 %309 }
  0x96   :  { %2890 = vset.pattern.permute.xlu1 %v5840_v50 }
  0x97   :  { %678 = vperm.xlu1 %2890, %v3179_v4  }
  0x98   :  { %v3292_v51 = vpop.permute.xlu1 %325 }
  0x9b   :  { %2892 = vset.pattern.permute.xlu1 %v5838_v52 }
  0x9c   :  { %763 = vperm.xlu1 %2892, %v3179_v4  }
  0x9d   :  { %v3296_v53 = vpop.permute.xlu1 %317 }
  0xa0   :  { %2893 = vset.pattern.permute.xlu1 %v5836_v54  ;;  %v3324_v54 = vpop.permute.xlu0 %303 }
  0xa1   :  { %473 = vperm.xlu1 %2893, %v3179_v4  }
  0xa2   :  { %v3300_v55 = vpop.permute.xlu1 %388 }
  0xa4   :  { %v3329_v50 = vpop.permute.xlu0 %234 }
  0xa5   :  { %2895 = vset.pattern.permute.xlu1 %v5832_v56  ;;  %v5850_v56 = vmov 27  }
  0xa6   :  { %495 = vperm.xlu1 %2895, %v3179_v4  }
  0xa7   :  { %v3304_v57 = vpop.permute.xlu1 %410 }
  0xa8   :  { %v3335_v43 = vpop.permute.xlu0 %394  ;;  %v418_v7 = vrot.slane %v3304_v57, %v3381_v15 }
  0xaa   :  { %2896 = vset.pattern.permute.xlu1 %v5834_v59 }
  0xab   :  { %487 = vperm.xlu1 %2896, %v3179_v4  }
  0xac   :  { %v3310_v60 = vpop.permute.xlu1 %402  ;;  %v3337_v41 = vpop.permute.xlu0 %259 }
  0xaf   :  { %2898 = vset.pattern.permute.xlu1 %v5860_v62  ;;  %v2759_v62 = vld [vmem:[%s5826_s1 + $0x1] ss:$2 sm:$0x3] }
  0xb0   :  { %520 = vperm.xlu1 %2898, %v3179_v4   ;;  %v3343_v40 = vpop.permute.xlu0 %544  ;;  %v53_v36 = vadd.s32 4294967293, %v2759_v62  ;;  %v57_v34 = vadd.s32 4294967294, %v2759_v62  ;;  %v61_v33 = vadd.s32 4294967295, %v2759_v62  ;;  %v65_v25 = vadd.s32 1, %v2759_v62 }
  0xb1   :  { %v3316_v63 = vpop.permute.xlu1 %342  ;;  %v69_v21 = vadd.s32 2, %v2759_v62  ;;  %v73_v19 = vadd.s32 3, %v2759_v62  ;;  %v104_v62 = vsel %vm5966_vm11, %v3312_v61, %v3306_v58 }
  0xb2   :  { %vm54_vm0 = vcmp.ge.s32.totalorder %v53_v36, 0  ;;  %vm55_vm1 = vcmp.lt.s32.totalorder %v53_v36, 16  ;;  %vm58_vm2 = vcmp.ge.s32.totalorder %v57_v34, 0  ;;  %vm59_vm3 = vcmp.lt.s32.totalorder %v57_v34, 16 }
  0xb3   :  { %vm56_vm4 = vmand %vm54_vm0, %vm55_vm1  ;;  %vm62_vm5 = vcmp.ge.s32.totalorder %v61_v33, 0  ;;  %vm63_vm6 = vcmp.lt.s32.totalorder %v61_v33, 16  ;;  %v3365_v36 = vsub.s32 0, %v107_v31  ;;  %vm66_vm9 = vcmp.ge.s32.totalorder %v65_v25, 0 }
  0xb4   :  { %2899 = vset.pattern.permute.xlu1 %v5850_v56  ;;  %vm60_vm7 = vmand %vm58_vm2, %vm59_vm3  ;;  %v105_v26 = vsel %vm56_vm4, 1, %v5926_v2  ;;  %vm67_vm10 = vcmp.lt.s32.totalorder %v65_v25, 16  ;;  %vm70_vm14 = vcmp.ge.s32.totalorder %v69_v21, 0  ;;  %vm71_vm15 = vcmp.lt.s32.totalorder %v69_v21, 16 }
  0xb5   :  { %528 = vperm.xlu1 %2899, %v3179_v4   ;;  %6113 = vst [vmem:[#allocation5_spill] sm:$0xff] %v3365_v36  ;;  %vm64_vm8 = vmand %vm62_vm5, %vm63_vm6  ;;  %v125_v22 = vsel %vm60_vm7, 1, %v5926_v2  ;;  %v109_v33 = vrot.slane %v105_v26, %v3365_v36  ;;  %v113_v20 = vrot.slane %v105_v26, %v3367_v23  ;;  %v6116_v26 = vmov 0 }
  0xb6   :  { %v3322_v59 = vpop.permute.xlu1 %538  ;;  %v145_v35 = vsel %vm64_vm8, 1, %v5926_v2  ;;  %v129_v16 = vrot.slane %v125_v22, %v3365_v36  ;;  %v133_v27 = vrot.slane %v125_v22, %v3367_v23  ;;  %vm68_vm13 = vmand %vm66_vm9, %vm67_vm10  ;;  %v6119_v25 = vmov 0 }
  0xb7   :  { %vm3383_vm0 = vcmp.eq.s32.totalorder %v109_v33, 1  ;;  %vm3387_vm1 = vcmp.eq.s32.totalorder %v113_v20, 1  ;;  %v149_v22 = vrot.slane %v145_v35, %v3365_v36  ;;  %v103_v31 = vsel %vm5966_vm11, %v3306_v58, %v3312_v61  ;;  %vm72_vm5 = vmand %vm70_vm14, %vm71_vm15 }
  0xb8   :  { %v6117_v26 = vsel %vm3383_vm0, 4294967295, %v6116_v26  ;;  %v6120_v25 = vsel %vm3387_vm1, 4294967295, %v6119_v25  ;;  %v153_v29 = vrot.slane %v145_v35, %v3367_v23  ;;  %vm74_vm2 = vcmp.ge.s32.totalorder %v73_v19, 0 }
  0xb9   :  { %2901 = vset.pattern.permute.xlu1 %v5856_v1  ;;  %v3347_v1 = vpop.permute.xlu0 %140  ;;  %6118 = vst [vmem:[#allocation8_spill] sm:$0xff] %v6117_v26  ;;  %6121 = vst [vmem:[#allocation9_spill] sm:$0xff] %v6120_v25  ;;  %vm75_vm3 = vcmp.lt.s32.totalorder %v73_v19, 16  ;;  %vm3405_vm4 = vcmp.eq.s32.totalorder %v129_v16, 1  ;;  %v6123_v33 = vmov 0  ;;  %v165_v12 = vsel %vm68_vm13, 1, %v5926_v2 }
  0xba   :  { %v6124_v33 = vsel %vm3405_vm4, 4294967295, %v6123_v33  ;;  %vm3415_vm6 = vcmp.eq.s32.totalorder %v133_v27, 1  ;;  %v6126_v58 = vmov 0  ;;  %v123_v16 = vsel %vm5949_vm12, %v3270_v42, %v3275_v44  ;;  %vm76_vm9 = vmand %vm74_vm2, %vm75_vm3 }
  0xbb   :  { %v3327_v52 = vpop.permute.xlu1 %560  ;;  %6125 = vst [vmem:[#allocation11_spill] sm:$0xff] %v6124_v33  ;;  %v6127_v58 = vsel %vm3415_vm6, 4294967295, %v6126_v58  ;;  %v3425_v19 = vsel %vm3383_vm0, %v104_v62, 0.0  ;;  %v250_v61 = vrot.slane %v3284_v47, %v3381_v15  ;;  %v3431_v21 = vsel %vm3387_vm1, %v103_v31, 0.0 }
  0xbc   :  { %6128 = vst [vmem:[#allocation12_spill] sm:$0xff] %v6127_v58  ;;  %6129 = vst [vmem:[#allocation13_spill] sm:$0xff] %v3431_v21  ;;  %vm5948_vm7 = vcmp.lt.s32.totalorder %v3363_v24, 1  ;;  %vm3434_vm8 = vcmp.eq.s32.totalorder %v149_v22, 1  ;;  %v6130_v35 = vmov 0  ;;  %v3440_v42 = vsel %vm3405_vm4, %v124_v10, 0.0 }
  0xbd   :  { %v3354_v37 = vpop.permute.xlu0 %350  ;;  %v6131_v35 = vsel %vm3434_vm8, 4294967295, %v6130_v35  ;;  %6133 = vst [vmem:[#allocation15_spill] sm:$0xff] %v3440_v42  ;;  %vm3442_vm10 = vcmp.eq.s32.totalorder %v153_v29, 1  ;;  %v6134_v44 = vmov 0  ;;  %v169_v27 = vrot.slane %v165_v12, %v3365_v36 }
  0xbe   :  { %6132 = vst [vmem:[#allocation14_spill] sm:$0xff] %v6131_v35  ;;  %v6135_v44 = vsel %vm3442_vm10, 4294967295, %v6134_v44  ;;  %v185_v62 = vsel %vm72_vm5, 1, %v5926_v2  ;;  %v3452_v22 = vsel %vm3415_vm6, %v123_v16, 0.0  ;;  %v229_v31 = vmul.f32 %v3280_v45, %v3440_v42 }
  0xbf   :  { %v3331_v48 = vpop.permute.xlu1 %138  ;;  %6136 = vst [vmem:[#allocation16_spill] sm:$0xff] %v6135_v44  ;;  %v223_v10 = vmul.f32 %v3318_v3, %v3425_v19  ;;  %v333_v29 = vrot.slane %v3292_v51, %v3381_v15  ;;  %v230_v17 = vmul.f32 %v3280_v45, %v3452_v22  ;;  %v224_v8 = vmul.f32 %v3318_v3, %v3431_v21 }
  0xc0   :  { %v3467_v16 = vmul.f32 %v250_v61, %v3160_v0  ;;  %v3470_v13 = vsel %vm76_vm9, 1, %v5926_v2  ;;  %v173_v9 = vrot.slane %v165_v12, %v3367_v23  ;;  %v189_v51 = vrot.slane %v185_v62, %v3365_v36 }
  0xc1   :  { %v3358_v30 = vpop.permute.xlu0 %623  ;;  %v193_v6 = vrot.slane %v185_v62, %v3367_v23  ;;  %v306_v45 = vmul.f32 %v3324_v54, %v3425_v19  ;;  %v307_v3 = vmul.f32 %v3324_v54, %v3431_v21  ;;  %v312_v61 = vmul.f32 %v3288_v49, %v3440_v42 }
  0xc2   :  { %v313_v2 = vmul.f32 %v3288_v49, %v3452_v22  ;;  %v231_v57 = vadd.f32 %v229_v31, %v223_v10  ;;  %v3486_v12 = vmul.f32 %v333_v29, %v3160_v0  ;;  %vm5965_vm13 = vcmp.lt.s32.totalorder %v3363_v24, 127 }
  0xc3   :  { %v3333_v46 = vpop.permute.xlu1 %267  ;;  %v209_v62 = vrot.slane %v3470_v13, %v3365_v36  ;;  %v213_v58 = vrot.slane %v3470_v13, %v3367_v23  ;;  %v232_v54 = vadd.f32 %v230_v17, %v224_v8  ;;  %v568_v49 = vrot.slane %v3327_v52, %v3381_v15 }
  0xc4   :  { %v143_v31 = vsel %vm5948_vm7, %v3331_v48, %v3347_v1  ;;  %v391_v10 = vmul.f32 %v3300_v55, %v3425_v19  ;;  %v392_v29 = vmul.f32 %v3300_v55, %v3431_v21  ;;  %v3506_v13 = vmul.f32 %v418_v7, %v3160_v0 }
  0xc5   :  { %v3369_v34 = vpop.permute.xlu0 %275  ;;  %v144_v8 = vsel %vm5948_vm7, %v3347_v1, %v3331_v48  ;;  %vm5964_vm14 = vcmp.lt.s32.totalorder %v3363_v24, 126  ;;  %v314_v52 = vadd.f32 %v312_v61, %v306_v45  ;;  %v315_v33 = vadd.f32 %v313_v2, %v307_v3 }
  0xc6   :  { %v397_v25 = vmul.f32 %v3335_v43, %v3440_v42  ;;  %v541_v55 = vmul.f32 %v3322_v59, %v3425_v19  ;;  %vm3519_vm15 = vcmp.eq.s32.totalorder %v169_v27, 1  ;;  %v6138_v7 = vmov 0 }
  0xc7   :  { %v6139_v7 = vsel %vm3519_vm15, 4294967295, %v6138_v7  ;;  %vm3523_vm2 = vcmp.eq.s32.totalorder %v173_v9, 1  ;;  %v6140_v26 = vmov 0  ;;  %v337_v48 = vcombine.high %v3486_v12, %v3486_v12 }
  0xc8   :  { %v3339_v56 = vpop.permute.xlu1 %427  ;;  %v6141_v26 = vsel %vm3523_vm2, 4294967295, %v6140_v26  ;;  %v398_v2 = vmul.f32 %v3335_v43, %v3452_v22  ;;  %v547_v45 = vmul.f32 %v3343_v40, %v3440_v42  ;;  %v3537_v27 = vsel %vm3442_vm10, %v143_v31, 0.0 }
  0xc9   :  { %v3395_v14 = vpop.permute.xlu0 %637  ;;  %v548_v9 = vmul.f32 %v3343_v40, %v3452_v22  ;;  %v542_v3 = vmul.f32 %v3322_v59, %v3431_v21  ;;  %v3544_v61 = vmul.f32 %v568_v49, %v3160_v0  ;;  %v3548_v23 = vsel %vm3434_vm8, %v144_v8, 0.0 }
  0xca   :  { %6143 = vst [vmem:[#allocation19_spill] sm:$0xff] %v3548_v23  ;;  %vm3550_vm3 = vcmp.eq.s32.totalorder %v189_v51, 1  ;;  %v6144_v43 = vmov 0  ;;  %vm3554_vm5 = vcmp.eq.s32.totalorder %v193_v6, 1  ;;  %v6146_v31 = vmov 0 }
  0xcb   :  { %v6145_v43 = vsel %vm3550_vm3, 4294967295, %v6144_v43  ;;  %v6147_v31 = vsel %vm3554_vm5, 4294967295, %v6146_v31  ;;  %v399_v44 = vadd.f32 %v397_v25, %v391_v10  ;;  %v400_v40 = vadd.f32 %v398_v2, %v392_v29 }
  0xcc   :  { %v422_v59 = vcombine.high %v3506_v13, %v3506_v13  ;;  %v626_v8 = vmul.f32 %v3358_v30, %v3425_v19  ;;  %v627_v51 = vmul.f32 %v3358_v30, %v3431_v21  ;;  %v549_v35 = vadd.f32 %v547_v45, %v541_v55 }
  0xcd   :  { %v3341_v4 = vpop.permute.xlu1 %552  ;;  %v3460_v11 = vpop.permute.xlu0 %730  ;;  %v238_v6 = vmul.f32 %v3329_v50, %v3537_v27  ;;  %v237_v25 = vmul.f32 %v3329_v50, %v3548_v23  ;;  %v321_v10 = vmul.f32 %v3296_v53, %v3537_v27  ;;  %v406_v29 = vmul.f32 %v3310_v60, %v3537_v27 }
  0xce   :  { %v738_v49 = vrot.slane %v3460_v11, %v3381_v15  ;;  %v320_v11 = vmul.f32 %v3296_v53, %v3548_v23  ;;  %v550_v30 = vadd.f32 %v548_v9, %v542_v3  ;;  %v572_v55 = vcombine.high %v3544_v61, %v3544_v61 }
  0xcf   :  { %v555_v2 = vmul.f32 %v3341_v4, %v3548_v23  ;;  %v405_v45 = vmul.f32 %v3310_v60, %v3548_v23  ;;  %v640_v9 = vmul.f32 %v3395_v14, %v3548_v23  ;;  %vm5963_vm9 = vcmp.lt.s32.totalorder %v3363_v24, 125 }
  0xd0   :  { %v3585_v50 = vmul.f32 %v738_v49, %v3160_v0  ;;  %vm3602_vm7 = vcmp.eq.s32.totalorder %v209_v62, 1  ;;  %vm3606_vm12 = vcmp.eq.s32.totalorder %v213_v58, 1  ;;  %v240_v23 = vadd.f32 %v238_v6, %v232_v54 }
  0xd1   :  { %v3512_v17 = vpop.permute.xlu0 %443  ;;  %vm6232_vm1 = vcmp.lt.s32.totalorder %v3363_v24, 16 }
  0xd2   :  { %v3345_v39 = vpop.permute.xlu1 %629  ;;  %6137 = vst [vmem:[#allocation17_spill] sm:$0xff] %v3512_v17  ;;  %6149 = vst [vmem:[#allocation21_spill] sm:$0xff] %v3585_v50  ;;  %v6153_v50 = vmov 0 }
  0xd3   :  { %v632_v53 = vmul.f32 %v3345_v39, %v3440_v42  ;;  %v6154_v50 = vsel %vm3606_vm12, 4294967295, %v6153_v50  ;;  %v557_v42 = vadd.f32 %v555_v2, %v549_v35  ;;  %v633_v35 = vmul.f32 %v3345_v39, %v3452_v22  ;;  %vm6233_vm0 = vmmov %vm6232_vm1 }
  0xd4   :  { %6155 = vst [vmem:[#allocation23_spill] sm:$0xff] %v6154_v50 }
  0xd5   :  { %v179_v36 = vpop.permute.xlu0 %178  ;;  %v634_v58 = vadd.f32 %v632_v53, %v626_v8 }
  0xd7   :  { %v3349_v38 = vpop.permute.xlu1 %645 }
  0xd8   :  { %v653_v3 = vrot.slane %v3349_v38, %v3381_v15  ;;  %v323_v38 = vadd.f32 %v321_v10, %v315_v33  ;;  %v322_v15 = vadd.f32 %v320_v11, %v314_v52  ;;  %v3653_v10 = vadd.f32 %v3544_v61, %v557_v42 }
  0xdc   :  { %v3356_v32 = vpop.permute.xlu1 %358 }
  0xdd   :  { %6110 = vst [vmem:[#allocation2_spill] sm:$0xff] %v3356_v32  ;;  %v3614_v32 = vpop.permute.xlu0 %585 }
  0xe1   :  { %v3360_v28 = vpop.permute.xlu1 %435 }
  0xe2   :  { %6111 = vst [vmem:[#allocation3_spill] sm:$0xff] %v3360_v28 }
  0xe6   :  { %v3374_v18 = vpop.permute.xlu1 %708 }
  0xe7   :  { %v711_v42 = vmul.f32 %v3374_v18, %v3425_v19 }
  0xeb   :  { %v3403_v20 = vpop.permute.xlu1 %714 }
  0xec   :  { %6122 = vst [vmem:[#allocation10_spill] sm:$0xff] %v3403_v20  ;;  %v408_v20 = vadd.f32 %v406_v29, %v400_v40  ;;  %v340_v40 = vadd.f32 %v337_v48, %v323_v38 }
  0xef   :  { %v3446_v47 = vpop.permute.xlu1 %158 }
  0xf3   :  { %v161_v5 = vpop.permute.xlu1 %160 }
  0xf4   :  { %v163_v60 = vsel %vm5965_vm13, %v3446_v47, %v161_v5  ;;  %v164_v49 = vsel %vm5965_vm13, %v161_v5, %v3446_v47  ;;  %v407_v47 = vadd.f32 %v405_v45, %v399_v44 }
  0xf5   :  { %v3618_v54 = vsel %vm3519_vm15, %v163_v60, 0.0  ;;  %v3622_v33 = vsel %vm3523_vm2, %v164_v49, 0.0 }
  0xf6   :  { %v263_v8 = vmul.f32 %v3337_v41, %v3622_v33  ;;  %v262_v6 = vmul.f32 %v3337_v41, %v3618_v54  ;;  %v424_v29 = vadd.f32 %v3506_v13, %v407_v47  ;;  %v201_v41 = vpop.permute.xlu0 %200  ;;  %v346_v13 = vmul.f32 %v3316_v63, %v3622_v33 }
  0xf7   :  { %v3527_v1 = vpop.permute.xlu1 %577  ;;  %v345_v48 = vmul.f32 %v3316_v63, %v3618_v54  ;;  %v431_v47 = vmul.f32 %v3339_v56, %v3622_v33 }
  0xf8   :  { %6142 = vst [vmem:[#allocation18_spill] sm:$0xff] %v3527_v1  ;;  %v239_v1 = vadd.f32 %v237_v25, %v231_v57  ;;  %v3628_v57 = vmul.f32 %v3395_v14, %v3537_v27  ;;  %v425_v25 = vadd.f32 %v422_v59, %v408_v20  ;;  %v348_v38 = vadd.f32 %v346_v13, %v340_v40  ;;  %v6160_v40 = vld [vmem:[#allocation10_spill] sm:$0xff]  ;;  %v6163_v13 = vld [vmem:[#allocation19_spill] sm:$0xff] }
  0xfa   :  { %v256_v14 = vadd.f32 %v3467_v16, %v239_v1 }
  0xfc   :  { %v3568_v17 = vpop.permute.xlu1 %722 }
  0xfd   :  { %6148 = vst [vmem:[#allocation20_spill] sm:$0xff] %v3568_v17  ;;  %v556_v17 = vmul.f32 %v3341_v4, %v3537_v27  ;;  %v6150_v4 = vmov 0 }
  0xfe   :  { %v6151_v4 = vsel %vm3602_vm7, 4294967295, %v6150_v4 }
  0xff   :  { %6152 = vst [vmem:[#allocation22_spill] sm:$0xff] %v6151_v4  ;;  %v558_v62 = vadd.f32 %v556_v17, %v550_v30  ;;  %v3658_v30 = vadd.f32 %v633_v35, %v627_v51  ;;  %v264_v51 = vadd.f32 %v262_v6, %v256_v14  ;;  %v6158_v14 = vld [vmem:[#allocation13_spill] sm:$0xff] }
 0x100   :  { %v181_v28 = vpop.permute.xlu1 %180 }
 0x101   :  { %v183_v21 = vsel %vm5964_vm14, %v179_v36, %v181_v28  ;;  %v184_v5 = vsel %vm5964_vm14, %v181_v28, %v179_v36  ;;  %v3631_v28 = vmul.f32 %v653_v3, %v3160_v0  ;;  %v6156_v36 = vcombine.high %v3467_v16, %v3467_v16 }
 0x102   :  { %v3638_v17 = vsel %vm3550_vm3, %v183_v21, 0.0  ;;  %v3642_v52 = vsel %vm3554_vm5, %v184_v5, 0.0  ;;  %v642_v21 = vadd.f32 %v640_v9, %v634_v58  ;;  %v3655_v11 = vadd.f32 %v572_v55, %v558_v62 }
 0x103   :  { %v257_v44 = vadd.f32 %v6156_v36, %v240_v23  ;;  %v339_v23 = vadd.f32 %v3486_v12, %v322_v15  ;;  %v657_v16 = vcombine.high %v3631_v28, %v3631_v28  ;;  %v271_v1 = vmul.f32 %v3333_v46, %v3642_v52 }
 0x104   :  { %v3644_v39 = vpop.permute.xlu1 %662  ;;  %v270_v15 = vmul.f32 %v3333_v46, %v3638_v17  ;;  %v3667_v20 = vadd.f32 %v3631_v28, %v642_v21  ;;  %v354_v45 = vmul.f32 %v3354_v37, %v3642_v52  ;;  %v353_v63 = vmul.f32 %v3354_v37, %v3638_v17  ;;  %v6157_v37 = vld [vmem:[#allocation2_spill] sm:$0xff] }
 0x105   :  { %v265_v59 = vadd.f32 %v263_v8, %v257_v44  ;;  %v347_v5 = vadd.f32 %v345_v48, %v339_v23  ;;  %v430_v62 = vmul.f32 %v3339_v56, %v3618_v54  ;;  %v6159_v8 = vld [vmem:[#allocation15_spill] sm:$0xff]  ;;  %v6161_v23 = vld [vmem:[#allocation18_spill] sm:$0xff]  ;;  %v6164_v48 = vld [vmem:[#allocation20_spill] sm:$0xff] }
 0x106   :  { %v272_v3 = vadd.f32 %v270_v15, %v264_v51  ;;  %v717_v6 = vmul.f32 %v6160_v40, %v6159_v8  ;;  %v580_v21 = vmul.f32 %v6161_v23, %v3618_v54  ;;  %v356_v15 = vadd.f32 %v354_v45, %v348_v38 }
 0x107   :  { %v273_v53 = vadd.f32 %v271_v1, %v265_v59  ;;  %v6162_v1 = vld [vmem:[#allocation3_spill] sm:$0xff]  ;;  %v432_v59 = vadd.f32 %v430_v62, %v424_v29  ;;  %v588_v62 = vmul.f32 %v3614_v32, %v3638_v17 }
 0x108   :  { %v199_v12 = vpop.permute.xlu1 %198  ;;  %v439_v56 = vmul.f32 %v6162_v1, %v3642_v52  ;;  %v719_v38 = vadd.f32 %v717_v6, %v711_v42 }
 0x109   :  { %v203_v61 = vsel %vm5963_vm9, %v199_v12, %v201_v41  ;;  %v204_v46 = vsel %vm5963_vm9, %v201_v41, %v199_v12  ;;  %v355_v41 = vadd.f32 %v353_v63, %v347_v5  ;;  %v438_v12 = vmul.f32 %v6162_v1, %v3638_v17  ;;  %v671_v1 = vpop.permute.xlu0 %670 }
 0x10a   :  { %v3681_v55 = vsel %vm3602_vm7, %v203_v61, 0.0  ;;  %v3685_v2 = vsel %vm3606_vm12, %v204_v46, 0.0  ;;  %v725_v61 = vmul.f32 %v6164_v48, %v6163_v13  ;;  %v433_v46 = vadd.f32 %v431_v47, %v425_v25 }
 0x10b   :  { %v279_v9 = vmul.f32 %v3369_v34, %v3685_v2  ;;  %v278_v60 = vmul.f32 %v3369_v34, %v3681_v55  ;;  %v362_v36 = vmul.f32 %v6157_v37, %v3685_v2  ;;  %v361_v44 = vmul.f32 %v6157_v37, %v3681_v55 }
 0x10c   :  { %v594_v49 = vpop.permute.xlu1 %593  ;;  %v712_v34 = vmul.f32 %v3374_v18, %v6158_v14  ;;  %v581_v18 = vmul.f32 %v6161_v23, %v3622_v33  ;;  %v718_v63 = vmul.f32 %v6160_v40, %v3452_v22  ;;  %v665_v5 = vmul.f32 %v3644_v39, %v3618_v54 }
 0x10d   :  { %v281_v58 = vadd.f32 %v279_v9, %v273_v53  ;;  %v280_v35 = vadd.f32 %v278_v60, %v272_v3  ;;  %v364_v53 = vadd.f32 %v362_v36, %v356_v15  ;;  %v363_v9 = vadd.f32 %v361_v44, %v355_v41  ;;  %v6165_v3 = vld [vmem:[#allocation17_spill] sm:$0xff] }
 0x10e   :  { %v447_v60 = vmul.f32 %v6165_v3, %v3685_v2  ;;  %v446_v45 = vmul.f32 %v6165_v3, %v3681_v55  ;;  %v589_v25 = vmul.f32 %v3614_v32, %v3642_v52  ;;  %v441_v29 = vadd.f32 %v439_v56, %v433_v46  ;;  %v77_v3 = vld [vmem:[%s5827_s3] sm:$0xf] }
 0x10f   :  { %284 = vrot.lane.b32.xlu1 %v281_v58, %s3110_s13  ;;  %282 = vrot.lane.b32.xlu0 %v280_v35, %s3110_s13  ;;  %v440_v47 = vadd.f32 %v438_v12, %v432_v59  ;;  %v582_v58 = vadd.f32 %v580_v21, %v3653_v10  ;;  %v583_v42 = vadd.f32 %v581_v18, %v3655_v11 }
 0x110   :  { %v726_v35 = vmul.f32 %v6164_v48, %v3537_v27  ;;  %v727_v37 = vadd.f32 %v725_v61, %v719_v38  ;;  %v596_v36 = vmul.f32 %v594_v49, %v3681_v55  ;;  %v597_v44 = vmul.f32 %v594_v49, %v3685_v2 }
 0x111   :  { %v748_v51 = vpop.permute.xlu1 %747  ;;  %v449_v40 = vadd.f32 %v447_v60, %v441_v29  ;;  %v448_v6 = vadd.f32 %v446_v45, %v440_v47  ;;  %v643_v23 = vadd.f32 %v3628_v57, %v3658_v30  ;;  %v720_v56 = vadd.f32 %v718_v63, %v712_v34  ;;  %v6166_v30 = vld [vmem:[#allocation21_spill] sm:$0xff] }
 0x112   :  { %v666_v32 = vmul.f32 %v3644_v39, %v3622_v33  ;;  %v667_v10 = vadd.f32 %v665_v5, %v3667_v20  ;;  %v750_v21 = vmul.f32 %v748_v51, %v3618_v54  ;;  %v591_v49 = vadd.f32 %v589_v25, %v583_v42 }
 0x113   :  { %367 = vrot.lane.b32.xlu1 %v364_v53, %s3111_s14  ;;  %365 = vrot.lane.b32.xlu0 %v363_v9, %s3111_s14  ;;  %v590_v15 = vadd.f32 %v588_v62, %v582_v58  ;;  %v728_v41 = vadd.f32 %v726_v35, %v720_v56  ;;  %v660_v57 = vadd.f32 %v657_v16, %v643_v23  ;;  %v756_v16 = vpop.permute.xlu0 %755  ;;  %v6167_v56 = vld [vmem:[#allocation7_spill] sm:$0xff] }
 0x114   :  { %v744_v34 = vadd.f32 %v6166_v30, %v727_v37  ;;  %v599_v20 = vadd.f32 %v597_v44, %v591_v49  ;;  %v673_v18 = vmul.f32 %v671_v1, %v3638_v17  ;;  %v742_v48 = vcombine.high %v6166_v30, %v6166_v30 }
 0x115   :  { %v598_v12 = vadd.f32 %v596_v36, %v590_v15  ;;  %v668_v61 = vadd.f32 %v666_v32, %v660_v57  ;;  %v751_v46 = vmul.f32 %v748_v51, %v3622_v33  ;;  %v674_v60 = vmul.f32 %v671_v1, %v3642_v52  ;;  %v3773_v36 = vld [vmem:[%s5825_s2] sm:$0xf] }
 0x116   :  { %v679_v11 = vpop.permute.xlu1 %678  ;;  %v752_v59 = vadd.f32 %v750_v21, %v744_v34  ;;  %v675_v28 = vadd.f32 %v673_v18, %v667_v10  ;;  %v745_v9 = vadd.f32 %v742_v48, %v728_v41  ;;  %v758_v38 = vmul.f32 %v756_v16, %v3638_v17 }
 0x117   :  { %452 = vrot.lane.b32.xlu1 %v449_v40, %s3112_s15  ;;  %450 = vrot.lane.b32.xlu0 %v448_v6, %s3112_s15  ;;  %v681_v39 = vmul.f32 %v679_v11, %v3681_v55  ;;  %v682_v45 = vmul.f32 %v679_v11, %v3685_v2  ;;  %v676_v25 = vadd.f32 %v674_v60, %v668_v61  ;;  %v480_v44 = vpop.permute.xlu0 %479  ;;  %v5977_v57 = vmov 0.0  }
 0x118   :  { %v753_v5 = vadd.f32 %v751_v46, %v745_v9  ;;  %v760_v29 = vadd.f32 %v758_v38, %v752_v59  ;;  %v759_v35 = vmul.f32 %v756_v16, %v3642_v52  ;;  %v482_v10 = vmul.f32 %v480_v44, %v6159_v8  ;;  %903 = vmatprep.mubr.f32.mxu0 %v5977_v57 }
 0x119   :  { %v683_v63 = vadd.f32 %v681_v39, %v675_v28  ;;  %v684_v58 = vadd.f32 %v682_v45, %v676_v25  ;;  %v483_v11 = vmul.f32 %v480_v44, %v3452_v22  ;;  %1013 = vmatprep.mubr.f32.mxu1 %v5977_v57  ;;  %v6168_v8 = vmov 3  }
 0x11a   :  { %v761_v37 = vadd.f32 %v759_v35, %v753_v5  ;;  %v6169_v61 = vmov 7   ;;  %v6170_v46 = vmov 10   ;;  %v6171_v16 = vmov 8  }
 0x11b   :  { %v764_v53 = vpop.permute.xlu1 %763  ;;  %602 = vrot.lane.b32.xlu1 %v599_v20, %s3113_s16  ;;  %600 = vrot.lane.b32.xlu0 %v598_v12, %s3113_s16  ;;  %v513_v22 = vpop.permute.xlu0 %512  ;;  %v6173_v45 = vmov 2   ;;  %v6177_v38 = vmov 15   ;;  %v6178_v5 = vmov 29   ;;  %v6179_v25 = vmov 17  }
 0x11c   :  { %v766_v51 = vmul.f32 %v764_v53, %v3681_v55  ;;  %v767_v47 = vmul.f32 %v764_v53, %v3685_v2  ;;  %v515_v39 = vmul.f32 %v513_v22, %v3618_v54  ;;  %v516_v20 = vmul.f32 %v513_v22, %v3622_v33 }
 0x11d   :  { %v6184_v35 = vmov 28   ;;  %v6186_v44 = vmov 31  }
 0x11e   :  { %v768_v42 = vadd.f32 %v766_v51, %v760_v29  ;;  %v769_v6 = vadd.f32 %v767_v47, %v761_v37  ;;  %v6174_v51 = vmov 16   ;;  %v6180_v47 = vmov 12  }
 0x11f   :  { %794 = vperm.xlu0 %2900, %v77_v3   ;;  %685 = vrot.lane.b32.xlu1 %v683_v63, %s3114_s19  ;;  %v6176_v63 = vmov 4   ;;  %v6185_v37 = vmov 37  }
 0x120   :  { %v474_v62 = vpop.permute.xlu1 %473 }
 0x121   :  { %v476_v23 = vmul.f32 %v474_v62, %v3425_v19  ;;  %v477_v1 = vmul.f32 %v474_v62, %v6158_v14  ;;  %v6181_v62 = vmov 11  }
 0x123   :  { %687 = vrot.lane.b32.xlu1 %v684_v58, %s3114_s19  ;;  %770 = vrot.lane.b32.xlu0 %v768_v42, %s3115_s20  ;;  %v484_v49 = vadd.f32 %v482_v10, %v476_v23  ;;  %v485_v15 = vadd.f32 %v483_v11, %v477_v1  ;;  %v6182_v58 = vmov 35   ;;  %v6183_v42 = vmov 6  }
 0x124   :  { %v6189_v23 = vmov 5   ;;  %v6190_v1 = vmov 33   ;;  %v6192_v10 = vmov 30   ;;  %v6193_v11 = vmov 40  }
 0x125   :  { %v496_v40 = vpop.permute.xlu1 %495 }
 0x126   :  { %v503_v32 = vrot.slane %v496_v40, %v6167_v56  ;;  %v6187_v40 = vmov 45  }
 0x127   :  { %772 = vrot.lane.b32.xlu1 %v769_v6, %s3115_s20  ;;  %1578 = vperm.xlu0 %2900, %v3773_v36   ;;  %v6188_v6 = vmov 20  }
 0x128   :  { %v505_v21 = vmul.f32 %v503_v32, %v3160_v0  ;;  %v6191_v32 = vmov 18  }
 0x12a   :  { %v488_v41 = vpop.permute.xlu1 %487  ;;  %v507_v19 = vcombine.high %v505_v21, %v505_v21 }
 0x12b   :  { %v490_v14 = vmul.f32 %v488_v41, %v6163_v13  ;;  %v491_v30 = vmul.f32 %v488_v41, %v3537_v27  ;;  %1584 = vperm.xlu1 %2901, %v3773_v36   ;;  %2902 = vset.pattern.permute.xlu0 %v6168_v8  ;;  %v6196_v41 = vmov 38  }
 0x12c   :  { %1600 = vperm.xlu0 %2902, %v3773_v36  }
 0x12d   :  { %v492_v0 = vadd.f32 %v490_v14, %v484_v49  ;;  %v493_v34 = vadd.f32 %v491_v30, %v485_v15  ;;  %v26_v49 = vld [vmem:[%s5826_s1] ss:$2 sm:$0x3]  ;;  %v6195_v15 = vmov 47  }
 0x12e   :  { %v33_v14 = vadd.s32 4294967294, %v26_v49  ;;  %v37_v22 = vadd.s32 4294967295, %v26_v49 }
 0x12f   :  { %v509_v12 = vadd.f32 %v505_v21, %v492_v0  ;;  %v510_v18 = vadd.f32 %v507_v19, %v493_v34  ;;  %v521_v48 = vpop.permute.xlu1 %520  ;;  %2903 = vset.pattern.permute.xlu1 %v6169_v61  ;;  %v6194_v21 = vmov 36   ;;  %v29_v19 = vadd.s32 4294967293, %v26_v49 }
 0x130   :  { %v523_v27 = vmul.f32 %v521_v48, %v3638_v17  ;;  %v524_v13 = vmul.f32 %v521_v48, %v3642_v52  ;;  %1649 = vperm.xlu1 %2903, %v3773_v36   ;;  %2905 = vset.pattern.permute.xlu0 %v6170_v46  ;;  %v6172_v17 = vmov 14   ;;  %v6197_v0 = vmov 22  }
 0x131   :  { %v517_v59 = vadd.f32 %v515_v39, %v509_v12  ;;  %v518_v53 = vadd.f32 %v516_v20, %v510_v18  ;;  %1671 = vperm.xlu0 %2905, %v3773_v36   ;;  %vm30_vm9 = vcmp.ge.s32.totalorder %v29_v19, 0  ;;  %vm31_vm14 = vcmp.lt.s32.totalorder %v29_v19, 16  ;;  %v6203_v19 = vld [vmem:[#allocation6_spill] sm:$0xff] }
 0x132   :  { %v6198_v34 = vmov 13   ;;  %vm34_vm13 = vcmp.ge.s32.totalorder %v33_v14, 0  ;;  %vm35_vm11 = vcmp.lt.s32.totalorder %v33_v14, 16  ;;  %vm38_vm12 = vcmp.ge.s32.totalorder %v37_v22, 0  ;;  %vm32_vm5 = vmand %vm30_vm9, %vm31_vm14 }
 0x133   :  { %v525_v54 = vadd.f32 %v523_v27, %v517_v59  ;;  %v526_v28 = vadd.f32 %v524_v13, %v518_v53  ;;  %vm39_vm7 = vcmp.lt.s32.totalorder %v37_v22, 16  ;;  %vm36_vm2 = vmand %vm34_vm13, %vm35_vm11  ;;  %v6199_v12 = vmov 25  }
 0x134   :  { %v529_v33 = vpop.permute.xlu1 %528  ;;  %2904 = vset.pattern.permute.xlu1 %v6171_v16  ;;  %v6200_v18 = vmov 19   ;;  %vm40_vm3 = vmand %vm38_vm12, %vm39_vm7  ;;  %v6201_v48 = vmov 0   ;;  %v41_v59 = vadd.s32 1, %v26_v49  ;;  %v6204_v22 = vmov 26  }
 0x135   :  { %v531_v9 = vmul.f32 %v529_v33, %v3681_v55  ;;  %v532_v3 = vmul.f32 %v529_v33, %v3685_v2  ;;  %1655 = vperm.xlu1 %2904, %v3773_v36   ;;  %2908 = vset.pattern.permute.xlu0 %v6172_v17  ;;  %v3815_v55 = vld [vmem:[%s5824_s0 + $0x8] sm:$0xff]  ;;  %v6175_v2 = vmov 9   ;;  %v289_v27 = vsel %vm32_vm5, 1, %v6201_v48 }
 0x136   :  { %1722 = vperm.xlu0 %2908, %v3773_v36   ;;  %v3830_v29 = vcombine.high %v3815_v55, %v3815_v55  ;;  %v372_v53 = vsel %vm36_vm2, 1, %v6201_v48  ;;  %v45_v33 = vadd.s32 2, %v26_v49  ;;  %v297_v14 = vrot.slane %v289_v27, %v6203_v19 }
 0x137   :  { %v3804_v52 = vadd.f32 %v531_v9, %v525_v54  ;;  %v3806_v60 = vadd.f32 %v532_v3, %v526_v28  ;;  %v457_v28 = vsel %vm40_vm3, 1, %v6201_v48  ;;  %v6202_v9 = vld [vmem:[#allocation5_spill] sm:$0xff]  ;;  %vm5983_vm11 = vcmp.lt.s32.totalorder %v3363_v24, 32 }
 0x138   :  { %v293_v3 = vrot.slane %v289_v27, %v6202_v9  ;;  %v376_v57 = vrot.slane %v372_v53, %v6202_v9  ;;  %vm43_vm7 = vcmp.lt.s32.totalorder %v41_v59, 16  ;;  %v49_v27 = vadd.s32 3, %v26_v49 }
 0x139   :  { %2906 = vset.pattern.permute.xlu1 %v6173_v45  ;;  %vm3916_vm5 = vcmp.eq.s32.totalorder %v297_v14, 1  ;;  %v6212_v49 = vmov 0  ;;  %vm6218_vm2 = vcmp.ge.s32.totalorder %v41_v59, 0  ;;  %vm6228_vm10 = vcmp.lt.s32.totalorder %v45_v33, 16 }
 0x13a   :  { %1592 = vperm.xlu1 %2906, %v3773_v36   ;;  %2911 = vset.pattern.permute.xlu0 %v6174_v51  ;;  %vm3912_vm3 = vcmp.eq.s32.totalorder %v293_v3, 1  ;;  %vm3921_vm12 = vcmp.eq.s32.totalorder %v376_v57, 1  ;;  %vm3935_vm14 = vmand %vm6218_vm2, %vm43_vm7  ;;  %v6221_v57 = vmov 0  ;;  %vm50_vm6 = vcmp.ge.s32.totalorder %v49_v27, 0 }
 0x13b   :  { %1736 = vperm.xlu0 %2911, %v3773_v36   ;;  %v6213_v49 = vsel %vm3921_vm12, 4294967295, %v6212_v49  ;;  %vm51_vm7 = vcmp.lt.s32.totalorder %v49_v27, 16  ;;  %vm6230_vm2 = vcmp.lt.s32.totalorder %v3363_v24, 48  ;;  %v6235_v27 = vmov 32  }
 0x13c   :  { %6214 = vst [vmem:[#allocation15_spill] sm:$0xff] %v6213_v49  ;;  %vm6231_vm4 = vmmov %vm6230_vm2 }
 0x13e   :  { %2907 = vset.pattern.permute.xlu1 %v6175_v2 }
 0x13f   :  { %1663 = vperm.xlu1 %2907, %v3773_v36   ;;  %1536 = vrot.lane.b32.xlu0 %v3815_v55, %s3056_s26 }
 0x140   :  { %2912 = vset.pattern.permute.xlu0 %v6176_v63 }
 0x143   :  { %2909 = vset.pattern.permute.xlu1 %v6177_v38  ;;  %1617 = vperm.xlu0 %2912, %v3773_v36  }
 0x144   :  { %1728 = vperm.xlu1 %2909, %v3773_v36  }
 0x147   :  { %2915 = vset.pattern.permute.xlu0 %v6178_v5 }
 0x148   :  { %2910 = vset.pattern.permute.xlu1 %v6179_v25  ;;  %1866 = vperm.xlu0 %2915, %v3773_v36   ;;  %v6234_v25 = vmov 1  }
 0x149   :  { %1744 = vperm.xlu1 %2910, %v3773_v36  }
 0x14c   :  { %1546 = vrot.lane.b32.xlu0 %v3830_v29, %s3069_s30 }
 0x14d   :  { %1528 = vrot.lane.b32.xlu1 %v3815_v55, %s3057_s27  ;;  %2918 = vset.pattern.permute.xlu0 %v6180_v47 }
 0x14e   :  { %2913 = vset.pattern.permute.xlu1 %v6181_v62 }
 0x150   :  { %1696 = vperm.xlu0 %2918, %v3773_v36  }
 0x151   :  { %1530 = vrot.lane.b32.xlu1 %v3830_v29, %s3057_s27 }
 0x154   :  { %2921 = vset.pattern.permute.xlu0 %v6182_v58  ;;  %v6215_v58 = vmov 0 }
 0x155   :  { %1538 = vrot.lane.b32.xlu1 %v3830_v29, %s3056_s26  ;;  %1933 = vperm.xlu0 %2921, %v3773_v36  }
 0x159   :  { %1688 = vperm.xlu1 %2913, %v3773_v36   ;;  %2924 = vset.pattern.permute.xlu0 %v6183_v42  ;;  %v6280_v42 = vld [vmem:[#allocation11_spill] sm:$0xff] }
 0x15a   :  { %1633 = vperm.xlu0 %2924, %v3773_v36  }
 0x15d   :  { %2914 = vset.pattern.permute.xlu1 %v6184_v35 }
 0x15e   :  { %1860 = vperm.xlu1 %2914, %v3773_v36   ;;  %2927 = vset.pattern.permute.xlu0 %v6185_v37  ;;  %v6206_v37 = vmov 0 }
 0x15f   :  { %1947 = vperm.xlu0 %2927, %v3773_v36   ;;  %v6207_v37 = vsel %vm3912_vm3, 4294967295, %v6206_v37 }
 0x160   :  { %6208 = vst [vmem:[#allocation2_spill] sm:$0xff] %v6207_v37 }
 0x162   :  { %2916 = vset.pattern.permute.xlu1 %v6186_v44  ;;  %v6227_v44 = vmov 43  }
 0x163   :  { %1882 = vperm.xlu1 %2916, %v3773_v36   ;;  %2930 = vset.pattern.permute.xlu0 %v6187_v40  ;;  %v6205_v40 = vmov 42  }
 0x164   :  { %2028 = vperm.xlu0 %2930, %v3773_v36  }
 0x167   :  { %1544 = vrot.lane.b32.xlu1 %v3815_v55, %s3069_s30 }
 0x168   :  { %2931 = vset.pattern.permute.xlu0 %v6188_v6  ;;  %2917 = vset.pattern.permute.xlu1 %v6189_v23  ;;  %v461_v6 = vrot.slane %v457_v28, %v6202_v9 }
 0x169   :  { %1777 = vperm.xlu0 %2931, %v3773_v36  }
 0x16a   :  { %vm3940_vm9 = vcmp.eq.s32.totalorder %v461_v6, 1 }
 0x16b   :  { %1625 = vperm.xlu1 %2917, %v3773_v36   ;;  %v6222_v57 = vsel %vm3940_vm9, 4294967295, %v6221_v57 }
 0x16c   :  { %6223 = vst [vmem:[#allocation18_spill] sm:$0xff] %v6222_v57 }
 0x16d   :  { %1560 = vrot.lane.b32.xlu0 %v3815_v55, %s3082_s8 }
 0x16e   :  { %2934 = vset.pattern.permute.xlu0 %v6190_v1 }
 0x16f   :  { %2919 = vset.pattern.permute.xlu1 %v6191_v32 }
 0x170   :  { %1761 = vperm.xlu1 %2919, %v3773_v36  }
 0x171   :  { %1907 = vperm.xlu0 %2934, %v3773_v36  }
 0x174   :  { %2920 = vset.pattern.permute.xlu1 %v6192_v10 }
 0x175   :  { %1874 = vperm.xlu1 %2920, %v3773_v36   ;;  %1570 = vrot.lane.b32.xlu0 %v3830_v29, %s3085_s9 }
 0x176   :  { %2937 = vset.pattern.permute.xlu0 %v6193_v11  ;;  %v465_v11 = vrot.slane %v457_v28, %v6203_v19 }
 0x178   :  { %vm3944_vm15 = vcmp.eq.s32.totalorder %v465_v11, 1 }
 0x179   :  { %2922 = vset.pattern.permute.xlu1 %v6194_v21  ;;  %1980 = vperm.xlu0 %2937, %v3773_v36   ;;  %v6209_v21 = vmov 0 }
 0x17a   :  { %1939 = vperm.xlu1 %2922, %v3773_v36   ;;  %v6210_v21 = vsel %vm3916_vm5, 4294967295, %v6209_v21 }
 0x17b   :  { %6211 = vst [vmem:[#allocation13_spill] sm:$0xff] %v6210_v21 }
 0x17d   :  { %2940 = vset.pattern.permute.xlu0 %v6195_v15  ;;  %v380_v15 = vrot.slane %v372_v53, %v6203_v19  ;;  %v89_v53 = vld [vmem:[%s5828_s5 + $0x18] sm:$0xff] }
 0x17e   :  { %2923 = vset.pattern.permute.xlu1 %v6196_v41  ;;  %2053 = vperm.xlu0 %2940, %v3773_v36  }
 0x17f   :  { %1955 = vperm.xlu1 %2923, %v3773_v36   ;;  %vm3925_vm13 = vcmp.eq.s32.totalorder %v380_v15, 1  ;;  %v6224_v15 = vmov 0 }
 0x180   :  { %v6216_v58 = vsel %vm3925_vm13, 4294967295, %v6215_v58  ;;  %v6225_v15 = vsel %vm3944_vm15, 4294967295, %v6224_v15 }
 0x181   :  { %v3884_v30 = vpop.permute.xlu1 %284  ;;  %v283_v39 = vpop.permute.xlu0 %282  ;;  %6217 = vst [vmem:[#allocation10_spill] sm:$0xff] %v6216_v58  ;;  %6226 = vst [vmem:[#allocation3_spill] sm:$0xff] %v6225_v15 }
 0x182   :  { %2943 = vset.pattern.permute.xlu0 %v6197_v0  ;;  %v288_v6 = vsel %vm6231_vm4, %v3884_v30, %v283_v39  ;;  %vm6025_vm4 = vcmp.lt.s32.totalorder %v3363_v24, 96 }
 0x183   :  { %2925 = vset.pattern.permute.xlu1 %v6198_v34  ;;  %1801 = vperm.xlu0 %2943, %v3773_v36  }
 0x184   :  { %1704 = vperm.xlu1 %2925, %v3773_v36  }
 0x185   :  { %v368_v20 = vpop.permute.xlu1 %367  ;;  %v366_v54 = vpop.permute.xlu0 %365 }
 0x186   :  { %v370_v3 = vsel %vm5983_vm11, %v366_v54, %v368_v20  ;;  %v371_v14 = vsel %vm5983_vm11, %v368_v20, %v366_v54  ;;  %vm6229_vm11 = vcmp.ge.s32.totalorder %v45_v33, 0  ;;  %v287_v20 = vsel %vm6230_vm2, %v283_v39, %v3884_v30 }
 0x187   :  { %2946 = vset.pattern.permute.xlu0 %v6199_v12  ;;  %vm48_vm8 = vmand %vm6229_vm11, %vm6228_vm10  ;;  %v383_v54 = vsel %vm3921_vm12, %v371_v14, 0.0  ;;  %v384_v33 = vsel %vm3925_vm13, %v370_v3, 0.0  ;;  %v300_v39 = vsel %vm3912_vm3, %v288_v6, 0.0 }
 0x188   :  { %2926 = vset.pattern.permute.xlu1 %v6200_v18  ;;  %1834 = vperm.xlu0 %2946, %v3773_v36   ;;  %v692_v30 = vsel %vm48_vm8, 1, %v6201_v48  ;;  %v385_v3 = vadd.f32 %v383_v54, %v300_v39  ;;  %v6239_v39 = vmov 0 }
 0x189   :  { %v453_v13 = vpop.permute.xlu1 %452  ;;  %1769 = vperm.xlu1 %2926, %v3773_v36   ;;  %v451_v28 = vpop.permute.xlu0 %450 }
 0x18a   :  { %v455_v11 = vsel %vm6232_vm1, %v451_v28, %v453_v13  ;;  %v456_v59 = vsel %vm6233_vm0, %v453_v13, %v451_v28  ;;  %v301_v13 = vsel %vm3916_vm5, %v287_v20, 0.0  ;;  %vm52_vm0 = vmand %vm50_vm6, %vm51_vm7  ;;  %vm6026_vm1 = vcmp.lt.s32.totalorder %v3363_v24, 112 }
 0x18b   :  { %v468_v28 = vsel %vm3940_vm9, %v456_v59, 0.0  ;;  %v469_v14 = vsel %vm3944_vm15, %v455_v11, 0.0  ;;  %v386_v58 = vadd.f32 %v384_v33, %v301_v13  ;;  %v696_v59 = vrot.slane %v692_v30, %v6202_v9 }
 0x18c   :  { %2948 = vset.pattern.permute.xlu0 %v6204_v22  ;;  %v700_v11 = vrot.slane %v692_v30, %v6203_v19  ;;  %v470_v15 = vadd.f32 %v468_v28, %v385_v3  ;;  %v777_v54 = vsel %vm52_vm0, 1, %v6201_v48  ;;  %vm6024_vm0 = vcmask 1043456  }
 0x18d   :  { %2928 = vset.pattern.permute.xlu1 %v6205_v40  ;;  %1842 = vperm.xlu0 %2948, %v3773_v36   ;;  %v603_v41 = vpop.permute.xlu1 %602  ;;  %v601_v20 = vpop.permute.xlu0 %600  ;;  %vm4005_vm10 = vcmp.eq.s32.totalorder %v696_v59, 1  ;;  %v781_v28 = vrot.slane %v777_v54, %v6202_v9 }
 0x18e   :  { %2006 = vperm.xlu1 %2928, %v3773_v36   ;;  %v605_v30 = vsel %vm6026_vm1, %v601_v20, %v603_v41  ;;  %v606_v13 = vsel %vm6026_vm1, %v603_v41, %v601_v20  ;;  %vm4009_vm11 = vcmp.eq.s32.totalorder %v700_v11, 1  ;;  %v535_v3 = vadd.f32 %v3804_v52, %v470_v15 }
 0x18f   :  { %vm4033_vm7 = vcmp.eq.s32.totalorder %v781_v28, 1  ;;  %v6252_v15 = vmov 0 }
 0x191   :  { %2951 = vset.pattern.permute.xlu0 %v6201_v48 }
 0x192   :  { %2929 = vset.pattern.permute.xlu1 %v6227_v44  ;;  %816 = vperm.xlu0 %2951, %v89_v53   ;;  %v607_v53 = vsel %vm3935_vm14, 1, %v6201_v48  ;;  %v686_v44 = vpop.permute.xlu1 %685  ;;  %vm6002_vm14 = vcmp.lt.s32.totalorder %v3363_v24, 80 }
 0x193   :  { %2012 = vperm.xlu1 %2929, %v3773_v36   ;;  %v611_v49 = vrot.slane %v607_v53, %v6202_v9  ;;  %v615_v6 = vrot.slane %v607_v53, %v6203_v19  ;;  %v6236_v53 = vmov 0 }
 0x195   :  { %vm3991_vm6 = vcmp.eq.s32.totalorder %v611_v49, 1  ;;  %vm3995_vm8 = vcmp.eq.s32.totalorder %v615_v6, 1  ;;  %v6245_v49 = vmov 0 }
 0x196   :  { %2952 = vset.pattern.permute.xlu0 %v6234_v25  ;;  %v471_v25 = vadd.f32 %v469_v14, %v386_v58  ;;  %v688_v33 = vpop.permute.xlu1 %687  ;;  %v6237_v53 = vsel %vm3991_vm6, 4294967295, %v6236_v53  ;;  %v6240_v39 = vsel %vm3995_vm8, 4294967295, %v6239_v39  ;;  %v6242_v58 = vmov 0 }
 0x197   :  { %1552 = vrot.lane.b32.xlu1 %v3815_v55, %s3096_s10  ;;  %6238 = vst [vmem:[#allocation19_spill] sm:$0xff] %v6237_v53  ;;  %6241 = vst [vmem:[#allocation20_spill] sm:$0xff] %v6240_v39  ;;  %v6243_v58 = vsel %vm4005_vm10, 4294967295, %v6242_v58  ;;  %v6246_v49 = vsel %vm4009_vm11, 4294967295, %v6245_v49  ;;  %v785_v14 = vrot.slane %v777_v54, %v6203_v19  ;;  %v690_v41 = vsel %vm6025_vm4, %v686_v44, %v688_v33 }
 0x198   :  { %2932 = vset.pattern.permute.xlu1 %v6235_v27  ;;  %6244 = vst [vmem:[#allocation17_spill] sm:$0xff] %v6243_v58  ;;  %6247 = vst [vmem:[#allocation21_spill] sm:$0xff] %v6246_v49  ;;  %v536_v6 = vadd.f32 %v3806_v60, %v471_v25  ;;  %v691_v20 = vsel %vm6025_vm4, %v688_v33, %v686_v44  ;;  %v618_v59 = vsel %vm3991_vm6, %v605_v30, 0.0  ;;  %v619_v11 = vsel %vm3995_vm8, %v606_v13, 0.0  ;;  %v87_v58 = vld [vmem:[%s5828_s5 + $0x8] sm:$0xff] }
 0x199   :  { %v703_v52 = vsel %vm4005_vm10, %v690_v41, 0.0  ;;  %v704_v60 = vsel %vm4009_vm11, %v691_v20, 0.0  ;;  %v620_v9 = vadd.f32 %v618_v59, %v535_v3  ;;  %v6249_v19 = vmov 0 }
 0x19a   :  { %v621_v44 = vadd.f32 %v619_v11, %v536_v6  ;;  %v6250_v19 = vsel %vm4033_vm7, 4294967295, %v6249_v19  ;;  %vm4037_vm2 = vcmp.eq.s32.totalorder %v785_v14, 1  ;;  %v773_v25 = vpop.permute.xlu1 %772  ;;  %v6255_v41 = vmov 44  }
 0x19b   :  { %1554 = vrot.lane.b32.xlu1 %v3830_v29, %s3096_s10  ;;  %6251 = vst [vmem:[#allocation5_spill] sm:$0xff] %v6250_v19  ;;  %v6253_v15 = vsel %vm4037_vm2, 4294967295, %v6252_v15  ;;  %v705_v33 = vadd.f32 %v703_v52, %v620_v9  ;;  %v82_v52 = vld [vmem:[%s5829_s4] sm:$0xff]  ;;  %vm6272_vm4 = vcmp.lt.s32.totalorder %v3363_v24, 2 }
 0x19c   :  { %6254 = vst [vmem:[#allocation6_spill] sm:$0xff] %v6253_v15  ;;  %v706_v3 = vadd.f32 %v704_v60, %v621_v44  ;;  %v6256_v60 = vmov 39   ;;  %v6257_v44 = vmov 0.0   ;;  %v86_v15 = vld [vmem:[%s5828_s5] sm:$0xff] }
 0x19e   :  { %v4025_v57 = vpop.permute.xlu0 %794 }
 0x19f   :  { %6248 = vst [vmem:[#allocation7_spill] sm:$0xff] %v4025_v57  ;;  %1899 = vperm.xlu1 %2932, %v3773_v36  }
 0x1a2   :  { %v771_v54 = vpop.permute.xlu0 %770 }
 0x1a3   :  { %v775_v30 = vsel %vm6002_vm14, %v771_v54, %v773_v25  ;;  %v776_v13 = vsel %vm6002_vm14, %v773_v25, %v771_v54  ;;  %2933 = vset.pattern.permute.xlu1 %v6255_v41  ;;  %vm6023_vm14 = vcmask 31744   ;;  %v84_v54 = vld [vmem:[%s5829_s4 + $0x10] sm:$0xff] }
 0x1a4   :  { %v788_v28 = vsel %vm4033_vm7, %v775_v30, 0.0  ;;  %2020 = vperm.xlu1 %2933, %v3773_v36   ;;  %v789_v14 = vsel %vm4037_vm2, %v776_v13, 0.0  ;;  %v85_v13 = vld [vmem:[%s5829_s4 + $0x18] sm:$0xff] }
 0x1a5   :  { %v790_v6 = vadd.f32 %v788_v28, %v705_v33  ;;  %v791_v20 = vadd.f32 %v789_v14, %v706_v3  ;;  %v6258_v33 = vmov 34   ;;  %v6259_v3 = vmov 46  }
 0x1a6   :  { %v6260_v14 = vmov 41  }
 0x1a7   :  { %v798_v59 = vadd.f32 %v4025_v57, %v791_v20  ;;  %v797_v11 = vadd.f32 %v4025_v57, %v790_v6  ;;  %v6261_v20 = vmov 48  }
 0x1a8   :  { %1562 = vrot.lane.b32.xlu1 %v3830_v29, %s3082_s8  ;;  %v83_v29 = vld [vmem:[%s5829_s4 + $0x8] sm:$0xff] }
 0x1a9   :  { %2762 = vmatprep.subr.msk.mxu0 %vm6024_vm0, %v798_v59  ;;  %2935 = vset.pattern.permute.xlu1 %v6256_v60 }
 0x1aa   :  { %v4060_v9 = vpop.permute.xlu1 %1584  ;;  %2763 = vmatpush1.msk.msra.mxu0 %vm6024_vm0, %v797_v11  ;;  %v6262_v11 = vmov 21  }
 0x1ab   :  { %2764 = vmatmul.mubr.msk.f32.vlgmr.msra.gmra.mrb[0].mxu0 %vm6023_vm14, %v82_v52 }
 0x1ac   :  { %1972 = vperm.xlu1 %2935, %v3773_v36   ;;  %909 = vmatprep.mubr.f32.mxu0 %v6257_v44 }
 0x1af   :  { %v4069_v25 = vpop.permute.xlu1 %1649  ;;  %2765 = vmatmul.mubr.msk.f32.gmra.mrb[2].mxu0 %vm6023_vm14, %v83_v29  ;;  %v1579_v29 = vpop.permute.xlu0 %1578 }
 0x1b0   :  { %1568 = vrot.lane.b32.xlu1 %v3815_v55, %s3085_s9  ;;  %915 = vmatprep.mubr.f32.mxu0 %v6257_v44 }
 0x1b1   :  { %2936 = vset.pattern.permute.xlu1 %v6258_v33  ;;  %v6265_v33 = vmov 27  }
 0x1b3   :  { %2766 = vmatmul.mubr.msk.f32.gmra.mrb[4].mxu0 %vm6023_vm14, %v84_v54  ;;  %v6263_v54 = vmov 24   ;;  %v1601_v41 = vpop.permute.xlu0 %1600 }
 0x1b4   :  { %1915 = vperm.xlu1 %2936, %v3773_v36   ;;  %v4081_v30 = vpop.permute.xlu1 %1655  ;;  %921 = vmatprep.mubr.f32.mxu0 %v6257_v44  ;;  %v1608_v51 = vrot.slane %v1601_v41, %v6167_v56 }
 0x1b6   :  { %v4162_v10 = vmul.f32 %v3815_v55, %v1608_v51 }
 0x1b7   :  { %2767 = vmatmul.mubr.msk.f32.gmra.mrb[6].mxu0 %vm6023_vm14, %v85_v13  ;;  %v1672_v19 = vpop.permute.xlu0 %1671  ;;  %vm6270_vm14 = vcmp.lt.s32.totalorder %v3363_v24, 3 }
 0x1b8   :  { %2938 = vset.pattern.permute.xlu1 %v6259_v3  ;;  %2251 = vmatprep.mubr.f32.mxu0 %v6257_v44  ;;  %v1679_v40 = vrot.slane %v1672_v19, %v6167_v56  ;;  %vm6271_vm0 = vmmov %vm6270_vm14 }
 0x1b9   :  { %2045 = vperm.xlu1 %2938, %v3773_v36   ;;  %v4091_v28 = vpop.permute.xlu1 %1592 }
 0x1ba   :  { %v4165_v2 = vmul.f32 %v3815_v55, %v1679_v40 }
 0x1bb   :  { %v1723_v39 = vpop.permute.xlu0 %1722 }
 0x1bd   :  { %2939 = vset.pattern.permute.xlu1 %v6260_v14  ;;  %v6264_v14 = vmov 23  }
 0x1be   :  { %1988 = vperm.xlu1 %2939, %v3773_v36   ;;  %v4095_v6 = vpop.permute.xlu1 %1663 }
 0x1bf   :  { %v4125_v21 = vpop.permute.xlu0 %1736 }
 0x1c2   :  { %2941 = vset.pattern.permute.xlu1 %v6261_v20 }
 0x1c3   :  { %2061 = vperm.xlu1 %2941, %v3773_v36   ;;  %v4099_v59 = vpop.permute.xlu1 %1728 }
 0x1c7   :  { %2942 = vset.pattern.permute.xlu1 %v6262_v11 }
 0x1c8   :  { %1795 = vperm.xlu1 %2942, %v3773_v36   ;;  %v1745_v52 = vpop.permute.xlu1 %1744 }
 0x1c9   :  { %v1752_v60 = vrot.slane %v1745_v52, %v6167_v56 }
 0x1cb   :  { %v4168_v19 = vmul.f32 %v3815_v55, %v1752_v60 }
 0x1cc   :  { %2944 = vset.pattern.permute.xlu1 %v6263_v54  ;;  %v1529_v13 = vpop.permute.xlu1 %1528  ;;  %v6276_v54 = vld [vmem:[#allocation9_spill] sm:$0xff] }
 0x1cd   :  { %1817 = vperm.xlu1 %2944, %v3773_v36  }
 0x1d0   :  { %v1531_v3 = vpop.permute.xlu1 %1530 }
 0x1d1   :  { %2945 = vset.pattern.permute.xlu1 %v6264_v14  ;;  %v1532_v1 = vsel %vm6270_vm14, %v1529_v13, %v1531_v3  ;;  %v1533_v62 = vsel %vm6271_vm0, %v1531_v3, %v1529_v13  ;;  %vm6277_vm14 = vnez %v6276_v54  ;;  %vm6279_vm0 = vmmov %vm6272_vm4 }
 0x1d2   :  { %1809 = vperm.xlu1 %2945, %v3773_v36   ;;  %v4180_v3 = vsel %vm6277_vm14, %v1532_v1, 0.0  ;;  %vm6294_vm14 = vnez %v6139_v7 }
 0x1d3   :  { %6278 = vst [vmem:[#allocation29_spill] sm:$0xff] %v4180_v3  ;;  %v1582_v54 = vmul.f32 %v1579_v29, %v4180_v3 }
 0x1d4   :  { %v1539_v57 = vpop.permute.xlu1 %1538 }
 0x1d6   :  { %2947 = vset.pattern.permute.xlu1 %v6201_v48 }
 0x1d7   :  { %801 = vperm.xlu1 %2947, %v86_v15   ;;  %v88_v15 = vld [vmem:[%s5828_s5 + $0x10] sm:$0xff] }
 0x1d8   :  { %v4111_v49 = vpop.permute.xlu1 %1688 }
 0x1db   :  { %806 = vperm.xlu1 %2947, %v87_v58   ;;  %v1537_v58 = vpop.permute.xlu0 %1536 }
 0x1dc   :  { %v1541_v41 = vsel %vm6272_vm4, %v1539_v57, %v1537_v58  ;;  %v1540_v51 = vsel %vm6279_vm0, %v1537_v58, %v1539_v57  ;;  %vm6281_vm4 = vnez %v6280_v42  ;;  %v1726_v42 = vmul.f32 %v1723_v39, %v4180_v3 }
 0x1dd   :  { %v4116_v53 = vpop.permute.xlu1 %1860  ;;  %v4190_v11 = vsel %vm6281_vm4, %v1541_v41, 0.0  ;;  %v1653_v41 = vmul.f32 %v4069_v25, %v4180_v3  ;;  %vm6284_vm4 = vcmp.lt.s32.totalorder %v3363_v24, 1 }
 0x1de   :  { %v1731_v46 = vmul.f32 %v4099_v59, %v4190_v11 }
 0x1df   :  { %2949 = vset.pattern.permute.xlu1 %v6265_v33  ;;  %v4130_v5 = vpop.permute.xlu0 %1617  ;;  %v6273_v33 = vld [vmem:[#allocation8_spill] sm:$0xff] }
 0x1e0   :  { %1850 = vperm.xlu1 %2949, %v3773_v36   ;;  %vm6274_vm1 = vnez %v6273_v33  ;;  %v6282_v33 = vld [vmem:[#allocation12_spill] sm:$0xff] }
 0x1e1   :  { %v4176_v16 = vsel %vm6274_vm1, %v1533_v62, 0.0  ;;  %vm6283_vm0 = vnez %v6282_v33  ;;  %vm6304_vm1 = vnez %v6154_v50 }
 0x1e2   :  { %v4120_v27 = vpop.permute.xlu1 %1882  ;;  %6275 = vst [vmem:[#allocation28_spill] sm:$0xff] %v4176_v16  ;;  %v1581_v1 = vmul.f32 %v1579_v29, %v4176_v16  ;;  %v4198_v57 = vsel %vm6283_vm0, %v1540_v51, 0.0  ;;  %v1652_v13 = vmul.f32 %v4069_v25, %v4176_v16  ;;  %v1725_v60 = vmul.f32 %v1723_v39, %v4176_v16  ;;  %vm6285_vm0 = vmmov %vm6284_vm4 }
 0x1e3   :  { %v1867_v22 = vpop.permute.xlu0 %1866  ;;  %v1587_v29 = vmul.f32 %v4060_v9, %v4190_v11  ;;  %v1658_v51 = vmul.f32 %v4081_v30, %v4190_v11  ;;  %v1588_v23 = vmul.f32 %v4060_v9, %v4198_v57  ;;  %v1659_v25 = vmul.f32 %v4081_v30, %v4198_v57 }
 0x1e4   :  { %2950 = vset.pattern.permute.xlu1 %v6201_v48  ;;  %v1890_v39 = vrot.slane %v4120_v27, %v6167_v56  ;;  %v1732_v45 = vmul.f32 %v4099_v59, %v4198_v57  ;;  %v1863_v61 = vmul.f32 %v4116_v53, %v4176_v16  ;;  %v1864_v27 = vmul.f32 %v4116_v53, %v4180_v3 }
 0x1e5   :  { %811 = vperm.xlu1 %2950, %v88_v15   ;;  %v1869_v63 = vmul.f32 %v1867_v22, %v4190_v11  ;;  %v1870_v59 = vmul.f32 %v1867_v22, %v4198_v57 }
 0x1e6   :  { %v1545_v37 = vpop.permute.xlu1 %1544 }
 0x1e7   :  { %v1547_v44 = vpop.permute.xlu0 %1546  ;;  %v1871_v22 = vadd.f32 %v1869_v63, %v1863_v61 }
 0x1e8   :  { %v1549_v62 = vsel %vm6284_vm4, %v1547_v44, %v1545_v37  ;;  %v1548_v33 = vsel %vm6285_vm0, %v1545_v37, %v1547_v44  ;;  %v6287_v44 = vld [vmem:[#allocation14_spill] sm:$0xff] }
 0x1e9   :  { %vm6288_vm4 = vnez %v6287_v44  ;;  %v1589_v44 = vadd.f32 %v1587_v29, %v1581_v1 }
 0x1ea   :  { %v4128_v17 = vpop.permute.xlu1 %1625  ;;  %v4232_v9 = vsel %vm6288_vm4, %v1549_v62, 0.0  ;;  %v1660_v62 = vadd.f32 %v1658_v51, %v1652_v13  ;;  %vm6292_vm4 = vcmp.lt.s32.totalorder %v3363_v24, 127 }
 0x1eb   :  { %v4140_v0 = vpop.permute.xlu0 %1696  ;;  %v1595_v53 = vmul.f32 %v4091_v28, %v4232_v9  ;;  %v1739_v13 = vmul.f32 %v4125_v21, %v4232_v9 }
 0x1ef   :  { %v4132_v35 = vpop.permute.xlu1 %1761  ;;  %v1934_v15 = vpop.permute.xlu0 %1933 }
 0x1f0   :  { %v1936_v34 = vmul.f32 %v1934_v15, %v4176_v16  ;;  %v1937_v37 = vmul.f32 %v1934_v15, %v4180_v3  ;;  %v1666_v16 = vmul.f32 %v4095_v6, %v4232_v9  ;;  %v1734_v3 = vadd.f32 %v1732_v45, %v1726_v42 }
 0x1f3   :  { %v4146_v32 = vpop.permute.xlu0 %1633 }
 0x1f4   :  { %v4134_v36 = vpop.permute.xlu1 %1874  ;;  %6268 = vst [vmem:[#allocation26_spill] sm:$0xff] %v4146_v32  ;;  %v1590_v32 = vadd.f32 %v1588_v23, %v1582_v54 }
 0x1f7   :  { %v4152_v38 = vpop.permute.xlu0 %1947 }
 0x1f9   :  { %v4136_v12 = vpop.permute.xlu1 %1939 }
 0x1fa   :  { %v1942_v63 = vmul.f32 %v4136_v12, %v4190_v11  ;;  %v1943_v42 = vmul.f32 %v4136_v12, %v4198_v57 }
 0x1fb   :  { %v2029_v40 = vpop.permute.xlu0 %2028 }
 0x1fc   :  { %v2036_v15 = vrot.slane %v2029_v40, %v6167_v56 }
 0x1fe   :  { %v4138_v14 = vpop.permute.xlu1 %1955  ;;  %v4263_v54 = vmul.f32 %v3815_v55, %v2036_v15 }
 0x1ff   :  { %v4223_v8 = vpop.permute.xlu0 %1777 }
 0x200   :  { %6286 = vst [vmem:[#allocation30_spill] sm:$0xff] %v4223_v8 }
 0x203   :  { %v4142_v18 = vpop.permute.xlu1 %1704  ;;  %v1561_v1 = vpop.permute.xlu0 %1560 }
 0x204   :  { %6266 = vst [vmem:[#allocation24_spill] sm:$0xff] %v4142_v18  ;;  %v1661_v18 = vadd.f32 %v1659_v25, %v1653_v41 }
 0x207   :  { %v4285_v15 = vpop.permute.xlu0 %1907 }
 0x208   :  { %v4144_v48 = vpop.permute.xlu1 %1769 }
 0x209   :  { %6267 = vst [vmem:[#allocation25_spill] sm:$0xff] %v4144_v48  ;;  %v1872_v48 = vadd.f32 %v1870_v59, %v1864_v27 }
 0x20d   :  { %v4148_v20 = vpop.permute.xlu1 %2006 }
 0x20e   :  { %6269 = vst [vmem:[#allocation27_spill] sm:$0xff] %v4148_v20  ;;  %v6290_v20 = vld [vmem:[#allocation16_spill] sm:$0xff] }
 0x20f   :  { %vm6291_vm0 = vnez %v6290_v20  ;;  %v1733_v20 = vadd.f32 %v1731_v46, %v1725_v60  ;;  %v1877_v46 = vmul.f32 %v4134_v36, %v4232_v9  ;;  %v1597_v60 = vadd.f32 %v1595_v53, %v1589_v44 }
 0x210   :  { %v4243_v8 = vsel %vm6291_vm0, %v1548_v33, 0.0  ;;  %vm6293_vm0 = vcmp.lt.s32.totalorder %v3363_v24, 126  ;;  %v1945_v44 = vadd.f32 %v1943_v42, %v1937_v37 }
 0x211   :  { %v1596_v33 = vmul.f32 %v4091_v28, %v4243_v8  ;;  %v1667_v40 = vmul.f32 %v4095_v6, %v4243_v8  ;;  %v1740_v23 = vmul.f32 %v4125_v21, %v4243_v8  ;;  %v1878_v61 = vmul.f32 %v4134_v36, %v4243_v8 }
 0x212   :  { %v4155_v47 = vpop.permute.xlu1 %2012  ;;  %v1668_v28 = vadd.f32 %v1666_v16, %v1660_v62  ;;  %v1963_v21 = vrot.slane %v4138_v14, %v6167_v56  ;;  %v1950_v36 = vmul.f32 %v4152_v38, %v4232_v9  ;;  %v1951_v51 = vmul.f32 %v4152_v38, %v4243_v8 }
 0x213   :  { %v1598_v41 = vadd.f32 %v1596_v33, %v1590_v32  ;;  %v1669_v12 = vadd.f32 %v1667_v40, %v1661_v18  ;;  %v1879_v16 = vadd.f32 %v1877_v46, %v1871_v22  ;;  %v1880_v27 = vadd.f32 %v1878_v61, %v1872_v48 }
 0x214   :  { %v1742_v59 = vadd.f32 %v1740_v23, %v1734_v3  ;;  %v1944_v62 = vadd.f32 %v1942_v63, %v1936_v34  ;;  %v4296_v18 = vmul.f32 %v3815_v55, %v1963_v21  ;;  %v1685_v48 = vadd.f32 %v4165_v2, %v1668_v28 }
 0x215   :  { %v6295_v34 = vcombine.high %v4162_v10, %v4162_v10  ;;  %v6297_v33 = vcombine.high %v4165_v2, %v4165_v2  ;;  %v4328_v61 = vadd.f32 %v1951_v51, %v1945_v44  ;;  %v6306_v44 = vld [vmem:[#allocation24_spill] sm:$0xff] }
 0x216   :  { %v4172_v52 = vpop.permute.xlu1 %1552  ;;  %v1952_v46 = vadd.f32 %v1950_v36, %v1944_v62 }
 0x217   :  { %v1615_v3 = vadd.f32 %v6295_v34, %v1598_v41  ;;  %v1686_v22 = vadd.f32 %v6297_v33, %v1669_v12 }
 0x21a   :  { %v4200_v58 = vpop.permute.xlu1 %1554 }
 0x21b   :  { %v1556_v6 = vsel %vm6292_vm4, %v4172_v52, %v4200_v58  ;;  %v1557_v32 = vsel %vm6292_vm4, %v4200_v58, %v4172_v52  ;;  %vm6296_vm4 = vnez %v6145_v43 }
 0x21c   :  { %v4293_v38 = vsel %vm6294_vm14, %v1556_v6, 0.0  ;;  %vm6298_vm14 = vnez %v6141_v26  ;;  %v1571_v6 = vpop.permute.xlu0 %1570 }
 0x21d   :  { %v4317_v40 = vsel %vm6298_vm14, %v1557_v32, 0.0  ;;  %v1764_v41 = vmul.f32 %v4132_v35, %v4293_v38  ;;  %vm6303_vm14 = vnez %v6151_v4 }
 0x21e   :  { %v4234_v30 = vpop.permute.xlu1 %1899  ;;  %v1621_v36 = vmul.f32 %v4130_v5, %v4317_v40 }
 0x21f   :  { %6289 = vst [vmem:[#allocation31_spill] sm:$0xff] %v4234_v30  ;;  %v1892_v30 = vmul.f32 %v3815_v55, %v1890_v39  ;;  %v1741_v39 = vadd.f32 %v1739_v13, %v1733_v20  ;;  %v1614_v20 = vadd.f32 %v4162_v10, %v1597_v60  ;;  %v1691_v10 = vmul.f32 %v4111_v49, %v4293_v38 }
 0x220   :  { %v1620_v13 = vmul.f32 %v4130_v5, %v4293_v38  ;;  %v1969_v60 = vadd.f32 %v4296_v18, %v1952_v46  ;;  %v1692_v46 = vmul.f32 %v4111_v49, %v4317_v40 }
 0x221   :  { %v1894_v45 = vcombine.high %v1892_v30, %v1892_v30  ;;  %v1758_v53 = vadd.f32 %v4168_v19, %v1741_v39  ;;  %v1896_v2 = vadd.f32 %v1892_v30, %v1879_v16  ;;  %v2015_v30 = vmul.f32 %v4155_v47, %v4190_v11 }
 0x222   :  { %v1693_v39 = vadd.f32 %v1691_v10, %v1685_v48  ;;  %v1622_v12 = vadd.f32 %v1620_v13, %v1614_v20  ;;  %v6307_v20 = vld [vmem:[#allocation26_spill] sm:$0xff] }
 0x223   :  { %v4258_v29 = vpop.permute.xlu1 %2020  ;;  %v4330_v63 = vadd.f32 %v1894_v45, %v1880_v27  ;;  %v1766_v13 = vadd.f32 %v1764_v41, %v1758_v53 }
 0x227   :  { %v1563_v25 = vpop.permute.xlu1 %1562 }
 0x228   :  { %v1564_v14 = vsel %vm6293_vm0, %v1561_v1, %v1563_v25  ;;  %v1565_v37 = vsel %vm6293_vm0, %v1563_v25, %v1561_v1  ;;  %v6299_v1 = vcombine.high %v4168_v19, %v4168_v19  ;;  %vm6300_vm0 = vnez %v6147_v31 }
 0x229   :  { %v4307_v52 = vsel %vm6296_vm4, %v1564_v14, 0.0  ;;  %v4336_v28 = vsel %vm6300_vm0, %v1565_v37, 0.0  ;;  %vm6301_vm4 = vcmp.lt.s32.totalorder %v3363_v24, 125  ;;  %v6305_v14 = vld [vmem:[#allocation25_spill] sm:$0xff]  ;;  %v6308_v37 = vld [vmem:[#allocation31_spill] sm:$0xff] }
 0x22a   :  { %v4326_v23 = vadd.f32 %v6299_v1, %v1742_v59  ;;  %v1699_v21 = vmul.f32 %v4140_v0, %v4307_v52  ;;  %v1628_v19 = vmul.f32 %v4128_v17, %v4307_v52  ;;  %vm6302_vm0 = vmmov %vm6301_vm4  ;;  %v1772_v59 = vmul.f32 %v6305_v14, %v4307_v52 }
 0x22b   :  { %v4309_v58 = vpop.permute.xlu1 %1972  ;;  %v1629_v5 = vmul.f32 %v4128_v17, %v4336_v28  ;;  %v1902_v33 = vmul.f32 %v6308_v37, %v4293_v38  ;;  %v1623_v1 = vadd.f32 %v1621_v36, %v1615_v3  ;;  %v6309_v17 = vld [vmem:[#allocation30_spill] sm:$0xff]  ;;  %v1910_v49 = vmul.f32 %v4285_v15, %v4307_v52 }
 0x22c   :  { %v1701_v62 = vadd.f32 %v1699_v21, %v1693_v39  ;;  %v1630_v48 = vadd.f32 %v1628_v19, %v1622_v12  ;;  %v2023_v12 = vmul.f32 %v4258_v29, %v4232_v9  ;;  %v1975_v3 = vmul.f32 %v4309_v58, %v4293_v38 }
 0x22d   :  { %v1774_v53 = vadd.f32 %v1772_v59, %v1766_v13  ;;  %v1631_v41 = vadd.f32 %v1629_v5, %v1623_v1  ;;  %v1700_v36 = vmul.f32 %v4140_v0, %v4336_v28  ;;  %v2016_v0 = vmul.f32 %v4155_v47, %v4198_v57 }
 0x22e   :  { %v1977_v5 = vadd.f32 %v1975_v3, %v1969_v60  ;;  %v2024_v13 = vmul.f32 %v4258_v29, %v4243_v8 }
 0x22f   :  { %v1569_v45 = vpop.permute.xlu1 %1568 }
 0x230   :  { %v1572_v51 = vsel %vm6301_vm4, %v1569_v45, %v1571_v6  ;;  %v1573_v25 = vsel %vm6302_vm0, %v1571_v6, %v1569_v45  ;;  %vm6041_vm4 = vcmask 130048   ;;  %vm6347_vm0 = vcmp.lt.s32.totalorder %v3363_v24, 48 }
 0x231   :  { %v4355_v16 = vsel %vm6303_vm14, %v1572_v51, 0.0  ;;  %v4359_v27 = vsel %vm6304_vm1, %v1573_v25, 0.0  ;;  %v6310_v51 = vld [vmem:[#allocation28_spill] sm:$0xff]  ;;  %v6311_v25 = vld [vmem:[#allocation27_spill] sm:$0xff]  ;;  %vm6350_vm14 = vcmp.lt.s32.totalorder %v3363_v24, 32 }
 0x232   :  { %v1707_v32 = vmul.f32 %v6306_v44, %v4355_v16  ;;  %v1636_v34 = vmul.f32 %v6307_v20, %v4355_v16  ;;  %v1780_v21 = vmul.f32 %v6309_v17, %v4355_v16  ;;  %v1637_v19 = vmul.f32 %v6307_v20, %v4359_v27  ;;  %vm6351_vm1 = vmmov %vm6350_vm14 }
 0x233   :  { %v1916_v10 = vpop.permute.xlu1 %1915  ;;  %v2009_v39 = vmul.f32 %v6311_v25, %v6310_v51  ;;  %v1765_v20 = vmul.f32 %v4132_v35, %v4317_v40 }
 0x234   :  { %v1709_v6 = vadd.f32 %v1707_v32, %v1701_v62  ;;  %v1638_v45 = vadd.f32 %v1636_v34, %v1630_v48  ;;  %v1904_v32 = vadd.f32 %v1902_v33, %v1896_v2  ;;  %v1694_v48 = vadd.f32 %v1692_v46, %v1686_v22  ;;  %v1981_v22 = vpop.permute.xlu0 %1980 }
 0x235   :  { %v2017_v62 = vadd.f32 %v2015_v30, %v2009_v39  ;;  %v1918_v34 = vmul.f32 %v1916_v10, %v4355_v16  ;;  %v1782_v4 = vadd.f32 %v1780_v21, %v1774_v53  ;;  %v1639_v50 = vadd.f32 %v1637_v19, %v1631_v41 }
 0x236   :  { %1711 = vrot.lane.b32.xlu0 %v1709_v6, %s3111_s14  ;;  %1640 = vrot.lane.b32.xlu1 %v1638_v45, %s3110_s13  ;;  %v1708_v6 = vmul.f32 %v6306_v44, %v4359_v27  ;;  %v6312_v45 = vld [vmem:[#allocation29_spill] sm:$0xff]  ;;  %v1912_v2 = vadd.f32 %v1910_v49, %v1904_v32  ;;  %v1702_v35 = vadd.f32 %v1700_v36, %v1694_v48 }
 0x237   :  { %v2010_v59 = vmul.f32 %v6311_v25, %v6312_v45  ;;  %v2025_v30 = vadd.f32 %v2023_v12, %v2017_v62  ;;  %v1773_v33 = vmul.f32 %v6305_v14, %v4336_v28  ;;  %v1903_v44 = vmul.f32 %v6308_v37, %v4317_v40 }
 0x238   :  { %v2046_v42 = vpop.permute.xlu1 %2045  ;;  %v1767_v1 = vadd.f32 %v1765_v20, %v4326_v23  ;;  %v1920_v46 = vadd.f32 %v1918_v34, %v1912_v2  ;;  %v1983_v60 = vmul.f32 %v1981_v22, %v4307_v52  ;;  %v1976_v14 = vmul.f32 %v4309_v58, %v4317_v40 }
 0x239   :  { %v2048_v47 = vmul.f32 %v2046_v42, %v4293_v38  ;;  %v2018_v21 = vadd.f32 %v2016_v0, %v2010_v59  ;;  %v1911_v37 = vmul.f32 %v4285_v15, %v4336_v28  ;;  %v2042_v29 = vadd.f32 %v4263_v54, %v2025_v30  ;;  %v2054_v15 = vpop.permute.xlu0 %2053 }
 0x23a   :  { %1784 = vrot.lane.b32.xlu0 %v1782_v4, %s3112_s15  ;;  %1642 = vrot.lane.b32.xlu1 %v1639_v50, %s3110_s13  ;;  %v1710_v4 = vadd.f32 %v1708_v6, %v1702_v35  ;;  %v1781_v50 = vmul.f32 %v6309_v17, %v4359_v27  ;;  %v1985_v25 = vadd.f32 %v1983_v60, %v1977_v5 }
 0x23b   :  { %v1775_v39 = vadd.f32 %v1773_v33, %v1767_v1  ;;  %v1905_v17 = vadd.f32 %v1903_v44, %v4330_v63  ;;  %v6313_v58 = vcombine.high %v4296_v18, %v4296_v18  ;;  %v2050_v3 = vadd.f32 %v2048_v47, %v2042_v29 }
 0x23c   :  { %v2026_v49 = vadd.f32 %v2024_v13, %v2018_v21  ;;  %v1919_v53 = vmul.f32 %v1916_v10, %v4359_v27  ;;  %v2040_v62 = vcombine.high %v4263_v54, %v4263_v54  ;;  %v2056_v32 = vmul.f32 %v2054_v15, %v4307_v52 }
 0x23d   :  { %v1989_v19 = vpop.permute.xlu1 %1988  ;;  %v1970_v12 = vadd.f32 %v6313_v58, %v4328_v61  ;;  %v1783_v36 = vadd.f32 %v1781_v50, %v1775_v39  ;;  %v1913_v20 = vadd.f32 %v1911_v37, %v1905_v17  ;;  %v2049_v63 = vmul.f32 %v2046_v42, %v4317_v40  ;;  %v1802_v13 = vpop.permute.xlu0 %1801 }
 0x23e   :  { %v1991_v23 = vmul.f32 %v1989_v19, %v4355_v16  ;;  %1922 = vrot.lane.b32.xlu0 %v1920_v46, %s3113_s16  ;;  %1713 = vrot.lane.b32.xlu1 %v1710_v4, %s3111_s14  ;;  %v2058_v18 = vadd.f32 %v2056_v32, %v2050_v3  ;;  %v2043_v6 = vadd.f32 %v2040_v62, %v2026_v49  ;;  %v6318_v32 = vmov 3  }
 0x23f   :  { %v1978_v48 = vadd.f32 %v1976_v14, %v1970_v12  ;;  %v1921_v10 = vadd.f32 %v1919_v53, %v1913_v20  ;;  %v1984_v59 = vmul.f32 %v1981_v22, %v4336_v28  ;;  %v1992_v54 = vmul.f32 %v1989_v19, %v4359_v27  ;;  %v4442_v22 = vld [vmem:[%s5825_s2 + $0x4] sm:$0xf] }
 0x240   :  { %v1993_v41 = vadd.f32 %v1991_v23, %v1985_v25  ;;  %v2051_v30 = vadd.f32 %v2049_v63, %v2043_v6  ;;  %v2057_v5 = vmul.f32 %v2054_v15, %v4336_v28  ;;  %v1804_v50 = vmul.f32 %v1802_v13, %v4190_v11 }
 0x241   :  { %v1986_v2 = vadd.f32 %v1984_v59, %v1978_v48  ;;  %v6314_v14 = vmov 4   ;;  %v1805_v37 = vmul.f32 %v1802_v13, %v4198_v57  ;;  %v1835_v29 = vpop.permute.xlu0 %1834  ;;  %v6316_v15 = vmov 2  }
 0x242   :  { %v2062_v34 = vpop.permute.xlu1 %2061  ;;  %1786 = vrot.lane.b32.xlu1 %v1783_v36, %s3112_s15  ;;  %1995 = vrot.lane.b32.xlu0 %v1993_v41, %s3114_s19  ;;  %v2059_v44 = vadd.f32 %v2057_v5, %v2051_v30  ;;  %v1837_v57 = vmul.f32 %v1835_v29, %v4293_v38  ;;  %v1838_v58 = vmul.f32 %v1835_v29, %v4317_v40  ;;  %v6317_v36 = vmov 10  }
 0x243   :  { %v2064_v61 = vmul.f32 %v2062_v34, %v4355_v16  ;;  %v1994_v42 = vadd.f32 %v1992_v54, %v1986_v2  ;;  %v2065_v35 = vmul.f32 %v2062_v34, %v4359_v27  ;;  %v6319_v48 = vmov 13  }
 0x244   :  { %v6320_v63 = vmov 5   ;;  %v6323_v6 = vmov 24   ;;  %v6326_v59 = vmov 9   ;;  %v6327_v54 = vmov 30  }
 0x245   :  { %v2066_v0 = vadd.f32 %v2064_v61, %v2058_v18  ;;  %v2067_v47 = vadd.f32 %v2065_v35, %v2059_v44  ;;  %v1843_v17 = vpop.permute.xlu0 %1842  ;;  %v6321_v61 = vmov 21   ;;  %v6329_v30 = vmov 33  }
 0x246   :  { %1924 = vrot.lane.b32.xlu1 %v1921_v10, %s3113_s16  ;;  %v1846_v49 = vmul.f32 %v1843_v17, %v4336_v28  ;;  %v6322_v10 = vmov 6   ;;  %v6330_v2 = vmov 12   ;;  %v6332_v5 = vmov 15  }
 0x247   :  { %2068 = vrot.lane.b32.xlu0 %v2066_v0, %s3115_s20  ;;  %v1796_v33 = vpop.permute.xlu1 %1795  ;;  %v6328_v0 = vmov 11  }
 0x248   :  { %v1798_v46 = vmul.f32 %v1796_v33, %v6310_v51  ;;  %v1799_v4 = vmul.f32 %v1796_v33, %v6312_v45 }
 0x24a   :  { %1997 = vrot.lane.b32.xlu1 %v1994_v42, %s3114_s19  ;;  %v1806_v19 = vadd.f32 %v1804_v50, %v1798_v46  ;;  %v1807_v51 = vadd.f32 %v1805_v37, %v1799_v4  ;;  %v6331_v42 = vmov 39   ;;  %v6334_v4 = vmov 16  }
 0x24b   :  { %1078 = vperm.xlu0 %2952, %v4442_v22  }
 0x24c   :  { %v1818_v1 = vpop.permute.xlu1 %1817 }
 0x24d   :  { %v1825_v60 = vrot.slane %v1818_v1, %v6167_v56  ;;  %v6333_v1 = vmov 42  }
 0x24e   :  { %2070 = vrot.lane.b32.xlu1 %v2067_v47, %s3115_s20 }
 0x24f   :  { %v1827_v21 = vmul.f32 %v3815_v55, %v1825_v60  ;;  %2955 = vset.pattern.permute.xlu0 %v6314_v14  ;;  %v6315_v55 = vmov 7  }
 0x250   :  { %1102 = vperm.xlu0 %2955, %v4442_v22  }
 0x251   :  { %v1810_v25 = vpop.permute.xlu1 %1809  ;;  %v1829_v23 = vcombine.high %v1827_v21, %v1827_v21 }
 0x252   :  { %v1812_v56 = vmul.f32 %v1810_v25, %v4232_v9  ;;  %v1813_v45 = vmul.f32 %v1810_v25, %v4243_v8  ;;  %1072 = vperm.xlu1 %2950, %v4442_v22   ;;  %v1845_v8 = vmul.f32 %v1843_v17, %v4307_v52  ;;  %v6336_v17 = vmov 18  }
 0x254   :  { %v1814_v11 = vadd.f32 %v1812_v56, %v1806_v19  ;;  %v1815_v39 = vadd.f32 %v1813_v45, %v1807_v51  ;;  %2958 = vset.pattern.permute.xlu0 %v6315_v55  ;;  %v6335_v45 = vmov 48  }
 0x255   :  { %1134 = vperm.xlu0 %2958, %v4442_v22  }
 0x256   :  { %v1831_v12 = vadd.f32 %v1827_v21, %v1814_v11  ;;  %v1832_v3 = vadd.f32 %v1829_v23, %v1815_v39  ;;  %2953 = vset.pattern.permute.xlu1 %v6316_v15  ;;  %v4462_v9 = vpop.permute.xlu1 %801 }
 0x257   :  { %1086 = vperm.xlu1 %2953, %v4442_v22  }
 0x258   :  { %v1839_v53 = vadd.f32 %v1837_v57, %v1831_v12  ;;  %v1840_v41 = vadd.f32 %v1838_v58, %v1832_v3  ;;  %v4521_v57 = vpop.permute.xlu0 %816 }
 0x259   :  { %2961 = vset.pattern.permute.xlu0 %v6317_v36 }
 0x25a   :  { %v4468_v62 = vpop.permute.xlu1 %806  ;;  %v1847_v38 = vadd.f32 %v1845_v8, %v1839_v53  ;;  %v1848_v40 = vadd.f32 %v1846_v49, %v1840_v41  ;;  %1156 = vperm.xlu0 %2961, %v4442_v22   ;;  %v2760_v8 = vld [vmem:[%s5827_s3 + $0x4] sm:$0xf] }
 0x25b   :  { %2954 = vset.pattern.permute.xlu1 %v6318_v32 }
 0x25c   :  { %1094 = vperm.xlu1 %2954, %v4442_v22  }
 0x25e   :  { %2964 = vset.pattern.permute.xlu0 %v6319_v48 }
 0x25f   :  { %v1851_v20 = vpop.permute.xlu1 %1850  ;;  %1180 = vperm.xlu0 %2964, %v4442_v22  }
 0x260   :  { %v1853_v52 = vmul.f32 %v1851_v20, %v4355_v16  ;;  %v1854_v28 = vmul.f32 %v1851_v20, %v4359_v27  ;;  %2956 = vset.pattern.permute.xlu1 %v6320_v63  ;;  %v6324_v16 = vmov 8   ;;  %v6325_v27 = vmov 27  }
 0x261   :  { %1110 = vperm.xlu1 %2956, %v4442_v22   ;;  %v6337_v20 = vmov 0  }
 0x262   :  { %v4479_v34 = vadd.f32 %v1853_v52, %v1847_v38  ;;  %v4481_v18 = vadd.f32 %v1854_v28, %v1848_v40  ;;  %v6338_v28 = vmov 19  }
 0x263   :  { %2969 = vset.pattern.permute.xlu0 %v6321_v61  ;;  %v6376_v61 = vmov 36  }
 0x264   :  { %1262 = vperm.xlu0 %2969, %v4442_v22   ;;  %v4515_v29 = vpop.permute.xlu1 %811 }
 0x265   :  { %2957 = vset.pattern.permute.xlu1 %v6322_v10 }
 0x266   :  { %1118 = vperm.xlu1 %2957, %v4442_v22  }
 0x268   :  { %2972 = vset.pattern.permute.xlu0 %v6323_v6 }
 0x269   :  { %1284 = vperm.xlu0 %2972, %v4442_v22  }
 0x26a   :  { %2959 = vset.pattern.permute.xlu1 %v6324_v16 }
 0x26b   :  { %1140 = vperm.xlu1 %2959, %v4442_v22  }
 0x26d   :  { %2975 = vset.pattern.permute.xlu0 %v6325_v27 }
 0x26e   :  { %1308 = vperm.xlu0 %2975, %v4442_v22  }
 0x26f   :  { %2960 = vset.pattern.permute.xlu1 %v6326_v59 }
 0x270   :  { %1148 = vperm.xlu1 %2960, %v4442_v22  }
 0x272   :  { %2978 = vset.pattern.permute.xlu0 %v6327_v54 }
 0x273   :  { %1332 = vperm.xlu0 %2978, %v4442_v22  }
 0x274   :  { %2962 = vset.pattern.permute.xlu1 %v6328_v0 }
 0x275   :  { %1164 = vperm.xlu1 %2962, %v4442_v22  }
 0x277   :  { %2981 = vset.pattern.permute.xlu0 %v6329_v30 }
 0x278   :  { %1356 = vperm.xlu0 %2981, %v4442_v22  }
 0x279   :  { %2963 = vset.pattern.permute.xlu1 %v6330_v2 }
 0x27a   :  { %1172 = vperm.xlu1 %2963, %v4442_v22  }
 0x27c   :  { %2986 = vset.pattern.permute.xlu0 %v6331_v42 }
 0x27d   :  { %1412 = vperm.xlu0 %2986, %v4442_v22  }
 0x27e   :  { %2965 = vset.pattern.permute.xlu1 %v6332_v5  ;;  %v905_v35 = vpop.f32.mrb[0].mxu0 }
 0x27f   :  { %1204 = vperm.xlu1 %2965, %v4442_v22   ;;  %v906_v33 = vadd.f32 %v905_v35, %v4462_v9  ;;  %v907_v44 = vpop.f32.mrb[1].mxu0 }
 0x280   :  { %v908_v13 = vadd.f32 %v907_v44, %v4462_v9 }
 0x281   :  { %v928_v47 = vmax.f32 %v906_v33, 0.0  ;;  %2989 = vset.pattern.permute.xlu0 %v6333_v1  ;;  %v2761_v33 = vld [vmem:[%s5827_s3 + $0x8] sm:$0xf] }
 0x282   :  { %v929_v46 = vmax.f32 %v908_v13, 0.0  ;;  %v911_v60 = vpop.f32.mrb[2].mxu0  ;;  %1446 = vperm.xlu0 %2989, %v4442_v22  }
 0x283   :  { %2966 = vset.pattern.permute.xlu1 %v6334_v4  ;;  %v912_v50 = vadd.f32 %v911_v60, %v4468_v62  ;;  %v913_v21 = vpop.f32.mrb[3].mxu0  ;;  %v932_v19 = vmin.f32 %v928_v47, 6.0  ;;  %v6339_v60 = vmov 22  }
 0x284   :  { %1212 = vperm.xlu1 %2966, %v4442_v22   ;;  %v914_v37 = vadd.f32 %v913_v21, %v4468_v62  ;;  %v933_v51 = vmin.f32 %v929_v46, 6.0  ;;  %v4539_v46 = vld [vmem:[%s5825_s2 + $0x4] sm:$0xf]  ;;  %v6340_v21 = vmov 23  }
 0x285   :  { %v930_v25 = vmax.f32 %v912_v50, 0.0  ;;  %v4546_v50 = vld [vmem:[%s5830_s6] sm:$0xf] }
 0x286   :  { %v931_v23 = vmax.f32 %v914_v37, 0.0  ;;  %v917_v56 = vpop.f32.mrb[4].mxu0  ;;  %2994 = vset.pattern.permute.xlu0 %v6335_v45  ;;  %v6341_v37 = vmov 0.0  }
 0x287   :  { %v919_v11 = vpop.f32.mrb[5].mxu0  ;;  %v918_v39 = vadd.f32 %v917_v56, %v4515_v29  ;;  %1492 = vperm.xlu0 %2994, %v4442_v22   ;;  %v934_v12 = vmin.f32 %v930_v25, 6.0  ;;  %v6343_v25 = vmov 26  }
 0x288   :  { %2967 = vset.pattern.permute.xlu1 %v6336_v17  ;;  %v920_v58 = vadd.f32 %v919_v11, %v4515_v29  ;;  %v935_v49 = vmin.f32 %v931_v23, 6.0  ;;  %v6346_v11 = vmov 14  }
 0x289   :  { %1228 = vperm.xlu1 %2967, %v4442_v22   ;;  %v936_v3 = vmul.f32 %v932_v19, %v918_v39  ;;  %v6342_v19 = vmov 25  }
 0x28a   :  { %v923_v53 = vpop.f32.mrb[6].mxu0  ;;  %v937_v41 = vmul.f32 %v933_v51, %v920_v58  ;;  %v6344_v51 = vmov 28  }
 0x28b   :  { %v925_v38 = vpop.f32.mrb[7].mxu0  ;;  %v924_v40 = vadd.f32 %v923_v53, %v4521_v57  ;;  %2995 = vset.pattern.permute.xlu0 %v6337_v20 }
 0x28c   :  { %v926_v52 = vadd.f32 %v925_v38, %v4521_v57  ;;  %942 = vperm.xlu0 %2995, %v2760_v8  }
 0x28d   :  { %2968 = vset.pattern.permute.xlu1 %v6338_v28  ;;  %v938_v35 = vmul.f32 %v934_v12, %v924_v40  ;;  %v6348_v12 = vmov 31  }
 0x28e   :  { %1236 = vperm.xlu1 %2968, %v4442_v22   ;;  %v939_v44 = vmul.f32 %v935_v49, %v926_v52 }
 0x28f   :  { %v2782_v13 = vpack.c.bf16 %v938_v35, %v936_v3 }
 0x290   :  { %v2780_v47 = vpack.c.bf16 %v939_v44, %v937_v41  ;;  %1511 = vperm.xlu0 %2995, %v2761_v33  }
 0x292   :  { %2970 = vset.pattern.permute.xlu1 %v6339_v60  ;;  %2781 = vmatprep.subr.bf16.mxu1 %v2780_v47 }
 0x293   :  { %1268 = vperm.xlu1 %2970, %v4442_v22   ;;  %2783 = vmatpush1.bf16.msra.mxu1 %v2782_v13 }
 0x294   :  { %2309 = vperm.xlu0 %2995, %v4539_v46  }
 0x296   :  { %2768 = vmatmul.mubr.msk.f32.vlgmr.msra.gmra.mrb[0].mxu1 %vm6041_vm4, %v4546_v50  ;;  %vm6349_vm4 = vmmov %vm6347_vm0 }
 0x297   :  { %2971 = vset.pattern.permute.xlu1 %v6340_v21  ;;  %2150 = vmatprep.mubr.f32.mxu1 %v6341_v37 }
 0x298   :  { %1276 = vperm.xlu1 %2971, %v4442_v22   ;;  %2997 = vset.pattern.permute.xlu0 %v6316_v15 }
 0x299   :  { %2323 = vperm.xlu0 %2997, %v4539_v46  }
 0x29c   :  { %2973 = vset.pattern.permute.xlu1 %v6342_v19  ;;  %v6371_v19 = vmov 35  }
 0x29d   :  { %1292 = vperm.xlu1 %2973, %v4442_v22   ;;  %3000 = vset.pattern.permute.xlu0 %v6320_v63  ;;  %v6345_v63 = vmov 29  }
 0x29e   :  { %2347 = vperm.xlu0 %3000, %v4539_v46  }
 0x2a1   :  { %2974 = vset.pattern.permute.xlu1 %v6343_v25  ;;  %v6377_v25 = vmov 37  }
 0x2a2   :  { %1300 = vperm.xlu1 %2974, %v4442_v22   ;;  %3003 = vset.pattern.permute.xlu0 %v6324_v16 }
 0x2a3   :  { %2377 = vperm.xlu0 %3003, %v4539_v46  }
 0x2a6   :  { %2976 = vset.pattern.permute.xlu1 %v6344_v51 }
 0x2a7   :  { %1318 = vperm.xlu1 %2976, %v4442_v22   ;;  %3006 = vset.pattern.permute.xlu0 %v6328_v0 }
 0x2a8   :  { %v1641_v15 = vpop.permute.xlu1 %1640  ;;  %v1712_v23 = vpop.permute.xlu0 %1711  ;;  %2401 = vperm.xlu0 %3006, %v4539_v46  }
 0x2ab   :  { %2977 = vset.pattern.permute.xlu1 %v6345_v63 }
 0x2ac   :  { %v1643_v56 = vpop.permute.xlu1 %1642  ;;  %1324 = vperm.xlu1 %2977, %v4442_v22   ;;  %3007 = vset.pattern.permute.xlu0 %v6346_v11  ;;  %v1785_v16 = vpop.permute.xlu0 %1784  ;;  %v6359_v11 = vmov 17  }
 0x2ad   :  { %1198 = vperm.xlu0 %3007, %v4442_v22   ;;  %v1645_v39 = vsel %vm6347_vm0, %v1643_v56, %v1641_v15  ;;  %v1644_v0 = vsel %vm6349_vm4, %v1641_v15, %v1643_v56  ;;  %v6358_v56 = vmov 32   ;;  %vm6362_vm4 = vcmp.lt.s32.totalorder %v3363_v24, 112 }
 0x2ae   :  { %v1646_v20 = vsel %vm3912_vm3, %v1645_v39, 0.0  ;;  %v1647_v35 = vsel %vm3916_vm5, %v1644_v0, 0.0  ;;  %vm6363_vm0 = vmmov %vm6362_vm4 }
 0x2b0   :  { %v1714_v58 = vpop.permute.xlu1 %1713  ;;  %2979 = vset.pattern.permute.xlu1 %v6348_v12  ;;  %v1923_v44 = vpop.permute.xlu0 %1922 }
 0x2b1   :  { %v1715_v3 = vsel %vm6350_vm14, %v1712_v23, %v1714_v58  ;;  %v1716_v8 = vsel %vm6351_vm1, %v1714_v58, %v1712_v23  ;;  %1340 = vperm.xlu1 %2979, %v4442_v22   ;;  %2435 = vperm.xlu0 %3007, %v4539_v46   ;;  %vm6356_vm1 = vcmp.lt.s32.totalorder %v3363_v24, 16 }
 0x2b2   :  { %v1717_v53 = vsel %vm3921_vm12, %v1716_v8, 0.0  ;;  %v1718_v38 = vsel %vm3925_vm13, %v1715_v3, 0.0  ;;  %vm6357_vm14 = vmmov %vm6356_vm1 }
 0x2b3   :  { %v1719_v33 = vadd.f32 %v1717_v53, %v1646_v20  ;;  %v1720_v47 = vadd.f32 %v1718_v38, %v1647_v35 }
 0x2b4   :  { %v1787_v13 = vpop.permute.xlu1 %1786  ;;  %v1996_v35 = vpop.permute.xlu0 %1995 }
 0x2b5   :  { %v1788_v15 = vsel %vm6356_vm1, %v1785_v16, %v1787_v13  ;;  %v1789_v23 = vsel %vm6357_vm14, %v1787_v13, %v1785_v16  ;;  %2980 = vset.pattern.permute.xlu1 %v6358_v56  ;;  %3010 = vset.pattern.permute.xlu0 %v6359_v11  ;;  %v6364_v13 = vmov 34   ;;  %vm6367_vm1 = vcmp.lt.s32.totalorder %v3363_v24, 96 }
 0x2b6   :  { %v1790_v39 = vsel %vm3940_vm9, %v1789_v23, 0.0  ;;  %v1791_v0 = vsel %vm3944_vm15, %v1788_v15, 0.0  ;;  %1348 = vperm.xlu1 %2980, %v4442_v22   ;;  %1220 = vperm.xlu0 %3010, %v4442_v22   ;;  %vm6368_vm14 = vmmov %vm6367_vm1 }
 0x2b7   :  { %v1792_v8 = vadd.f32 %v1790_v39, %v1719_v33  ;;  %v1793_v53 = vadd.f32 %v1791_v0, %v1720_v47 }
 0x2b8   :  { %v1925_v38 = vpop.permute.xlu1 %1924 }
 0x2b9   :  { %v1926_v16 = vsel %vm6362_vm4, %v1923_v44, %v1925_v38  ;;  %v1927_v20 = vsel %vm6363_vm0, %v1925_v38, %v1923_v44  ;;  %v1857_v15 = vadd.f32 %v4479_v34, %v1792_v8  ;;  %v1858_v23 = vadd.f32 %v4481_v18, %v1793_v53 }
 0x2ba   :  { %2982 = vset.pattern.permute.xlu1 %v6364_v13  ;;  %2457 = vperm.xlu0 %3010, %v4539_v46   ;;  %v1928_v47 = vsel %vm3991_vm6, %v1926_v16, 0.0  ;;  %v1929_v39 = vsel %vm3995_vm8, %v1927_v20, 0.0  ;;  %v2069_v20 = vpop.permute.xlu0 %2068  ;;  %vm6372_vm4 = vcmp.lt.s32.totalorder %v3363_v24, 80 }
 0x2bb   :  { %1364 = vperm.xlu1 %2982, %v4442_v22   ;;  %v1930_v53 = vadd.f32 %v1928_v47, %v1857_v15  ;;  %v1931_v16 = vadd.f32 %v1929_v39, %v1858_v23  ;;  %vm6373_vm0 = vmmov %vm6372_vm4 }
 0x2bc   :  { %v1998_v0 = vpop.permute.xlu1 %1997 }
 0x2bd   :  { %v1999_v44 = vsel %vm6367_vm1, %v1996_v35, %v1998_v0  ;;  %v2000_v38 = vsel %vm6368_vm14, %v1998_v0, %v1996_v35  ;;  %vm6379_vm1 = vcmask 1043456  }
 0x2be   :  { %v2001_v34 = vsel %vm4005_vm10, %v1999_v44, 0.0  ;;  %v2002_v18 = vsel %vm4009_vm11, %v2000_v38, 0.0  ;;  %3015 = vset.pattern.permute.xlu0 %v6336_v17  ;;  %vm6380_vm14 = vmmov %vm6379_vm1 }
 0x2bf   :  { %2983 = vset.pattern.permute.xlu1 %v6371_v19  ;;  %2465 = vperm.xlu0 %3015, %v4539_v46   ;;  %v2003_v60 = vadd.f32 %v2001_v34, %v1930_v53  ;;  %v2004_v35 = vadd.f32 %v2002_v18, %v1931_v16  ;;  %v6378_v34 = vld [vmem:[#allocation7_spill] sm:$0xff]  ;;  %v6384_v16 = vmov 40  }
 0x2c0   :  { %1382 = vperm.xlu1 %2983, %v4442_v22   ;;  %v2071_v6 = vpop.permute.xlu1 %2070  ;;  %v3048_v53 = vld [vmem:[%s5829_s4 + $0x8] sm:$0xff] }
 0x2c1   :  { %v2072_v0 = vsel %vm6372_vm4, %v2069_v20, %v2071_v6  ;;  %v2073_v44 = vsel %vm6373_vm0, %v2071_v6, %v2069_v20  ;;  %vm6382_vm4 = vcmask 31744   ;;  %v3049_v20 = vld [vmem:[%s5829_s4 + $0x10] sm:$0xff] }
 0x2c2   :  { %v2074_v17 = vsel %vm4033_vm7, %v2072_v0, 0.0  ;;  %v2075_v23 = vsel %vm4037_vm2, %v2073_v44, 0.0  ;;  %vm6383_vm0 = vmmov %vm6382_vm4  ;;  %v6387_v0 = vmov 41   ;;  %v3050_v44 = vld [vmem:[%s5829_s4 + $0x18] sm:$0xff] }
 0x2c3   :  { %v2076_v47 = vadd.f32 %v2074_v17, %v2003_v60  ;;  %v2077_v39 = vadd.f32 %v2075_v23, %v2004_v35  ;;  %3016 = vset.pattern.permute.xlu0 %v6376_v61  ;;  %v6381_v60 = vmov 38   ;;  %v3047_v61 = vld [vmem:[%s5829_s4] sm:$0xff]  ;;  %v6389_v23 = vmov 43  }
 0x2c4   :  { %2984 = vset.pattern.permute.xlu1 %v6377_v25  ;;  %1388 = vperm.xlu0 %3016, %v4442_v22  }
 0x2c5   :  { %v2078_v18 = vadd.f32 %v2076_v47, %v6378_v34  ;;  %1396 = vperm.xlu1 %2984, %v4442_v22   ;;  %v2079_v6 = vadd.f32 %v2077_v39, %v6378_v34  ;;  %v6391_v39 = vmov 45  }
 0x2c7   :  { %2771 = vmatprep.subr.msk.mxu1 %vm6379_vm1, %v2079_v6  ;;  %vm6385_vm1 = vmmov %vm6383_vm0 }
 0x2c8   :  { %2772 = vmatpush1.msk.msra.mxu1 %vm6380_vm14, %v2078_v18  ;;  %2625 = vperm.xlu0 %3016, %v4539_v46   ;;  %vm6388_vm14 = vmmov %vm6383_vm0  ;;  %v6392_v18 = vmov 46  }
 0x2c9   :  { %2985 = vset.pattern.permute.xlu1 %v6381_v60  ;;  %2773 = vmatmul.mubr.msk.f32.vlgmr.msra.gmra.mrb[2].mxu1 %vm6382_vm4, %v3047_v61  ;;  %v6393_v61 = vmov 47   ;;  %vm6438_vm4 = vcmask 130048  }
 0x2ca   :  { %1404 = vperm.xlu1 %2985, %v4442_v22   ;;  %2156 = vmatprep.mubr.f32.mxu1 %v6341_v37 }
 0x2cc   :  { %3021 = vset.pattern.permute.xlu0 %v6377_v25  ;;  %v6386_v25 = vmov 20  }
 0x2cd   :  { %2774 = vmatmul.mubr.msk.f32.gmra.mrb[4].mxu1 %vm6383_vm0, %v3048_v53  ;;  %2633 = vperm.xlu0 %3021, %v4539_v46   ;;  %v4697_v53 = vpop.permute.xlu0 %1078  ;;  %vm6456_vm0 = vcmp.lt.s32.totalorder %v3363_v24, 3 }
 0x2ce   :  { %2987 = vset.pattern.permute.xlu1 %v6384_v16  ;;  %2162 = vmatprep.mubr.f32.mxu1 %v6341_v37 }
 0x2cf   :  { %1420 = vperm.xlu1 %2987, %v4442_v22  }
 0x2d1   :  { %2775 = vmatmul.mubr.msk.f32.gmra.mrb[6].mxu1 %vm6385_vm1, %v3049_v20  ;;  %3022 = vset.pattern.permute.xlu0 %v6386_v25  ;;  %v4666_v35 = vpop.permute.xlu1 %1072  ;;  %v6394_v25 = vmov 1   ;;  %vm6457_vm1 = vmmov %vm6456_vm0 }
 0x2d2   :  { %2168 = vmatprep.mubr.f32.mxu1 %v6341_v37  ;;  %1244 = vperm.xlu0 %3022, %v4442_v22   ;;  %v6390_v37 = vmov 44  }
 0x2d3   :  { %2988 = vset.pattern.permute.xlu1 %v6387_v0 }
 0x2d4   :  { %1428 = vperm.xlu1 %2988, %v4442_v22  }
 0x2d5   :  { %2776 = vmatmul.mubr.msk.f32.gmra.mrb[8].mxu1 %vm6388_vm14, %v3050_v44  ;;  %v4705_v44 = vpop.permute.xlu0 %1102 }
 0x2d6   :  { %v4676_v17 = vpop.permute.xlu1 %1086  ;;  %2481 = vperm.xlu0 %3022, %v4539_v46  }
 0x2d8   :  { %2990 = vset.pattern.permute.xlu1 %v6389_v23 }
 0x2d9   :  { %1452 = vperm.xlu1 %2990, %v4442_v22  }
 0x2da   :  { %3027 = vset.pattern.permute.xlu0 %v6390_v37 }
 0x2db   :  { %v4682_v47 = vpop.permute.xlu1 %1094  ;;  %2697 = vperm.xlu0 %3027, %v4539_v46  }
 0x2dd   :  { %2991 = vset.pattern.permute.xlu1 %v6390_v37 }
 0x2de   :  { %1460 = vperm.xlu1 %2991, %v4442_v22  }
 0x2df   :  { %3028 = vset.pattern.permute.xlu0 %v6391_v39  ;;  %v4711_v39 = vpop.permute.xlu0 %1134 }
 0x2e0   :  { %v4688_v34 = vpop.permute.xlu1 %1110  ;;  %1468 = vperm.xlu0 %3028, %v4442_v22  }
 0x2e2   :  { %2992 = vset.pattern.permute.xlu1 %v6392_v18 }
 0x2e3   :  { %1476 = vperm.xlu1 %2992, %v4442_v22  }
 0x2e4   :  { %2705 = vperm.xlu0 %3028, %v4539_v46  }
 0x2e5   :  { %v4694_v6 = vpop.permute.xlu1 %1118 }
 0x2e7   :  { %2993 = vset.pattern.permute.xlu1 %v6393_v61 }
 0x2e8   :  { %1484 = vperm.xlu1 %2993, %v4442_v22   ;;  %3033 = vset.pattern.permute.xlu0 %v6392_v18  ;;  %v4719_v18 = vpop.permute.xlu0 %1156 }
 0x2ea   :  { %v4701_v20 = vpop.permute.xlu1 %1140 }
 0x2ec   :  { %2996 = vset.pattern.permute.xlu1 %v6394_v25 }
 0x2ed   :  { %2315 = vperm.xlu1 %2996, %v4539_v46  }
 0x2ef   :  { %v4707_v37 = vpop.permute.xlu1 %1148 }
 0x2f1   :  { %2998 = vset.pattern.permute.xlu1 %v6318_v32  ;;  %v4725_v32 = vpop.permute.xlu0 %1180 }
 0x2f2   :  { %2331 = vperm.xlu1 %2998, %v4539_v46  }
 0x2f4   :  { %v4713_v21 = vpop.permute.xlu1 %1164 }
 0x2f6   :  { %2999 = vset.pattern.permute.xlu1 %v6314_v14  ;;  %v4732_v14 = vpop.permute.xlu0 %1262 }
 0x2f7   :  { %2339 = vperm.xlu1 %2999, %v4539_v46  }
 0x2f9   :  { %v4717_v22 = vpop.permute.xlu1 %1172 }
 0x2fb   :  { %3001 = vset.pattern.permute.xlu1 %v6322_v10  ;;  %v4739_v10 = vpop.permute.xlu0 %1284 }
 0x2fc   :  { %2355 = vperm.xlu1 %3001, %v4539_v46  }
 0x2fe   :  { %v4723_v25 = vpop.permute.xlu1 %1204 }
 0x300   :  { %3002 = vset.pattern.permute.xlu1 %v6315_v55  ;;  %v4745_v55 = vpop.permute.xlu0 %1308 }
 0x301   :  { %2371 = vperm.xlu1 %3002, %v4539_v46   ;;  %6397 = vst [vmem:[#allocation26_spill] sm:$0xff] %v4745_v55 }
 0x303   :  { %v4729_v45 = vpop.permute.xlu1 %1212 }
 0x304   :  { %v4751_v8 = vpop.permute.xlu0 %1332 }
 0x305   :  { %3004 = vset.pattern.permute.xlu1 %v6326_v59 }
 0x306   :  { %2385 = vperm.xlu1 %3004, %v4539_v46  }
 0x308   :  { %v4735_v15 = vpop.permute.xlu1 %1228 }
 0x309   :  { %6395 = vst [vmem:[#allocation25_spill] sm:$0xff] %v4735_v15 }
 0x30a   :  { %3005 = vset.pattern.permute.xlu1 %v6317_v36 }
 0x30b   :  { %2393 = vperm.xlu1 %3005, %v4539_v46  }
 0x30d   :  { %v4741_v38 = vpop.permute.xlu1 %1236 }
 0x30e   :  { %6396 = vst [vmem:[#allocation24_spill] sm:$0xff] %v4741_v38 }
 0x30f   :  { %3008 = vset.pattern.permute.xlu1 %v6330_v2  ;;  %v4759_v2 = vpop.permute.xlu0 %1356 }
 0x310   :  { %2409 = vperm.xlu1 %3008, %v4539_v46  }
 0x312   :  { %v4747_v59 = vpop.permute.xlu1 %1268 }
 0x314   :  { %3009 = vset.pattern.permute.xlu1 %v6319_v48  ;;  %v4766_v48 = vpop.permute.xlu0 %1412 }
 0x315   :  { %2417 = vperm.xlu1 %3009, %v4539_v46   ;;  %6401 = vst [vmem:[#allocation27_spill] sm:$0xff] %v4766_v48 }
 0x317   :  { %v4753_v36 = vpop.permute.xlu1 %1276 }
 0x318   :  { %6398 = vst [vmem:[#allocation31_spill] sm:$0xff] %v4753_v36 }
 0x319   :  { %3011 = vset.pattern.permute.xlu1 %v6332_v5  ;;  %v4773_v5 = vpop.permute.xlu0 %1446 }
 0x31a   :  { %2441 = vperm.xlu1 %3011, %v4539_v46   ;;  %6402 = vst [vmem:[#allocation29_spill] sm:$0xff] %v4773_v5 }
 0x31c   :  { %v4757_v27 = vpop.permute.xlu1 %1292 }
 0x31d   :  { %6399 = vst [vmem:[#allocation30_spill] sm:$0xff] %v4757_v27 }
 0x31e   :  { %3012 = vset.pattern.permute.xlu1 %v6334_v4  ;;  %v4779_v4 = vpop.permute.xlu0 %1492 }
 0x31f   :  { %2449 = vperm.xlu1 %3012, %v4539_v46   ;;  %6403 = vst [vmem:[#allocation7_spill] sm:$0xff] %v4779_v4 }
 0x321   :  { %v4763_v11 = vpop.permute.xlu1 %1300 }
 0x322   :  { %6400 = vst [vmem:[#allocation28_spill] sm:$0xff] %v4763_v11  ;;  %v4785_v3 = vpop.permute.xlu0 %942 }
 0x323   :  { %3013 = vset.pattern.permute.xlu1 %v6344_v51  ;;  %6404 = vst [vmem:[#allocation32_spill] sm:$0xff] %v4785_v3 }
 0x324   :  { %2555 = vperm.xlu1 %3013, %v4539_v46  }
 0x326   :  { %v4769_v33 = vpop.permute.xlu1 %1318 }
 0x328   :  { %3014 = vset.pattern.permute.xlu1 %v6345_v63 }
 0x329   :  { %2561 = vperm.xlu1 %3014, %v4539_v46  }
 0x32b   :  { %v4775_v61 = vpop.permute.xlu1 %1324 }
 0x32d   :  { %3017 = vset.pattern.permute.xlu1 %v6327_v54  ;;  %v4793_v54 = vpop.permute.xlu0 %1511 }
 0x32e   :  { %2569 = vperm.xlu1 %3017, %v4539_v46   ;;  %6405 = vst [vmem:[#allocation33_spill] sm:$0xff] %v4793_v54 }
 0x330   :  { %v4781_v51 = vpop.permute.xlu1 %1340 }
 0x332   :  { %3018 = vset.pattern.permute.xlu1 %v6371_v19  ;;  %v4800_v19 = vpop.permute.xlu0 %2309 }
 0x333   :  { %2619 = vperm.xlu1 %3018, %v4539_v46   ;;  %6406 = vst [vmem:[#allocation34_spill] sm:$0xff] %v4800_v19 }
 0x335   :  { %v4787_v63 = vpop.permute.xlu1 %1348 }
 0x337   :  { %3019 = vset.pattern.permute.xlu1 %v6338_v28  ;;  %v4807_v28 = vpop.permute.xlu0 %2323 }
 0x338   :  { %2473 = vperm.xlu1 %3019, %v4539_v46   ;;  %6407 = vst [vmem:[#allocation35_spill] sm:$0xff] %v4807_v28 }
 0x33a   :  { %v4791_v58 = vpop.permute.xlu1 %1364 }
 0x33c   :  { %3020 = vset.pattern.permute.xlu1 %v6348_v12  ;;  %v4813_v12 = vpop.permute.xlu0 %2347 }
 0x33d   :  { %2577 = vperm.xlu1 %3020, %v4539_v46   ;;  %6408 = vst [vmem:[#allocation36_spill] sm:$0xff] %v4813_v12 }
 0x33f   :  { %v4797_v52 = vpop.permute.xlu1 %1382 }
 0x340   :  { %v4819_v19 = vpop.permute.xlu0 %2377 }
 0x341   :  { %3023 = vset.pattern.permute.xlu1 %v6333_v1  ;;  %6410 = vst [vmem:[#allocation38_spill] sm:$0xff] %v4819_v19 }
 0x342   :  { %2683 = vperm.xlu1 %3023, %v4539_v46  }
 0x344   :  { %v4803_v40 = vpop.permute.xlu1 %1396 }
 0x346   :  { %3024 = vset.pattern.permute.xlu1 %v6389_v23 }
 0x347   :  { %2689 = vperm.xlu1 %3024, %v4539_v46  }
 0x349   :  { %v4809_v54 = vpop.permute.xlu1 %1404 }
 0x34b   :  { %3025 = vset.pattern.permute.xlu1 %v6358_v56  ;;  %v4827_v56 = vpop.permute.xlu0 %2401 }
 0x34c   :  { %2585 = vperm.xlu1 %3025, %v4539_v46   ;;  %6413 = vst [vmem:[#allocation41_spill] sm:$0xff] %v4827_v56 }
 0x34e   :  { %v4815_v1 = vpop.permute.xlu1 %1420 }
 0x34f   :  { %6409 = vst [vmem:[#allocation37_spill] sm:$0xff] %v4815_v1 }
 0x350   :  { %3026 = vset.pattern.permute.xlu1 %v6381_v60  ;;  %v4834_v60 = vpop.permute.xlu0 %1198 }
 0x351   :  { %2641 = vperm.xlu1 %3026, %v4539_v46  }
 0x353   :  { %v4821_v23 = vpop.permute.xlu1 %1428 }
 0x354   :  { %6411 = vst [vmem:[#allocation39_spill] sm:$0xff] %v4821_v23 }
 0x355   :  { %3029 = vset.pattern.permute.xlu1 %v6329_v30  ;;  %v4841_v30 = vpop.permute.xlu0 %2435 }
 0x356   :  { %2593 = vperm.xlu1 %3029, %v4539_v46   ;;  %6416 = vst [vmem:[#allocation44_spill] sm:$0xff] %v4841_v30 }
 0x358   :  { %v4825_v28 = vpop.permute.xlu1 %1452 }
 0x359   :  { %6412 = vst [vmem:[#allocation40_spill] sm:$0xff] %v4825_v28  ;;  %v1221_v4 = vpop.permute.xlu0 %1220 }
 0x35a   :  { %3030 = vset.pattern.permute.xlu1 %v6331_v42 }
 0x35b   :  { %2649 = vperm.xlu1 %3030, %v4539_v46  }
 0x35d   :  { %v4831_v12 = vpop.permute.xlu1 %1460 }
 0x35e   :  { %6414 = vst [vmem:[#allocation42_spill] sm:$0xff] %v4831_v12 }
 0x35f   :  { %3031 = vset.pattern.permute.xlu1 %v6364_v13 }
 0x360   :  { %2601 = vperm.xlu1 %3031, %v4539_v46  }
 0x362   :  { %v4837_v19 = vpop.permute.xlu1 %1476 }
 0x363   :  { %6415 = vst [vmem:[#allocation43_spill] sm:$0xff] %v4837_v19 }
 0x364   :  { %3032 = vset.pattern.permute.xlu1 %v6384_v16 }
 0x365   :  { %2657 = vperm.xlu1 %3032, %v4539_v46  }
 0x367   :  { %v4843_v56 = vpop.permute.xlu1 %1484 }
 0x368   :  { %6417 = vst [vmem:[#allocation45_spill] sm:$0xff] %v4843_v56 }
 0x369   :  { %v1015_v42 = vpop.f32.mrb[0].mxu1  ;;  %3034 = vset.pattern.permute.xlu1 %v6387_v0 }
 0x36a   :  { %v4847_v41 = vadd.f32 %v1015_v42, %v4785_v3  ;;  %v1017_v13 = vpop.f32.mrb[1].mxu1 }
 0x36b   :  { %v4850_v49 = vadd.f32 %v1017_v13, %v4785_v3 }
 0x36c   :  { %1022 = vrot.lane.b32.xlu1 %v4847_v41, %s3057_s27  ;;  %v4855_v46 = vmul.f32 %v1221_v4, %v4847_v41  ;;  %v4857_v16 = vpop.permute.xlu1 %2315 }
 0x36d   :  { %6418 = vst [vmem:[#allocation46_spill] sm:$0xff] %v4850_v49  ;;  %6420 = vst [vmem:[#allocation48_spill] sm:$0xff] %v4857_v16  ;;  %1024 = vrot.lane.b32.xlu0 %v4850_v49, %s3057_s27  ;;  %v4862_v0 = vmul.f32 %v1221_v4, %v4850_v49 }
 0x36e   :  { %6419 = vst [vmem:[#allocation47_spill] sm:$0xff] %v4855_v46 }
 0x36f   :  { %6421 = vst [vmem:[#allocation49_spill] sm:$0xff] %v4862_v0 }
 0x370   :  { %1030 = vrot.lane.b32.xlu1 %v4847_v41, %s3056_s26 }
 0x371   :  { %1032 = vrot.lane.b32.xlu0 %v4850_v49, %s3056_s26  ;;  %v4868_v42 = vpop.permute.xlu1 %2331 }
 0x372   :  { %6422 = vst [vmem:[#allocation50_spill] sm:$0xff] %v4868_v42 }
 0x374   :  { %1038 = vrot.lane.b32.xlu1 %v4847_v41, %s3069_s30 }
 0x375   :  { %1040 = vrot.lane.b32.xlu0 %v4850_v49, %s3069_s30 }
 0x376   :  { %v4874_v13 = vpop.permute.xlu1 %2339 }
 0x377   :  { %6423 = vst [vmem:[#allocation51_spill] sm:$0xff] %v4874_v13 }
 0x378   :  { %1046 = vrot.lane.b32.xlu1 %v4847_v41, %s3096_s10 }
 0x379   :  { %1048 = vrot.lane.b32.xlu0 %v4850_v49, %s3096_s10 }
 0x37b   :  { %v4880_v4 = vpop.permute.xlu1 %2355 }
 0x37c   :  { %6424 = vst [vmem:[#allocation52_spill] sm:$0xff] %v4880_v4  ;;  %1054 = vrot.lane.b32.xlu1 %v4847_v41, %s3082_s8 }
 0x37d   :  { %1056 = vrot.lane.b32.xlu0 %v4850_v49, %s3082_s8 }
 0x380   :  { %1062 = vrot.lane.b32.xlu1 %v4847_v41, %s3085_s9  ;;  %v4888_v16 = vpop.permute.xlu1 %2371 }
 0x381   :  { %6425 = vst [vmem:[#allocation53_spill] sm:$0xff] %v4888_v16  ;;  %1064 = vrot.lane.b32.xlu0 %v4850_v49, %s3085_s9 }
 0x385   :  { %v4892_v13 = vpop.permute.xlu1 %2385 }
 0x386   :  { %6426 = vst [vmem:[#allocation54_spill] sm:$0xff] %v4892_v13 }
 0x38a   :  { %v4894_v30 = vpop.permute.xlu1 %2393 }
 0x38b   :  { %6427 = vst [vmem:[#allocation55_spill] sm:$0xff] %v4894_v30 }
 0x38f   :  { %v4896_v42 = vpop.permute.xlu1 %2409 }
 0x390   :  { %6428 = vst [vmem:[#allocation56_spill] sm:$0xff] %v4896_v42 }
 0x394   :  { %v4898_v4 = vpop.permute.xlu1 %2417 }
 0x395   :  { %6429 = vst [vmem:[#allocation57_spill] sm:$0xff] %v4898_v4 }
 0x399   :  { %v4900_v3 = vpop.permute.xlu1 %2441 }
 0x39a   :  { %6430 = vst [vmem:[#allocation58_spill] sm:$0xff] %v4900_v3  ;;  %v4910_v3 = vpop.permute.xlu0 %2457 }
 0x39b   :  { %6433 = vst [vmem:[#allocation61_spill] sm:$0xff] %v4910_v3 }
 0x39c   :  { %v2152_v56 = vpop.f32.mrb[2].mxu1 }
 0x39d   :  { %v2153_v19 = vadd.f32 %v2152_v56, %v4462_v9  ;;  %v2154_v55 = vpop.f32.mrb[3].mxu1 }
 0x39e   :  { %v2155_v11 = vadd.f32 %v2154_v55, %v4462_v9  ;;  %v4904_v16 = vpop.permute.xlu1 %2449 }
 0x39f   :  { %6431 = vst [vmem:[#allocation59_spill] sm:$0xff] %v4904_v16  ;;  %v2175_v12 = vmax.f32 %v2153_v19, 0.0 }
 0x3a0   :  { %v2158_v27 = vpop.f32.mrb[4].mxu1  ;;  %v2176_v30 = vmax.f32 %v2155_v11, 0.0 }
 0x3a1   :  { %v2159_v13 = vadd.f32 %v2158_v27, %v4468_v62  ;;  %v2160_v36 = vpop.f32.mrb[5].mxu1  ;;  %v2179_v0 = vmin.f32 %v2175_v12, 6.0 }
 0x3a2   :  { %v2161_v42 = vadd.f32 %v2160_v36, %v4468_v62  ;;  %v2180_v55 = vmin.f32 %v2176_v30, 6.0 }
 0x3a3   :  { %v4908_v28 = vpop.permute.xlu1 %2555  ;;  %v2177_v56 = vmax.f32 %v2159_v13, 0.0  ;;  %v4918_v13 = vpop.permute.xlu0 %2465 }
 0x3a4   :  { %6432 = vst [vmem:[#allocation60_spill] sm:$0xff] %v4908_v28  ;;  %v2164_v4 = vpop.f32.mrb[6].mxu1  ;;  %v2178_v16 = vmax.f32 %v2161_v42, 0.0  ;;  %6435 = vst [vmem:[#allocation63_spill] sm:$0xff] %v4918_v13 }
 0x3a5   :  { %v2165_v5 = vadd.f32 %v2164_v4, %v4515_v29  ;;  %v2166_v9 = vpop.f32.mrb[7].mxu1  ;;  %v2181_v62 = vmin.f32 %v2177_v56, 6.0 }
 0x3a6   :  { %v2167_v19 = vadd.f32 %v2166_v9, %v4515_v29  ;;  %v2182_v23 = vmin.f32 %v2178_v16, 6.0 }
 0x3a7   :  { %v2183_v38 = vmul.f32 %v2179_v0, %v2165_v5  ;;  %v4922_v5 = vpop.permute.xlu0 %1388 }
 0x3a8   :  { %v2184_v27 = vmul.f32 %v2180_v55, %v2167_v19  ;;  %v2170_v46 = vpop.f32.mrb[8].mxu1  ;;  %v4914_v11 = vpop.permute.xlu1 %2561 }
 0x3a9   :  { %6434 = vst [vmem:[#allocation62_spill] sm:$0xff] %v4914_v11  ;;  %v2171_v36 = vadd.f32 %v2170_v46, %v4521_v57  ;;  %v2172_v28 = vpop.f32.mrb[9].mxu1 }
 0x3aa   :  { %v2173_v12 = vadd.f32 %v2172_v28, %v4521_v57 }
 0x3ab   :  { %v2185_v4 = vmul.f32 %v2181_v62, %v2171_v36  ;;  %v4928_v46 = vpop.permute.xlu0 %2625 }
 0x3ac   :  { %v2186_v3 = vmul.f32 %v2182_v23, %v2173_v12  ;;  %6439 = vst [vmem:[#allocation66_spill] sm:$0xff] %v4928_v46  ;;  %v6465_v46 = vld [vmem:[#allocation11_spill] sm:$0xff] }
 0x3ad   :  { %v2786_v30 = vpack.c.bf16 %v2185_v4, %v2183_v38  ;;  %v4920_v42 = vpop.permute.xlu1 %2569  ;;  %vm6466_vm2 = vnez %v6465_v46 }
 0x3ae   :  { %6436 = vst [vmem:[#allocation64_spill] sm:$0xff] %v4920_v42  ;;  %v2784_v29 = vpack.c.bf16 %v2186_v3, %v2184_v27  ;;  %v6459_v42 = vld [vmem:[#allocation8_spill] sm:$0xff] }
 0x3af   :  { %v4934_v23 = vpop.permute.xlu0 %2633  ;;  %vm6460_vm14 = vnez %v6459_v42  ;;  %v5042_v42 = vmul.f32 %v4739_v10, %v4850_v49 }
 0x3b0   :  { %2785 = vmatprep.subr.bf16.mxu0 %v2784_v29  ;;  %6442 = vst [vmem:[#allocation69_spill] sm:$0xff] %v4934_v23 }
 0x3b1   :  { %2787 = vmatpush1.bf16.msra.mxu0 %v2786_v30  ;;  %6474 = vst [vmem:[#allocation89_spill] sm:$0xff] %v5042_v42 }
 0x3b2   :  { %v4924_v0 = vpop.permute.xlu1 %2619 }
 0x3b3   :  { %6437 = vst [vmem:[#allocation65_spill] sm:$0xff] %v4924_v0  ;;  %v4938_v3 = vpop.permute.xlu0 %1244  ;;  %v6468_v0 = vld [vmem:[#allocation12_spill] sm:$0xff] }
 0x3b4   :  { %2777 = vmatmul.mubr.msk.f32.vlgmr.msra.gmra.mrb[8].mxu0 %vm6438_vm4, %v4546_v50  ;;  %6444 = vst [vmem:[#allocation71_spill] sm:$0xff] %v4938_v3  ;;  %vm6469_vm7 = vnez %v6468_v0 }
 0x3b7   :  { %v4930_v57 = vpop.permute.xlu1 %2473  ;;  %v4942_v56 = vpop.permute.xlu0 %2481 }
 0x3b8   :  { %6440 = vst [vmem:[#allocation67_spill] sm:$0xff] %v4930_v57  ;;  %6446 = vst [vmem:[#allocation73_spill] sm:$0xff] %v4942_v56 }
 0x3bb   :  { %v4946_v55 = vpop.permute.xlu0 %2697 }
 0x3bc   :  { %v4932_v28 = vpop.permute.xlu1 %2577  ;;  %6448 = vst [vmem:[#allocation75_spill] sm:$0xff] %v4946_v55 }
 0x3bd   :  { %6441 = vst [vmem:[#allocation68_spill] sm:$0xff] %v4932_v28 }
 0x3bf   :  { %v4950_v19 = vpop.permute.xlu0 %1468 }
 0x3c0   :  { %6450 = vst [vmem:[#allocation77_spill] sm:$0xff] %v4950_v19 }
 0x3c1   :  { %v4936_v38 = vpop.permute.xlu1 %2683 }
 0x3c2   :  { %6443 = vst [vmem:[#allocation70_spill] sm:$0xff] %v4936_v38 }
 0x3c3   :  { %v4954_v62 = vpop.permute.xlu0 %2705 }
 0x3c4   :  { %6452 = vst [vmem:[#allocation79_spill] sm:$0xff] %v4954_v62 }
 0x3c6   :  { %v4940_v16 = vpop.permute.xlu1 %2689 }
 0x3c7   :  { %6445 = vst [vmem:[#allocation72_spill] sm:$0xff] %v4940_v16 }
 0x3cb   :  { %v4944_v9 = vpop.permute.xlu1 %2585 }
 0x3cc   :  { %6447 = vst [vmem:[#allocation74_spill] sm:$0xff] %v4944_v9 }
 0x3d0   :  { %v4948_v50 = vpop.permute.xlu1 %2641 }
 0x3d1   :  { %6449 = vst [vmem:[#allocation76_spill] sm:$0xff] %v4948_v50 }
 0x3d5   :  { %v4952_v27 = vpop.permute.xlu1 %2593 }
 0x3d6   :  { %6451 = vst [vmem:[#allocation78_spill] sm:$0xff] %v4952_v27  ;;  %v4968_v27 = vmul.f32 %v4950_v19, %v4847_v41 }
 0x3d8   :  { %6458 = vst [vmem:[#allocation83_spill] sm:$0xff] %v4968_v27 }
 0x3da   :  { %v4956_v36 = vpop.permute.xlu1 %2649 }
 0x3db   :  { %6453 = vst [vmem:[#allocation80_spill] sm:$0xff] %v4956_v36  ;;  %v4972_v36 = vmul.f32 %v4682_v47, %v4850_v49 }
 0x3df   :  { %v4958_v12 = vpop.permute.xlu1 %2601  ;;  %v1025_v4 = vpop.permute.xlu0 %1024 }
 0x3e0   :  { %6454 = vst [vmem:[#allocation81_spill] sm:$0xff] %v4958_v12  ;;  %v4980_v12 = vmul.f32 %v4719_v18, %v4847_v41 }
 0x3e3   :  { %v1033_v30 = vpop.permute.xlu0 %1032 }
 0x3e4   :  { %v4960_v29 = vpop.permute.xlu1 %2657 }
 0x3e5   :  { %6455 = vst [vmem:[#allocation82_spill] sm:$0xff] %v4960_v29  ;;  %v4976_v29 = vmul.f32 %v4682_v47, %v4847_v41 }
 0x3e7   :  { %v1041_v9 = vpop.permute.xlu0 %1040 }
 0x3e8   :  { %v1023_v56 = vpop.permute.xlu1 %1022 }
 0x3e9   :  { %v1026_v57 = vsel %vm6456_vm0, %v1023_v56, %v1025_v4  ;;  %v1027_v13 = vsel %vm6457_vm1, %v1025_v4, %v1023_v56  ;;  %v6461_v4 = vld [vmem:[#allocation9_spill] sm:$0xff]  ;;  %vm6463_vm0 = vcmp.lt.s32.totalorder %v3363_v24, 2 }
 0x3ea   :  { %v4984_v56 = vsel %vm6460_vm14, %v1027_v13, 0.0  ;;  %vm6462_vm4 = vnez %v6461_v4  ;;  %vm6464_vm1 = vmmov %vm6463_vm0  ;;  %v5004_v13 = vmul.f32 %v4781_v51, %v4850_v49 }
 0x3eb   :  { %v4988_v55 = vsel %vm6462_vm4, %v1026_v57, 0.0  ;;  %v1049_v47 = vpop.permute.xlu0 %1048  ;;  %v5008_v57 = vmul.f32 %v4719_v18, %v4850_v49  ;;  %v1265_v18 = vmul.f32 %v4732_v14, %v4984_v56  ;;  %vm6487_vm4 = vcmp.lt.s32.totalorder %v3363_v24, 126 }
 0x3ec   :  { %v1031_v23 = vpop.permute.xlu1 %1030  ;;  %v1266_v0 = vmul.f32 %v4732_v14, %v4988_v55  ;;  %v1076_v4 = vmul.f32 %v4666_v35, %v4988_v55  ;;  %v1201_v14 = vmul.f32 %v4834_v60, %v4984_v56  ;;  %v1202_v62 = vmul.f32 %v4834_v60, %v4988_v55  ;;  %vm6488_vm14 = vmmov %vm6487_vm4 }
 0x3ed   :  { %v1034_v16 = vsel %vm6463_vm0, %v1031_v23, %v1033_v30  ;;  %v1035_v38 = vsel %vm6464_vm1, %v1033_v30, %v1031_v23  ;;  %v5012_v23 = vmul.f32 %v4809_v54, %v4847_v41  ;;  %v5024_v30 = vmul.f32 %v4739_v10, %v4847_v41 }
 0x3ee   :  { %v4996_v11 = vsel %vm6466_vm2, %v1035_v38, 0.0  ;;  %v5000_v50 = vsel %vm6469_vm7, %v1034_v16, 0.0  ;;  %v5016_v38 = vmul.f32 %v4781_v51, %v4847_v41  ;;  %v5020_v16 = vmul.f32 %v4809_v54, %v4850_v49 }
 0x3ef   :  { %6467 = vst [vmem:[#allocation84_spill] sm:$0xff] %v4996_v11  ;;  %6470 = vst [vmem:[#allocation85_spill] sm:$0xff] %v5012_v23  ;;  %v1271_v46 = vmul.f32 %v4747_v59, %v4996_v11  ;;  %v1272_v51 = vmul.f32 %v4747_v59, %v5000_v50  ;;  %v1075_v54 = vmul.f32 %v4666_v35, %v4984_v56  ;;  %vm6477_vm0 = vcmp.lt.s32.totalorder %v3363_v24, 1 }
 0x3f0   :  { %v1039_v28 = vpop.permute.xlu1 %1038  ;;  %6471 = vst [vmem:[#allocation86_spill] sm:$0xff] %v5016_v38  ;;  %6472 = vst [vmem:[#allocation87_spill] sm:$0xff] %v5020_v16  ;;  %v1137_v41 = vmul.f32 %v4711_v39, %v4984_v56  ;;  %v1081_v35 = vmul.f32 %v4697_v53, %v4996_v11  ;;  %v1082_v27 = vmul.f32 %v4697_v53, %v5000_v50  ;;  %vm6485_vm7 = vnez %v6139_v7 }
 0x3f1   :  { %6473 = vst [vmem:[#allocation88_spill] sm:$0xff] %v5024_v30  ;;  %v5048_v59 = vadd.f32 %v1271_v46, %v1265_v18  ;;  %v5050_v19 = vadd.f32 %v1272_v51, %v1266_v0  ;;  %v1143_v10 = vmul.f32 %v4701_v20, %v4996_v11  ;;  %v1144_v49 = vmul.f32 %v4701_v20, %v5000_v50  ;;  %v1057_v30 = vpop.permute.xlu0 %1056  ;;  %vm6478_vm1 = vmmov %vm6477_vm0 }
 0x3f2   :  { %v1207_v60 = vmul.f32 %v4723_v25, %v4996_v11  ;;  %v1208_v0 = vmul.f32 %v4723_v25, %v5000_v50  ;;  %v1042_v46 = vsel %vm6477_vm0, %v1039_v28, %v1041_v9  ;;  %v1043_v53 = vsel %vm6478_vm1, %v1041_v9, %v1039_v28  ;;  %v6479_v9 = vld [vmem:[#allocation16_spill] sm:$0xff] }
 0x3f3   :  { %6475 = vst [vmem:[#allocation90_spill] sm:$0xff] %v5048_v59  ;;  %6476 = vst [vmem:[#allocation91_spill] sm:$0xff] %v5050_v19  ;;  %v1138_v18 = vmul.f32 %v4711_v39, %v4988_v55  ;;  %v1327_v20 = vmul.f32 %v4775_v61, %v4996_v11  ;;  %v1328_v51 = vmul.f32 %v4775_v61, %v5000_v50  ;;  %vm6480_vm0 = vnez %v6479_v9  ;;  %v6481_v61 = vld [vmem:[#allocation14_spill] sm:$0xff] }
 0x3f4   :  { %v1047_v42 = vpop.permute.xlu1 %1046  ;;  %v1391_v19 = vmul.f32 %v4922_v5, %v4996_v11  ;;  %v1321_v25 = vmul.f32 %v4769_v33, %v4984_v56  ;;  %v1322_v16 = vmul.f32 %v4769_v33, %v4988_v55  ;;  %v1385_v28 = vmul.f32 %v4797_v52, %v4984_v56 }
 0x3f5   :  { %v5084_v39 = vsel %vm6480_vm0, %v1042_v46, 0.0  ;;  %v1083_v59 = vadd.f32 %v1081_v35, %v1075_v54  ;;  %v1084_v38 = vadd.f32 %v1082_v27, %v1076_v4  ;;  %v1145_v3 = vadd.f32 %v1143_v10, %v1137_v41  ;;  %v1065_v4 = vpop.permute.xlu0 %1064 }
 0x3f6   :  { %vm6482_vm1 = vnez %v6481_v61  ;;  %v1146_v1 = vadd.f32 %v1144_v49, %v1138_v18  ;;  %v5090_v23 = vadd.f32 %v1207_v60, %v1201_v14  ;;  %v5092_v48 = vadd.f32 %v1208_v0, %v1202_v62  ;;  %v6493_v18 = vld [vmem:[#allocation23_spill] sm:$0xff] }
 0x3f7   :  { %v5088_v15 = vsel %vm6482_vm1, %v1043_v53, 0.0  ;;  %v5096_v33 = vmul.f32 %v4922_v5, %v5000_v50  ;;  %v5098_v9 = vadd.f32 %v1327_v20, %v1321_v25  ;;  %v1330_v46 = vadd.f32 %v1328_v51, %v1322_v16 }
 0x3f8   :  { %v1055_v11 = vpop.permute.xlu1 %1054  ;;  %v1393_v54 = vadd.f32 %v1391_v19, %v1385_v28  ;;  %v1090_v27 = vmul.f32 %v4676_v17, %v5084_v39  ;;  %v1089_v41 = vmul.f32 %v4676_v17, %v5088_v15  ;;  %v1151_v49 = vmul.f32 %v4707_v37, %v5088_v15  ;;  %v6495_v28 = vld [vmem:[#allocation22_spill] sm:$0xff] }
 0x3f9   :  { %vm6483_vm0 = vcmp.lt.s32.totalorder %v3363_v24, 127  ;;  %vm6486_vm2 = vnez %v6141_v26  ;;  %v1058_v17 = vsel %vm6487_vm4, %v1055_v11, %v1057_v30  ;;  %v1059_v14 = vsel %vm6488_vm14, %v1057_v30, %v1055_v11  ;;  %v6605_v26 = vld [vmem:[#allocation75_spill] sm:$0xff] }
 0x3fa   :  { %v1050_v62 = vsel %vm6483_vm0, %v1047_v42, %v1049_v47  ;;  %vm6484_vm1 = vmmov %vm6483_vm0  ;;  %v1152_v10 = vmul.f32 %v4707_v37, %v5084_v39  ;;  %vm6489_vm0 = vnez %v6147_v31  ;;  %v1336_v0 = vmul.f32 %v4751_v8, %v5084_v39 }
 0x3fb   :  { %v1051_v5 = vsel %vm6484_vm1, %v1049_v47, %v1047_v42  ;;  %v5112_v16 = vsel %vm6485_vm7, %v1050_v62, 0.0  ;;  %v5126_v42 = vsel %vm6489_vm0, %v1059_v14, 0.0  ;;  %vm6490_vm1 = vcmp.lt.s32.totalorder %v3363_v24, 125 }
 0x3fc   :  { %v5116_v19 = vsel %vm6486_vm2, %v1051_v5, 0.0  ;;  %v1063_v35 = vpop.permute.xlu1 %1062  ;;  %vm6491_vm7 = vmmov %vm6490_vm1  ;;  %vm6492_vm4 = vnez %v6145_v43  ;;  %v1092_v30 = vadd.f32 %v1090_v27, %v1084_v38  ;;  %v1215_v53 = vmul.f32 %v4729_v45, %v5088_v15 }
 0x3fd   :  { %v1066_v47 = vsel %vm6490_vm1, %v1063_v35, %v1065_v4  ;;  %v1067_v60 = vsel %vm6491_vm7, %v1065_v4, %v1063_v35  ;;  %v5136_v11 = vsel %vm6492_vm4, %v1058_v17, 0.0  ;;  %v1106_v37 = vmul.f32 %v4705_v44, %v5116_v19 }
 0x3fe   :  { %vm6494_vm14 = vnez %v6493_v18  ;;  %v1091_v51 = vadd.f32 %v1089_v41, %v1083_v59  ;;  %v1105_v25 = vmul.f32 %v4705_v44, %v5112_v16  ;;  %vm6496_vm7 = vnez %v6495_v28 }
 0x3ff   :  { %v5144_v20 = vsel %vm6494_vm14, %v1067_v60, 0.0  ;;  %v5150_v4 = vsel %vm6496_vm7, %v1066_v47, 0.0  ;;  %v1100_v38 = vadd.f32 %v4972_v36, %v1092_v30  ;;  %v1114_v27 = vmul.f32 %v4688_v34, %v5126_v42 }
 0x400   :  { %v1153_v62 = vadd.f32 %v1151_v49, %v1145_v3  ;;  %v1399_v5 = vmul.f32 %v4803_v40, %v5088_v15  ;;  %v1099_v17 = vadd.f32 %v4976_v29, %v1091_v51  ;;  %v1113_v59 = vmul.f32 %v4688_v34, %v5136_v11 }
 0x401   :  { %v1167_v44 = vmul.f32 %v4713_v21, %v5112_v16  ;;  %v1108_v41 = vadd.f32 %v1106_v37, %v1100_v38  ;;  %v1122_v14 = vmul.f32 %v4694_v6, %v5144_v20  ;;  %v1338_v35 = vadd.f32 %v1336_v0, %v1330_v46 }
 0x402   :  { %v1161_v36 = vadd.f32 %v4980_v12, %v1153_v62  ;;  %v1107_v47 = vadd.f32 %v1105_v25, %v1099_v17  ;;  %v1121_v3 = vmul.f32 %v4694_v6, %v5150_v4  ;;  %v1352_v29 = vmul.f32 %v4787_v63, %v5116_v19 }
 0x403   :  { %v1154_v49 = vadd.f32 %v1152_v10, %v1146_v1  ;;  %v1216_v34 = vmul.f32 %v4729_v45, %v5084_v39  ;;  %v1116_v60 = vadd.f32 %v1114_v27, %v1108_v41  ;;  %v1175_v30 = vmul.f32 %v4717_v22, %v5136_v11  ;;  %v6497_v27 = vld [vmem:[#allocation27_spill] sm:$0xff]  ;;  %v6499_v41 = vld [vmem:[#allocation37_spill] sm:$0xff] }
 0x404   :  { %v1346_v37 = vadd.f32 %v5004_v13, %v1338_v35  ;;  %v1115_v51 = vadd.f32 %v1113_v59, %v1107_v47  ;;  %v1169_v12 = vadd.f32 %v1167_v44, %v1161_v36  ;;  %v1183_v46 = vmul.f32 %v4725_v32, %v5150_v4  ;;  %v6498_v44 = vld [vmem:[#allocation85_spill] sm:$0xff] }
 0x405   :  { %v1360_v6 = vmul.f32 %v4759_v2, %v5126_v42  ;;  %v1124_v0 = vadd.f32 %v1122_v14, %v1116_v60  ;;  %v1162_v1 = vadd.f32 %v5008_v57, %v1154_v49  ;;  %v1168_v45 = vmul.f32 %v4713_v21, %v5116_v19  ;;  %v6500_v47 = vld [vmem:[#allocation25_spill] sm:$0xff]  ;;  %v6501_v60 = vld [vmem:[#allocation39_spill] sm:$0xff] }
 0x406   :  { %v1401_v10 = vadd.f32 %v1399_v5, %v1393_v54  ;;  %v1123_v25 = vadd.f32 %v1121_v3, %v1115_v51  ;;  %v1354_v38 = vadd.f32 %v1352_v29, %v1346_v37  ;;  %v1368_v13 = vmul.f32 %v4791_v58, %v5144_v20  ;;  %v6502_v37 = vld [vmem:[#allocation47_spill] sm:$0xff] }
 0x407   :  { %v1415_v62 = vmul.f32 %v6497_v27, %v5112_v16  ;;  %v1335_v17 = vmul.f32 %v4751_v8, %v5088_v15  ;;  %1127 = vrot.lane.b32.xlu1 %v1124_v0, %s3110_s13  ;;  %v1177_v59 = vadd.f32 %v1175_v30, %v1169_v12  ;;  %v1176_v57 = vmul.f32 %v4717_v22, %v5126_v42 }
 0x408   :  { %v1409_v21 = vadd.f32 %v6498_v44, %v1401_v10  ;;  %1125 = vrot.lane.b32.xlu0 %v1123_v25, %s3110_s13  ;;  %v1362_v54 = vadd.f32 %v1360_v6, %v1354_v38  ;;  %v1184_v5 = vmul.f32 %v4725_v32, %v5144_v20  ;;  %v1423_v14 = vmul.f32 %v6499_v41, %v5136_v11  ;;  %v6506_v25 = vld [vmem:[#allocation49_spill] sm:$0xff] }
 0x409   :  { %v1217_v36 = vadd.f32 %v1215_v53, %v5090_v23  ;;  %v1185_v8 = vadd.f32 %v1183_v46, %v1177_v59  ;;  %v1170_v35 = vadd.f32 %v1168_v45, %v1162_v1  ;;  %v1231_v3 = vmul.f32 %v6500_v47, %v5112_v16  ;;  %v6503_v53 = vld [vmem:[#allocation24_spill] sm:$0xff]  ;;  %v6505_v1 = vld [vmem:[#allocation71_spill] sm:$0xff] }
 0x40a   :  { %v1218_v22 = vadd.f32 %v1216_v34, %v5092_v48  ;;  %v1370_v29 = vadd.f32 %v1368_v13, %v1362_v54  ;;  %v1417_v49 = vadd.f32 %v1415_v62, %v1409_v21  ;;  %v1431_v30 = vmul.f32 %v6501_v60, %v5150_v4  ;;  %v6504_v48 = vld [vmem:[#allocation29_spill] sm:$0xff]  ;;  %v6507_v62 = vld [vmem:[#allocation84_spill] sm:$0xff]  ;;  %v6510_v54 = vld [vmem:[#allocation86_spill] sm:$0xff] }
 0x40b   :  { %v1225_v51 = vadd.f32 %v6502_v37, %v1217_v36  ;;  %v1386_v32 = vmul.f32 %v4797_v52, %v4988_v55  ;;  %1187 = vrot.lane.b32.xlu1 %v1185_v8, %s3111_s14  ;;  %v1178_v23 = vadd.f32 %v1176_v57, %v1170_v35  ;;  %v1239_v12 = vmul.f32 %v6503_v53, %v5136_v11 }
 0x40c   :  { %v1337_v46 = vadd.f32 %v1335_v17, %v5098_v9  ;;  %v1449_v34 = vmul.f32 %v6504_v48, %v4984_v56  ;;  %v1400_v6 = vmul.f32 %v4803_v40, %v5084_v39  ;;  %1373 = vrot.lane.b32.xlu0 %v1370_v29, %s3113_s16  ;;  %v1425_v0 = vadd.f32 %v1423_v14, %v1417_v49  ;;  %v6508_v56 = vld [vmem:[#allocation40_spill] sm:$0xff]  ;;  %v6509_v40 = vld [vmem:[#allocation31_spill] sm:$0xff] }
 0x40d   :  { %v1247_v52 = vmul.f32 %v6505_v1, %v5150_v4  ;;  %v1186_v45 = vadd.f32 %v1184_v5, %v1178_v23  ;;  %v1233_v10 = vadd.f32 %v1231_v3, %v1225_v51  ;;  %v1226_v38 = vadd.f32 %v6506_v25, %v1218_v22  ;;  %v6518_v25 = vld [vmem:[#allocation89_spill] sm:$0xff] }
 0x40e   :  { %v1232_v13 = vmul.f32 %v6500_v47, %v5116_v19  ;;  %v1394_v9 = vadd.f32 %v5096_v33, %v1386_v32  ;;  %v1455_v17 = vmul.f32 %v6508_v56, %v6507_v62  ;;  %v1279_v59 = vmul.f32 %v6509_v40, %v5088_v15  ;;  %v6511_v47 = vld [vmem:[#allocation42_spill] sm:$0xff] }
 0x40f   :  { %v1433_v57 = vadd.f32 %v1431_v30, %v1425_v0  ;;  %1189 = vrot.lane.b32.xlu1 %v1186_v45, %s3111_s14  ;;  %v1241_v44 = vadd.f32 %v1239_v12, %v1233_v10  ;;  %v1240_v21 = vmul.f32 %v6503_v53, %v5126_v42  ;;  %v1345_v5 = vadd.f32 %v6510_v54, %v1337_v46  ;;  %v6512_v32 = vld [vmem:[#allocation90_spill] sm:$0xff]  ;;  %v6513_v53 = vld [vmem:[#allocation87_spill] sm:$0xff]  ;;  %v6516_v0 = vld [vmem:[#allocation88_spill] sm:$0xff] }
 0x410   :  { %v1351_v14 = vmul.f32 %v4787_v63, %v5112_v16  ;;  %v1450_v33 = vmul.f32 %v6504_v48, %v4988_v55  ;;  %v1456_v36 = vmul.f32 %v6508_v56, %v5000_v50  ;;  %v1280_v8 = vmul.f32 %v6509_v40, %v5084_v39  ;;  %v6514_v46 = vld [vmem:[#allocation91_spill] sm:$0xff] }
 0x411   :  { %1435 = vrot.lane.b32.xlu0 %v1433_v57, %s3114_s19  ;;  %v1402_v35 = vadd.f32 %v1400_v6, %v1394_v9  ;;  %v1463_v3 = vmul.f32 %v6511_v47, %v5088_v15  ;;  %v1249_v22 = vadd.f32 %v1247_v52, %v1241_v44  ;;  %v1234_v29 = vadd.f32 %v1232_v13, %v1226_v38  ;;  %v6517_v52 = vld [vmem:[#allocation28_spill] sm:$0xff]  ;;  %v6520_v57 = vld [vmem:[#allocation43_spill] sm:$0xff] }
 0x412   :  { %v1248_v63 = vmul.f32 %v6505_v1, %v5144_v20  ;;  %v1457_v49 = vadd.f32 %v1455_v17, %v1449_v34  ;;  %v1464_v55 = vmul.f32 %v6511_v47, %v5084_v39  ;;  %v1359_v50 = vmul.f32 %v4759_v2, %v5136_v11  ;;  %v6515_v39 = vld [vmem:[#allocation30_spill] sm:$0xff] }
 0x413   :  { %v1367_v30 = vmul.f32 %v4791_v58, %v5150_v4  ;;  %1251 = vrot.lane.b32.xlu1 %v1249_v22, %s3112_s15  ;;  %v1242_v37 = vadd.f32 %v1240_v21, %v1234_v29  ;;  %v1353_v51 = vadd.f32 %v1351_v14, %v1345_v5  ;;  %v1416_v15 = vmul.f32 %v6497_v27, %v5116_v19  ;;  %v6519_v17 = vld [vmem:[#allocation26_spill] sm:$0xff]  ;;  %v6521_v5 = vld [vmem:[#allocation83_spill] sm:$0xff]  ;;  %v6524_v22 = vld [vmem:[#allocation45_spill] sm:$0xff] }
 0x414   :  { %v1281_v23 = vadd.f32 %v1279_v59, %v6512_v32  ;;  %v1410_v12 = vadd.f32 %v6513_v53, %v1402_v35  ;;  %v1282_v48 = vadd.f32 %v1280_v8, %v6514_v46  ;;  %v1295_v34 = vmul.f32 %v6515_v39, %v5112_v16  ;;  %v6522_v35 = vld [vmem:[#allocation46_spill] sm:$0xff] }
 0x415   :  { %v1296_v2 = vmul.f32 %v6515_v39, %v5116_v19  ;;  %v1250_v58 = vadd.f32 %v1248_v63, %v1242_v37  ;;  %v1465_v6 = vadd.f32 %v1463_v3, %v1457_v49  ;;  %v1303_v45 = vmul.f32 %v6517_v52, %v5136_v11  ;;  %v6525_v63 = vld [vmem:[#allocation7_spill] sm:$0xff] }
 0x416   :  { %v1289_v1 = vadd.f32 %v6516_v0, %v1281_v23  ;;  %v1458_v27 = vadd.f32 %v1456_v36, %v1450_v33  ;;  %v1424_v10 = vmul.f32 %v6499_v41, %v5126_v42  ;;  %v1290_v38 = vadd.f32 %v6518_v25, %v1282_v48 }
 0x417   :  { %v1304_v13 = vmul.f32 %v6517_v52, %v5126_v42  ;;  %1253 = vrot.lane.b32.xlu1 %v1250_v58, %s3112_s15  ;;  %v1361_v9 = vadd.f32 %v1359_v50, %v1353_v51  ;;  %v1432_v62 = vmul.f32 %v6501_v60, %v5144_v20  ;;  %v1311_v40 = vmul.f32 %v6519_v17, %v5150_v4  ;;  %v6523_v60 = vld [vmem:[#allocation77_spill] sm:$0xff]  ;;  %v6526_v58 = vld [vmem:[#allocation32_spill] sm:$0xff] }
 0x418   :  { %v1297_v56 = vadd.f32 %v1295_v34, %v1289_v1  ;;  %v1418_v59 = vadd.f32 %v1416_v15, %v1410_v12  ;;  %v1479_v44 = vmul.f32 %v6520_v57, %v5112_v16  ;;  %v1298_v41 = vadd.f32 %v1296_v2, %v1290_v38 }
 0x419   :  { %v1312_v21 = vmul.f32 %v6519_v17, %v5144_v20  ;;  %v1369_v54 = vadd.f32 %v1367_v30, %v1361_v9  ;;  %v1473_v14 = vadd.f32 %v6521_v5, %v1465_v6  ;;  %v1466_v33 = vadd.f32 %v1464_v55, %v1458_v27  ;;  %v5325_v5 = vld [vmem:[%s5825_s2 + $0x4] sm:$0xf] }
 0x41a   :  { %v1305_v36 = vadd.f32 %v1303_v45, %v1297_v56  ;;  %v1306_v8 = vadd.f32 %v1304_v13, %v1298_v41  ;;  %v1472_v47 = vmul.f32 %v6523_v60, %v6522_v35  ;;  %v1426_v3 = vadd.f32 %v1424_v10, %v1418_v59  ;;  %v6594_v41 = vld [vmem:[#allocation70_spill] sm:$0xff] }
 0x41b   :  { %1371 = vrot.lane.b32.xlu1 %v1369_v54, %s3113_s16  ;;  %v1487_v29 = vmul.f32 %v6524_v22, %v5136_v11  ;;  %v1495_v49 = vmul.f32 %v6525_v63, %v5150_v4  ;;  %v1481_v37 = vadd.f32 %v1479_v44, %v1473_v14  ;;  %v1480_v55 = vmul.f32 %v6520_v57, %v5116_v19 }
 0x41c   :  { %v1313_v16 = vadd.f32 %v1311_v40, %v1305_v36  ;;  %v1314_v50 = vadd.f32 %v1312_v21, %v1306_v8  ;;  %v1434_v30 = vadd.f32 %v1432_v62, %v1426_v3  ;;  %v1474_v51 = vadd.f32 %v1472_v47, %v1466_v33 }
 0x41d   :  { %v1489_v15 = vadd.f32 %v1487_v29, %v1481_v37  ;;  %v1488_v32 = vmul.f32 %v6524_v22, %v5126_v42  ;;  %v1496_v11 = vmul.f32 %v6525_v63, %v5144_v20  ;;  %vm6527_vm1 = vcmp.lt.s32.totalorder %v3363_v24, 32 }
 0x41e   :  { %v1482_v53 = vadd.f32 %v1480_v55, %v1474_v51  ;;  %vm6528_vm7 = vmmov %vm6527_vm1  ;;  %vm6529_vm14 = vcmp.lt.s32.totalorder %v3363_v24, 48  ;;  %vm6531_vm0 = vcmp.lt.s32.totalorder %v3363_v24, 16  ;;  %v6541_v22 = vmov 47  }
 0x41f   :  { %1437 = vrot.lane.b32.xlu1 %v1434_v30, %s3114_s19  ;;  %v1497_v23 = vadd.f32 %v1495_v49, %v1489_v15  ;;  %vm6530_vm4 = vmmov %vm6529_vm14 }
 0x420   :  { %v1490_v4 = vadd.f32 %v1488_v32, %v1482_v53 }
 0x422   :  { %v1498_v12 = vadd.f32 %v1496_v11, %v1490_v4 }
 0x423   :  { %1499 = vrot.lane.b32.xlu1 %v1497_v23, %s3115_s20 }
 0x427   :  { %1501 = vrot.lane.b32.xlu1 %v1498_v12, %s3115_s20 }
 0x479   :  { %v1128_v46 = vpop.permute.xlu1 %1127 }
 0x47a   :  { %v1126_v2 = vpop.permute.xlu0 %1125 }
 0x47b   :  { %v1129_v52 = vsel %vm6529_vm14, %v1126_v2, %v1128_v46  ;;  %v1130_v45 = vsel %vm6530_vm4, %v1128_v46, %v1126_v2  ;;  %vm6542_vm14 = vcmp.lt.s32.totalorder %v3363_v24, 96  ;;  %v6550_v2 = vld [vmem:[#allocation5_spill] sm:$0xff] }
 0x47c   :  { %v1131_v56 = vsel %vm3912_vm3, %v1130_v45, 0.0  ;;  %v1132_v40 = vsel %vm3916_vm5, %v1129_v52, 0.0  ;;  %v6554_v52 = vld [vmem:[#allocation33_spill] sm:$0xff] }
 0x47d   :  { %v1188_v48 = vpop.permute.xlu1 %1187 }
 0x47e   :  { %v1374_v59 = vpop.permute.xlu0 %1373 }
 0x481   :  { %v1190_v19 = vpop.permute.xlu1 %1189 }
 0x482   :  { %v1191_v0 = vsel %vm6527_vm1, %v1188_v48, %v1190_v19  ;;  %v1192_v20 = vsel %vm6528_vm7, %v1190_v19, %v1188_v48  ;;  %vm6532_vm1 = vmmov %vm6531_vm0 }
 0x483   :  { %v1193_v38 = vsel %vm3921_vm12, %v1192_v20, 0.0  ;;  %v1194_v9 = vsel %vm3925_vm13, %v1191_v0, 0.0  ;;  %v1436_v29 = vpop.permute.xlu0 %1435  ;;  %vm6543_vm7 = vmmov %vm6542_vm14 }
 0x484   :  { %v1195_v14 = vadd.f32 %v1193_v38, %v1131_v56  ;;  %v1196_v33 = vadd.f32 %v1194_v9, %v1132_v40  ;;  %v6555_v38 = vmov 48   ;;  %v3052_v9 = vld [vmem:[%s5824_s0] sm:$0xff]  ;;  %v6556_v40 = vmov 23  }
 0x485   :  { %v1252_v39 = vpop.permute.xlu1 %1251 }
 0x487   :  { %v2253_v34 = vpop.f32.mrb[8].mxu0 }
 0x488   :  { %v5292_v6 = vadd.f32 %v2253_v34, %v6526_v58  ;;  %v2255_v42 = vpop.f32.mrb[9].mxu0 }
 0x489   :  { %v1254_v1 = vpop.permute.xlu1 %1253  ;;  %v5331_v36 = vadd.f32 %v2255_v42, %v6526_v58  ;;  %v6552_v42 = vld [vmem:[#allocation6_spill] sm:$0xff] }
 0x48a   :  { %2259 = vrot.lane.b32.xlu1 %v5292_v6, %s3057_s27  ;;  %2267 = vrot.lane.b32.xlu0 %v5292_v6, %s3056_s26  ;;  %v1255_v27 = vsel %vm6531_vm0, %v1252_v39, %v1254_v1  ;;  %v1256_v10 = vsel %vm6532_vm1, %v1254_v1, %v1252_v39  ;;  %vm6539_vm0 = vcmp.lt.s32.totalorder %v3363_v24, 112  ;;  %vm6548_vm1 = vcmp.lt.s32.totalorder %v3363_v24, 80 }
 0x48b   :  { %v1257_v44 = vsel %vm3940_vm9, %v1256_v10, 0.0  ;;  %v1258_v21 = vsel %vm3944_vm15, %v1255_v27, 0.0  ;;  %vm6540_vm4 = vmmov %vm6539_vm0 }
 0x48c   :  { %v1259_v8 = vadd.f32 %v1257_v44, %v1195_v14  ;;  %v1260_v35 = vadd.f32 %v1258_v21, %v1196_v33  ;;  %v6558_v44 = vmov 21   ;;  %v6559_v21 = vmov 22  }
 0x48d   :  { %v1372_v54 = vpop.permute.xlu1 %1371  ;;  %v6561_v14 = vmov 25   ;;  %v6562_v33 = vmov 27  }
 0x48e   :  { %2665 = vperm.xlu1 %3034, %v5325_v5   ;;  %2275 = vrot.lane.b32.xlu0 %v5292_v6, %s3069_s30  ;;  %v1375_v47 = vsel %vm6539_vm0, %v1372_v54, %v1374_v59  ;;  %v1376_v3 = vsel %vm6540_vm4, %v1374_v59, %v1372_v54  ;;  %v1315_v63 = vadd.f32 %v1313_v16, %v1259_v8  ;;  %vm6549_vm0 = vmmov %vm6548_vm1  ;;  %v6557_v59 = vmov 26  }
 0x48f   :  { %v1316_v49 = vadd.f32 %v1314_v50, %v1260_v35  ;;  %v1377_v55 = vsel %vm3991_vm6, %v1375_v47, 0.0  ;;  %v1378_v32 = vsel %vm3995_vm8, %v1376_v3, 0.0  ;;  %vm6551_vm4 = vnez %v6550_v2 }
 0x490   :  { %v1379_v4 = vadd.f32 %v1377_v55, %v1315_v63  ;;  %v6560_v54 = vmov 24  }
 0x491   :  { %v1438_v60 = vpop.permute.xlu1 %1437  ;;  %v1380_v12 = vadd.f32 %v1378_v32, %v1316_v49  ;;  %v6566_v49 = vld [vmem:[#allocation79_spill] sm:$0xff] }
 0x492   :  { %2261 = vrot.lane.b32.xlu1 %v5331_v36, %s3057_s27  ;;  %2283 = vrot.lane.b32.xlu0 %v5292_v6, %s3096_s10  ;;  %v1439_v30 = vsel %vm6542_vm14, %v1436_v29, %v1438_v60  ;;  %v1440_v37 = vsel %vm6543_vm7, %v1438_v60, %v1436_v29  ;;  %vm6553_vm14 = vnez %v6552_v42  ;;  %vm6564_vm7 = vcmp.lt.s32.totalorder %v3363_v24, 3  ;;  %v6590_v42 = vld [vmem:[#allocation62_spill] sm:$0xff] }
 0x493   :  { %3035 = vset.pattern.permute.xlu1 %v6541_v22  ;;  %v1441_v50 = vsel %vm4005_vm10, %v1439_v30, 0.0  ;;  %v1442_v11 = vsel %vm4009_vm11, %v1440_v37, 0.0  ;;  %v5413_v30 = vmul.f32 %v6566_v49, %v5292_v6  ;;  %v5421_v55 = vmul.f32 %v6566_v49, %v5331_v36 }
 0x494   :  { %v1443_v48 = vadd.f32 %v1441_v50, %v1379_v4  ;;  %v1444_v19 = vadd.f32 %v1442_v11, %v1380_v12  ;;  %v6569_v12 = vld [vmem:[#allocation8_spill] sm:$0xff] }
 0x495   :  { %v1500_v23 = vpop.permute.xlu1 %1499 }
 0x496   :  { %2269 = vrot.lane.b32.xlu1 %v5331_v36, %s3056_s26  ;;  %2291 = vrot.lane.b32.xlu0 %v5292_v6, %s3082_s8 }
 0x499   :  { %v1502_v46 = vpop.permute.xlu1 %1501 }
 0x49a   :  { %2277 = vrot.lane.b32.xlu1 %v5331_v36, %s3069_s30  ;;  %2299 = vrot.lane.b32.xlu0 %v5292_v6, %s3085_s9  ;;  %v1503_v39 = vsel %vm6548_vm1, %v1500_v23, %v1502_v46  ;;  %v1504_v34 = vsel %vm6549_vm0, %v1502_v46, %v1500_v23  ;;  %vm6565_vm1 = vmmov %vm6564_vm7  ;;  %v6568_v23 = vld [vmem:[#allocation55_spill] sm:$0xff]  ;;  %vm6570_vm0 = vnez %v6569_v12  ;;  %v6586_v12 = vld [vmem:[#allocation48_spill] sm:$0xff] }
 0x49b   :  { %v1505_v58 = vsel %vm6551_vm4, %v1503_v39, 0.0  ;;  %v1506_v0 = vsel %vm6553_vm14, %v1504_v34, 0.0  ;;  %v5429_v50 = vmul.f32 %v6568_v23, %v5292_v6  ;;  %v5433_v11 = vmul.f32 %v6568_v23, %v5331_v36  ;;  %v6573_v34 = vld [vmem:[#allocation61_spill] sm:$0xff] }
 0x49c   :  { %v1507_v20 = vadd.f32 %v1505_v58, %v1443_v48  ;;  %v1508_v1 = vadd.f32 %v1506_v0, %v1444_v19  ;;  %v6571_v48 = vld [vmem:[#allocation9_spill] sm:$0xff]  ;;  %v5447_v58 = vmul.f32 %v6573_v34, %v5331_v36  ;;  %v5451_v0 = vmul.f32 %v6573_v34, %v5292_v6 }
 0x49e   :  { %2285 = vrot.lane.b32.xlu1 %v5331_v36, %s3096_s10  ;;  %2713 = vperm.xlu0 %3033, %v5325_v5   ;;  %v1514_v45 = vadd.f32 %v6554_v52, %v1507_v20  ;;  %v1515_v27 = vadd.f32 %v6554_v52, %v1508_v1 }
 0x4a0   :  { %v1518_v10 = vcombine.low %v1514_v45, %v1515_v27  ;;  %v6576_v45 = vld [vmem:[#allocation68_spill] sm:$0xff] }
 0x4a1   :  { %v5459_v27 = vmul.f32 %v6576_v45, %v5331_v36 }
 0x4a2   :  { %2293 = vrot.lane.b32.xlu1 %v5331_v36, %s3082_s8  ;;  %3036 = vset.pattern.permute.xlu0 %v6555_v38  ;;  %v1520_v56 = vadd.f32 %v3052_v9, %v1518_v10  ;;  %v5463_v10 = vmul.f32 %v6576_v45, %v5292_v6 }
 0x4a3   :  { %2729 = vperm.xlu0 %3036, %v5325_v5  }
 0x4a4   :  { %1521 = vst [vmem:[%s5831_s7] sm:$0xff] %v1520_v56  ;;  %v6579_v56 = vld [vmem:[#allocation12_spill] sm:$0xff] }
 0x4a6   :  { %2301 = vrot.lane.b32.xlu1 %v5331_v36, %s3085_s9 }
 0x4a7   :  { %3039 = vset.pattern.permute.xlu0 %v6556_v40 }
 0x4a8   :  { %2513 = vperm.xlu0 %3039, %v5325_v5  }
 0x4aa   :  { %2721 = vperm.xlu1 %3035, %v5325_v5  }
 0x4ac   :  { %3042 = vset.pattern.permute.xlu0 %v6557_v59  ;;  %v6581_v59 = vld [vmem:[#allocation76_spill] sm:$0xff] }
 0x4ad   :  { %2537 = vperm.xlu0 %3042, %v5325_v5  }
 0x4ae   :  { %3037 = vset.pattern.permute.xlu1 %v6558_v44  ;;  %v5475_v44 = vmul.f32 %v6581_v59, %v5331_v36 }
 0x4af   :  { %2499 = vperm.xlu1 %3037, %v5325_v5  }
 0x4b1   :  { %3044 = vset.pattern.permute.xlu0 %v6555_v38  ;;  %v6577_v38 = vld [vmem:[#allocation11_spill] sm:$0xff] }
 0x4b3   :  { %3038 = vset.pattern.permute.xlu1 %v6559_v21  ;;  %v5479_v21 = vmul.f32 %v6581_v59, %v5292_v6  ;;  %v6588_v59 = vld [vmem:[#allocation38_spill] sm:$0xff] }
 0x4b4   :  { %2505 = vperm.xlu1 %3038, %v5325_v5  }
 0x4b8   :  { %3040 = vset.pattern.permute.xlu1 %v6560_v54  ;;  %v6582_v54 = vld [vmem:[#allocation34_spill] sm:$0xff] }
 0x4b9   :  { %2521 = vperm.xlu1 %3040, %v5325_v5  }
 0x4bd   :  { %3041 = vset.pattern.permute.xlu1 %v6561_v14 }
 0x4be   :  { %2529 = vperm.xlu1 %3041, %v5325_v5  }
 0x4c2   :  { %3043 = vset.pattern.permute.xlu1 %v6562_v33 }
 0x4c3   :  { %2545 = vperm.xlu1 %3043, %v5325_v5   ;;  %v6567_v5 = vld [vmem:[#allocation50_spill] sm:$0xff] }
 0x4c4   :  { %v5417_v37 = vmul.f32 %v6567_v5, %v5292_v6  ;;  %v5425_v32 = vmul.f32 %v6567_v5, %v5331_v36  ;;  %v6585_v5 = vld [vmem:[#allocation60_spill] sm:$0xff] }
 0x4fc   :  { %v2268_v8 = vpop.permute.xlu0 %2267  ;;  %v2260_v35 = vpop.permute.xlu1 %2259 }
 0x500   :  { %v2276_v60 = vpop.permute.xlu0 %2275 }
 0x504   :  { %v5405_v3 = vpop.permute.xlu0 %2283 }
 0x508   :  { %v5435_v4 = vpop.permute.xlu0 %2291 }
 0x50d   :  { %v5403_v47 = vpop.permute.xlu1 %2665 }
 0x50e   :  { %6563 = vst [vmem:[#allocation14_spill] sm:$0xff] %v5403_v47 }
 0x511   :  { %v2262_v22 = vpop.permute.xlu1 %2261 }
 0x512   :  { %v2263_v29 = vsel %vm6564_vm7, %v2260_v35, %v2262_v22  ;;  %v2264_v63 = vsel %vm6565_vm1, %v2262_v22, %v2260_v35  ;;  %vm6572_vm7 = vnez %v6571_v48  ;;  %vm6574_vm1 = vcmp.lt.s32.totalorder %v3363_v24, 2 }
 0x513   :  { %v5439_v46 = vsel %vm6570_vm0, %v2264_v63, 0.0  ;;  %v5443_v19 = vsel %vm6572_vm7, %v2263_v29, 0.0  ;;  %vm6575_vm14 = vmmov %vm6574_vm1  ;;  %vm6578_vm0 = vnez %v6577_v38  ;;  %vm6580_vm7 = vnez %v6579_v56  ;;  %v6584_v29 = vld [vmem:[#allocation44_spill] sm:$0xff]  ;;  %v2300_v56 = vpop.permute.xlu0 %2299 }
 0x514   :  { %v2312_v14 = vmul.f32 %v6582_v54, %v5439_v46  ;;  %v2313_v33 = vmul.f32 %v6582_v54, %v5443_v19  ;;  %v2438_v63 = vmul.f32 %v6584_v29, %v5439_v46  ;;  %v2439_v49 = vmul.f32 %v6584_v29, %v5443_v19  ;;  %v6589_v29 = vld [vmem:[#allocation58_spill] sm:$0xff] }
 0x515   :  { %v2270_v39 = vpop.permute.xlu1 %2269  ;;  %v2558_v23 = vmul.f32 %v6585_v5, %v5439_v46  ;;  %v2559_v34 = vmul.f32 %v6585_v5, %v5443_v19  ;;  %v2687_v57 = vmul.f32 %v6594_v41, %v5443_v19 }
 0x516   :  { %v2271_v20 = vsel %vm6574_vm1, %v2268_v8, %v2270_v39  ;;  %v2272_v1 = vsel %vm6575_vm14, %v2270_v39, %v2268_v8  ;;  %v6583_v8 = vld [vmem:[#allocation53_spill] sm:$0xff]  ;;  %vm6591_vm14 = vcmp.lt.s32.totalorder %v3363_v24, 1 }
 0x517   :  { %v5467_v9 = vsel %vm6578_vm0, %v2272_v1, 0.0  ;;  %v5471_v40 = vsel %vm6580_vm7, %v2271_v20, 0.0  ;;  %v2374_v35 = vmul.f32 %v6583_v8, %v5439_v46  ;;  %v2375_v22 = vmul.f32 %v6583_v8, %v5443_v19  ;;  %v6587_v20 = vld [vmem:[#allocation65_spill] sm:$0xff]  ;;  %vm6592_vm1 = vmmov %vm6591_vm14 }
 0x518   :  { %v2318_v48 = vmul.f32 %v6586_v12, %v5467_v9  ;;  %v2622_v1 = vmul.f32 %v6587_v20, %v5439_v46  ;;  %v2623_v45 = vmul.f32 %v6587_v20, %v5443_v19  ;;  %v2319_v38 = vmul.f32 %v6586_v12, %v5471_v40 }
 0x519   :  { %v2278_v39 = vpop.permute.xlu1 %2277  ;;  %v2380_v54 = vmul.f32 %v6588_v59, %v5467_v9  ;;  %v2381_v8 = vmul.f32 %v6588_v59, %v5471_v40  ;;  %v2444_v52 = vmul.f32 %v6589_v29, %v5467_v9  ;;  %v2445_v5 = vmul.f32 %v6589_v29, %v5471_v40  ;;  %v6593_v59 = vld [vmem:[#allocation66_spill] sm:$0xff] }
 0x51a   :  { %v2564_v2 = vmul.f32 %v6590_v42, %v5467_v9  ;;  %v2565_v20 = vmul.f32 %v6590_v42, %v5471_v40  ;;  %v2279_v12 = vsel %vm6591_vm14, %v2276_v60, %v2278_v39  ;;  %v2280_v53 = vsel %vm6592_vm1, %v2278_v39, %v2276_v60  ;;  %v6596_v60 = vld [vmem:[#allocation16_spill] sm:$0xff] }
 0x51b   :  { %v2320_v16 = vadd.f32 %v2318_v48, %v2312_v14  ;;  %v2628_v15 = vmul.f32 %v6593_v59, %v5467_v9  ;;  %v2686_v29 = vmul.f32 %v6594_v41, %v5439_v46  ;;  %v2321_v17 = vadd.f32 %v2319_v38, %v2313_v33 }
 0x51c   :  { %v2629_v42 = vmul.f32 %v6593_v59, %v5471_v40  ;;  %vm6595_vm0 = vnez %v6481_v61  ;;  %vm6597_vm7 = vnez %v6596_v60  ;;  %v2382_v48 = vadd.f32 %v2380_v54, %v2374_v35  ;;  %v6598_v61 = vld [vmem:[#allocation72_spill] sm:$0xff]  ;;  %v6599_v35 = vld [vmem:[#allocation35_spill] sm:$0xff] }
 0x51d   :  { %v2286_v51 = vpop.permute.xlu1 %2285  ;;  %v5531_v62 = vsel %vm6595_vm0, %v2280_v53, 0.0  ;;  %v5535_v14 = vsel %vm6597_vm7, %v2279_v12, 0.0  ;;  %v5537_v39 = vadd.f32 %v2381_v8, %v2375_v22  ;;  %v5539_v13 = vadd.f32 %v2444_v52, %v2438_v63  ;;  %v2714_v41 = vpop.permute.xlu0 %2713  ;;  %v6602_v54 = vld [vmem:[#allocation59_spill] sm:$0xff] }
 0x51e   :  { %v5541_v25 = vadd.f32 %v2445_v5, %v2439_v49  ;;  %v5543_v33 = vadd.f32 %v2564_v2, %v2558_v23  ;;  %v5545_v38 = vadd.f32 %v2565_v20, %v2559_v34  ;;  %v2692_v53 = vmul.f32 %v6598_v61, %v5467_v9  ;;  %v6601_v23 = vld [vmem:[#allocation54_spill] sm:$0xff] }
 0x51f   :  { %v2693_v59 = vmul.f32 %v6598_v61, %v5471_v40  ;;  %v5551_v12 = vadd.f32 %v2628_v15, %v2622_v1  ;;  %v2326_v22 = vmul.f32 %v6599_v35, %v5531_v62  ;;  %v2327_v52 = vmul.f32 %v6599_v35, %v5535_v14 }
 0x520   :  { %vm6600_vm14 = vcmp.lt.s32.totalorder %v3363_v24, 127  ;;  %v5560_v49 = vadd.f32 %v2629_v42, %v2623_v45  ;;  %v2388_v34 = vmul.f32 %v6601_v23, %v5531_v62  ;;  %v2389_v15 = vmul.f32 %v6601_v23, %v5535_v14 }
 0x521   :  { %v2288_v2 = vsel %vm6600_vm14, %v2286_v51, %v5405_v3  ;;  %v2294_v63 = vpop.permute.xlu1 %2293  ;;  %v5572_v8 = vmul.f32 %v6602_v54, %v5531_v62  ;;  %v5576_v5 = vmul.f32 %v6602_v54, %v5535_v14  ;;  %vm6603_vm1 = vmmov %vm6600_vm14  ;;  %vm6604_vm0 = vcmp.lt.s32.totalorder %v3363_v24, 126 }
 0x522   :  { %v5568_v1 = vsel %vm6486_vm2, %v2288_v2, 0.0  ;;  %v2287_v45 = vsel %vm6603_vm1, %v5405_v3, %v2286_v51  ;;  %v2296_v20 = vsel %vm6604_vm0, %v2294_v63, %v5435_v4  ;;  %v2694_v42 = vadd.f32 %v2692_v53, %v2686_v29  ;;  %vm6606_vm2 = vmmov %vm6604_vm0  ;;  %v5595_v51 = vpop.permute.xlu0 %2729  ;;  %v6608_v29 = vld [vmem:[#allocation51_spill] sm:$0xff] }
 0x523   :  { %v2700_v60 = vmul.f32 %v6605_v26, %v5531_v62  ;;  %v2295_v61 = vsel %vm6606_vm2, %v5435_v4, %v2294_v63  ;;  %vm6607_vm7 = vnez %v6147_v31  ;;  %v2701_v2 = vmul.f32 %v6605_v26, %v5535_v14 }
 0x524   :  { %v5591_v35 = vsel %vm6607_vm7, %v2296_v20, 0.0  ;;  %v2329_v23 = vadd.f32 %v2327_v52, %v2321_v17  ;;  %v2343_v53 = vmul.f32 %v6608_v29, %v5568_v1  ;;  %v2328_v54 = vadd.f32 %v2326_v22, %v2320_v16 }
 0x525   :  { %v2302_v3 = vpop.permute.xlu1 %2301  ;;  %vm6609_vm14 = vnez %v6139_v7  ;;  %v2695_v4 = vadd.f32 %v2693_v59, %v2687_v57  ;;  %vm6610_vm1 = vcmp.lt.s32.totalorder %v3363_v24, 125  ;;  %vm6612_vm2 = vnez %v6145_v43  ;;  %v6614_v7 = vld [vmem:[#allocation36_spill] sm:$0xff] }
 0x526   :  { %v5601_v47 = vsel %vm6609_vm14, %v2287_v45, 0.0  ;;  %v2303_v31 = vsel %vm6610_vm1, %v2300_v56, %v2302_v3  ;;  %vm6611_vm0 = vmmov %vm6610_vm1  ;;  %v5609_v20 = vsel %vm6612_vm2, %v2295_v61, 0.0  ;;  %vm6613_vm7 = vnez %v6493_v18  ;;  %v6615_v57 = vld [vmem:[#allocation64_spill] sm:$0xff] }
 0x527   :  { %v2304_v63 = vsel %vm6611_vm0, %v2302_v3, %v2300_v56  ;;  %v2337_v16 = vadd.f32 %v5425_v32, %v2329_v23  ;;  %v2351_v22 = vmul.f32 %v6614_v7, %v5591_v35  ;;  %v5620_v59 = vmul.f32 %v6615_v57, %v5531_v62  ;;  %v6617_v61 = vld [vmem:[#allocation52_spill] sm:$0xff]  ;;  %v6618_v23 = vld [vmem:[#allocation69_spill] sm:$0xff] }
 0x528   :  { %v5613_v17 = vsel %vm6613_vm7, %v2304_v63, 0.0  ;;  %v2573_v56 = vmul.f32 %v6615_v57, %v5535_v14  ;;  %v2702_v52 = vadd.f32 %v2700_v60, %v2694_v42  ;;  %v2336_v43 = vadd.f32 %v5417_v37, %v2328_v54 }
 0x529   :  { %v2703_v45 = vadd.f32 %v2701_v2, %v2695_v4  ;;  %vm6616_vm14 = vnez %v6495_v28  ;;  %v5629_v26 = vpop.permute.xlu1 %2721  ;;  %v2345_v32 = vadd.f32 %v2343_v53, %v2337_v16  ;;  %v2359_v3 = vmul.f32 %v6617_v61, %v5613_v17  ;;  %v2514_v2 = vpop.permute.xlu0 %2513  ;;  %v6619_v4 = vld [vmem:[#allocation41_spill] sm:$0xff] }
 0x52a   :  { %v5627_v18 = vsel %vm6616_vm14, %v2303_v31, 0.0  ;;  %v5635_v63 = vmul.f32 %v6618_v23, %v5531_v62  ;;  %v5639_v42 = vmul.f32 %v6618_v23, %v5535_v14  ;;  %v2342_v37 = vmul.f32 %v6608_v29, %v5601_v47 }
 0x52b   :  { %v2350_v28 = vmul.f32 %v6614_v7, %v5609_v20  ;;  %v5646_v60 = vmul.f32 %v2714_v41, %v5601_v47  ;;  %v2353_v53 = vadd.f32 %v2351_v22, %v2345_v32  ;;  %v2390_v54 = vadd.f32 %v2388_v34, %v2382_v48  ;;  %v6620_v48 = vld [vmem:[#allocation56_spill] sm:$0xff] }
 0x52c   :  { %v2404_v31 = vmul.f32 %v6619_v4, %v5601_v47  ;;  %v5651_v16 = vadd.f32 %v5413_v30, %v2702_v52  ;;  %v5654_v57 = vmul.f32 %v2714_v41, %v5568_v1  ;;  %v2344_v23 = vadd.f32 %v2342_v37, %v2336_v43 }
 0x52d   :  { %v2358_v29 = vmul.f32 %v6617_v61, %v5627_v18  ;;  %v5659_v7 = vadd.f32 %v5421_v55, %v2703_v45  ;;  %v2361_v24 = vadd.f32 %v2359_v3, %v2353_v53  ;;  %v2398_v22 = vadd.f32 %v5429_v50, %v2390_v54  ;;  %v6621_v50 = vld [vmem:[#allocation57_spill] sm:$0xff]  ;;  %v6622_v53 = vld [vmem:[#allocation63_spill] sm:$0xff] }
 0x52e   :  { %v2412_v34 = vmul.f32 %v6620_v48, %v5609_v20  ;;  %v2516_v32 = vmul.f32 %v2514_v2, %v5531_v62  ;;  %v2517_v30 = vmul.f32 %v2514_v2, %v5535_v14  ;;  %v5668_v41 = vmul.f32 %v5629_v26, %v5609_v20  ;;  %v2500_v43 = vpop.permute.xlu1 %2499 }
 0x52f   :  { %v2352_v52 = vadd.f32 %v2350_v28, %v2344_v23  ;;  %2364 = vrot.lane.b32.xlu0 %v2361_v24, %s3110_s13  ;;  %v2502_v55 = vmul.f32 %v2500_v43, %v5439_v46  ;;  %v2406_v45 = vadd.f32 %v2404_v31, %v2398_v22  ;;  %v2420_v61 = vmul.f32 %v6621_v50, %v5627_v18 }
 0x530   :  { %v2391_v3 = vadd.f32 %v2389_v15, %v5537_v39  ;;  %v2503_v62 = vmul.f32 %v2500_v43, %v5443_v19  ;;  %v2405_v14 = vmul.f32 %v6619_v4, %v5568_v1  ;;  %v2413_v28 = vmul.f32 %v6620_v48, %v5591_v35  ;;  %v6623_v39 = vld [vmem:[#allocation67_spill] sm:$0xff] }
 0x531   :  { %v2360_v37 = vadd.f32 %v2358_v29, %v2352_v52  ;;  %v2414_v2 = vadd.f32 %v2412_v34, %v2406_v45  ;;  %v2455_v46 = vadd.f32 %v5576_v5, %v5541_v25  ;;  %v2469_v54 = vmul.f32 %v6622_v53, %v5568_v1  ;;  %v6624_v29 = vld [vmem:[#allocation73_spill] sm:$0xff] }
 0x532   :  { %v2399_v24 = vadd.f32 %v5433_v11, %v2391_v3  ;;  %v2421_v19 = vmul.f32 %v6621_v50, %v5613_v17  ;;  %v2477_v15 = vmul.f32 %v6623_v39, %v5591_v35  ;;  %v2454_v4 = vadd.f32 %v5572_v8, %v5539_v13 }
 0x533   :  { %2362 = vrot.lane.b32.xlu1 %v2360_v37, %s3110_s13  ;;  %v2468_v11 = vmul.f32 %v6622_v53, %v5601_v47  ;;  %v2422_v31 = vadd.f32 %v2420_v61, %v2414_v2  ;;  %v2506_v25 = vpop.permute.xlu1 %2505  ;;  %v2463_v5 = vadd.f32 %v5447_v58, %v2455_v46  ;;  %v2485_v22 = vmul.f32 %v6624_v29, %v5613_v17  ;;  %v6625_v58 = vld [vmem:[#allocation74_spill] sm:$0xff] }
 0x534   :  { %v2407_v23 = vadd.f32 %v2405_v14, %v2399_v24  ;;  %v2508_v48 = vmul.f32 %v2506_v25, %v5467_v9  ;;  %v2509_v34 = vmul.f32 %v2506_v25, %v5471_v40  ;;  %v2462_v52 = vadd.f32 %v5451_v0, %v2454_v4  ;;  %v6626_v2 = vld [vmem:[#allocation78_spill] sm:$0xff] }
 0x535   :  { %v2476_v13 = vmul.f32 %v6623_v39, %v5609_v20  ;;  %2424 = vrot.lane.b32.xlu0 %v2422_v31, %s3111_s14  ;;  %v2471_v43 = vadd.f32 %v2469_v54, %v2463_v5  ;;  %v2575_v45 = vadd.f32 %v2573_v56, %v5545_v38  ;;  %v2589_v50 = vmul.f32 %v6625_v58, %v5568_v1  ;;  %v6627_v56 = vld [vmem:[#allocation81_spill] sm:$0xff] }
 0x536   :  { %v2415_v8 = vadd.f32 %v2413_v28, %v2407_v23  ;;  %v2510_v61 = vadd.f32 %v2508_v48, %v2502_v55  ;;  %v2511_v3 = vadd.f32 %v2509_v34, %v2503_v62  ;;  %v2470_v37 = vadd.f32 %v2468_v11, %v2462_v52  ;;  %v2538_v28 = vpop.permute.xlu0 %2537  ;;  %v6628_v23 = vld [vmem:[#allocation80_spill] sm:$0xff] }
 0x537   :  { %v2484_v9 = vmul.f32 %v6624_v29, %v5627_v18  ;;  %v2479_v0 = vadd.f32 %v2477_v15, %v2471_v43  ;;  %v2583_v14 = vadd.f32 %v5459_v27, %v2575_v45  ;;  %v2597_v24 = vmul.f32 %v6626_v2, %v5591_v35 }
 0x538   :  { %v2423_v40 = vadd.f32 %v2421_v19, %v2415_v8  ;;  %v2522_v46 = vpop.permute.xlu1 %2521  ;;  %v2518_v53 = vadd.f32 %v2516_v32, %v2510_v61  ;;  %v2519_v38 = vadd.f32 %v2517_v30, %v2511_v3  ;;  %v2605_v54 = vmul.f32 %v6627_v56, %v5613_v17 }
 0x539   :  { %v2574_v55 = vadd.f32 %v5620_v59, %v5543_v33  ;;  %v2487_v62 = vadd.f32 %v2485_v22, %v2479_v0  ;;  %v2478_v19 = vadd.f32 %v2476_v13, %v2470_v37  ;;  %v2524_v39 = vmul.f32 %v2522_v46, %v5292_v6 }
 0x53a   :  { %2426 = vrot.lane.b32.xlu1 %v2423_v40, %s3111_s14  ;;  %v2591_v27 = vadd.f32 %v2589_v50, %v2583_v14  ;;  %v2525_v15 = vmul.f32 %v2522_v46, %v5331_v36  ;;  %v2588_v32 = vmul.f32 %v6625_v58, %v5601_v47  ;;  %v2596_v30 = vmul.f32 %v6626_v2, %v5609_v20 }
 0x53b   :  { %v2582_v4 = vadd.f32 %v5463_v10, %v2574_v55  ;;  %v2725_v33 = vmul.f32 %v5629_v26, %v5591_v35  ;;  %v2540_v59 = vmul.f32 %v2538_v28, %v5609_v20  ;;  %2490 = vrot.lane.b32.xlu0 %v2487_v62, %s3112_s15  ;;  %v2486_v11 = vadd.f32 %v2484_v9, %v2478_v19 }
 0x53c   :  { %v2599_v6 = vadd.f32 %v2597_v24, %v2591_v27  ;;  %v2604_v36 = vmul.f32 %v6627_v56, %v5627_v18  ;;  %v2639_v10 = vadd.f32 %v5639_v42, %v5560_v49  ;;  %v2653_v25 = vmul.f32 %v6628_v23, %v5568_v1  ;;  %v6629_v49 = vld [vmem:[#allocation82_spill] sm:$0xff] }
 0x53d   :  { %v2590_v31 = vadd.f32 %v2588_v32, %v2582_v4  ;;  %v2526_v5 = vadd.f32 %v2524_v39, %v2518_v53  ;;  %v2638_v29 = vadd.f32 %v5635_v63, %v5551_v12  ;;  %v2652_v22 = vmul.f32 %v6628_v23, %v5601_v47  ;;  %v2530_v48 = vpop.permute.xlu1 %2529  ;;  %v6631_v39 = vld [vmem:[#allocation4_spill] sm:$0xff] }
 0x53e   :  { %2488 = vrot.lane.b32.xlu1 %v2486_v11, %s3112_s15  ;;  %v2607_v26 = vadd.f32 %v2605_v54, %v2599_v6  ;;  %v2527_v34 = vadd.f32 %v2525_v15, %v2519_v38  ;;  %v2647_v13 = vadd.f32 %v5475_v44, %v2639_v10  ;;  %v2661_v42 = vmul.f32 %v6629_v49, %v5591_v35  ;;  %v6630_v44 = vld [vmem:[#allocation14_spill] sm:$0xff] }
 0x53f   :  { %v2598_v52 = vadd.f32 %v2596_v30, %v2590_v31  ;;  %v2646_v8 = vadd.f32 %v5479_v21, %v2638_v29  ;;  %v2660_v43 = vmul.f32 %v6629_v49, %v5609_v20  ;;  %v2532_v12 = vmul.f32 %v2530_v48, %v5601_v47 }
 0x540   :  { %2610 = vrot.lane.b32.xlu0 %v2607_v26, %s3113_s16  ;;  %v2533_v63 = vmul.f32 %v2530_v48, %v5568_v1  ;;  %v2541_v45 = vmul.f32 %v2538_v28, %v5591_v35  ;;  %v2655_v50 = vadd.f32 %v2653_v25, %v2647_v13  ;;  %v2669_v61 = vmul.f32 %v6630_v44, %v5613_v17 }
 0x541   :  { %v2606_v58 = vadd.f32 %v2604_v36, %v2598_v52  ;;  %v2654_v3 = vadd.f32 %v2652_v22, %v2646_v8  ;;  %v2668_v37 = vmul.f32 %v6630_v44, %v5627_v18  ;;  %v2534_v9 = vadd.f32 %v2532_v12, %v2526_v5 }
 0x542   :  { %v2535_v21 = vadd.f32 %v2533_v63, %v2527_v34  ;;  %v2718_v20 = vadd.f32 %v5646_v60, %v5651_v16  ;;  %v2719_v47 = vadd.f32 %v5654_v57, %v5659_v7  ;;  %v2663_v1 = vadd.f32 %v2661_v42, %v2655_v50  ;;  %v2546_v35 = vpop.permute.xlu1 %2545 }
 0x543   :  { %2608 = vrot.lane.b32.xlu1 %v2606_v58, %s3113_s16  ;;  %v2662_v40 = vadd.f32 %v2660_v43, %v2654_v3  ;;  %v2542_v0 = vadd.f32 %v2540_v59, %v2534_v9  ;;  %v2548_v2 = vmul.f32 %v2546_v35, %v5627_v18  ;;  %v2549_v46 = vmul.f32 %v2546_v35, %v5613_v17 }
 0x544   :  { %v2543_v14 = vadd.f32 %v2541_v45, %v2535_v21  ;;  %v2727_v24 = vadd.f32 %v2725_v33, %v2719_v47  ;;  %v2671_v28 = vadd.f32 %v2669_v61, %v2663_v1  ;;  %v2726_v53 = vadd.f32 %v5668_v41, %v2718_v20 }
 0x545   :  { %v2670_v38 = vadd.f32 %v2668_v37, %v2662_v40  ;;  %v2550_v60 = vadd.f32 %v2548_v2, %v2542_v0  ;;  %v2733_v16 = vmul.f32 %v5595_v51, %v5613_v17  ;;  %v2732_v7 = vmul.f32 %v5595_v51, %v5627_v18 }
 0x546   :  { %2674 = vrot.lane.b32.xlu0 %v2671_v28, %s3114_s19  ;;  %v2551_v57 = vadd.f32 %v2549_v46, %v2543_v14  ;;  %vm6632_vm1 = vcmp.lt.s32.totalorder %v6631_v39, 32  ;;  %vm6634_vm2 = vcmp.lt.s32.totalorder %v6631_v39, 48  ;;  %vm6638_vm14 = vcmp.lt.s32.totalorder %v6631_v39, 16 }
 0x547   :  { %2672 = vrot.lane.b32.xlu1 %v2670_v38, %s3114_s19  ;;  %v2735_v56 = vadd.f32 %v2733_v16, %v2727_v24  ;;  %v2734_v54 = vadd.f32 %v2732_v7, %v2726_v53  ;;  %vm6633_vm0 = vmmov %vm6632_vm1  ;;  %v6655_v38 = vld [vmem:[#allocation6_spill] sm:$0xff]  ;;  %v6657_v7 = vld [vmem:[#allocation33_spill] sm:$0xff] }
 0x548   :  { %vm6635_vm7 = vmmov %vm6634_vm2 }
 0x54a   :  { %2738 = vrot.lane.b32.xlu0 %v2735_v56, %s3115_s20 }
 0x54b   :  { %2736 = vrot.lane.b32.xlu1 %v2734_v54, %s3115_s20 }
 0x5a1   :  { %v2365_v41 = vpop.permute.xlu0 %2364 }
 0x5a5   :  { %v2363_v55 = vpop.permute.xlu1 %2362 }
 0x5a6   :  { %v2366_v51 = vsel %vm6634_vm2, %v2363_v55, %v2365_v41  ;;  %v2367_v18 = vsel %vm6635_vm7, %v2365_v41, %v2363_v55  ;;  %v3053_v55 = vld [vmem:[%s5824_s0 + $0x8] sm:$0xff] }
 0x5a7   :  { %v2425_v62 = vpop.permute.xlu0 %2424  ;;  %v2368_v36 = vsel %vm3912_vm3, %v2367_v18, 0.0  ;;  %v2369_v23 = vsel %vm3916_vm5, %v2366_v51, 0.0  ;;  %vm6652_vm5 = vcmp.lt.s32.totalorder %v6631_v39, 80 }
 0x5ac   :  { %v2427_v19 = vpop.permute.xlu1 %2426 }
 0x5ad   :  { %v2428_v17 = vsel %vm6632_vm1, %v2425_v62, %v2427_v19  ;;  %v2429_v27 = vsel %vm6633_vm0, %v2427_v19, %v2425_v62  ;;  %v2491_v15 = vpop.permute.xlu0 %2490  ;;  %vm6639_vm1 = vmmov %vm6638_vm14 }
 0x5ae   :  { %v2430_v32 = vsel %vm3921_vm12, %v2429_v27, 0.0  ;;  %v2431_v33 = vsel %vm3925_vm13, %v2428_v17, 0.0  ;;  %vm6644_vm12 = vcmp.lt.s32.totalorder %v6631_v39, 112 }
 0x5af   :  { %v2432_v22 = vadd.f32 %v2430_v32, %v2368_v36  ;;  %v2433_v48 = vadd.f32 %v2431_v33, %v2369_v23  ;;  %vm6645_vm13 = vmmov %vm6644_vm12 }
 0x5b0   :  { %v2489_v59 = vpop.permute.xlu1 %2488 }
 0x5b1   :  { %v2492_v11 = vsel %vm6638_vm14, %v2489_v59, %v2491_v15  ;;  %v2493_v6 = vsel %vm6639_vm1, %v2491_v15, %v2489_v59 }
 0x5b2   :  { %v2494_v5 = vsel %vm3940_vm9, %v2493_v6, 0.0  ;;  %v2495_v29 = vsel %vm3944_vm15, %v2492_v11, 0.0  ;;  %v2611_v34 = vpop.permute.xlu0 %2610  ;;  %vm6648_vm15 = vcmp.lt.s32.totalorder %v6631_v39, 96  ;;  %vm6653_vm9 = vmmov %vm6652_vm5 }
 0x5b3   :  { %v2496_v52 = vadd.f32 %v2494_v5, %v2432_v22  ;;  %v2497_v13 = vadd.f32 %v2495_v29, %v2433_v48  ;;  %vm6649_vm3 = vmmov %vm6648_vm15 }
 0x5b5   :  { %v2609_v49 = vpop.permute.xlu1 %2608  ;;  %v2552_v43 = vadd.f32 %v2550_v60, %v2496_v52  ;;  %v2553_v12 = vadd.f32 %v2551_v57, %v2497_v13 }
 0x5b6   :  { %v2612_v42 = vsel %vm6644_vm12, %v2609_v49, %v2611_v34  ;;  %v2613_v8 = vsel %vm6645_vm13, %v2611_v34, %v2609_v49 }
 0x5b7   :  { %v2614_v58 = vsel %vm3991_vm6, %v2612_v42, 0.0  ;;  %v2615_v44 = vsel %vm3995_vm8, %v2613_v8, 0.0  ;;  %vm6656_vm6 = vnez %v6655_v38 }
 0x5b8   :  { %v2675_v63 = vpop.permute.xlu0 %2674  ;;  %v2616_v1 = vadd.f32 %v2614_v58, %v2552_v43  ;;  %v2617_v35 = vadd.f32 %v2615_v44, %v2553_v12 }
 0x5b9   :  { %v2673_v61 = vpop.permute.xlu1 %2672 }
 0x5ba   :  { %v2676_v3 = vsel %vm6648_vm15, %v2673_v61, %v2675_v63  ;;  %v2677_v37 = vsel %vm6649_vm3, %v2675_v63, %v2673_v61 }
 0x5bb   :  { %v2678_v21 = vsel %vm4005_vm10, %v2676_v3, 0.0  ;;  %v2679_v47 = vsel %vm4009_vm11, %v2677_v37, 0.0 }
 0x5bc   :  { %v2739_v40 = vpop.permute.xlu0 %2738  ;;  %v2680_v14 = vadd.f32 %v2678_v21, %v2616_v1  ;;  %v2681_v2 = vadd.f32 %v2679_v47, %v2617_v35 }
 0x5bd   :  { %v2737_v0 = vpop.permute.xlu1 %2736 }
 0x5be   :  { %v2740_v24 = vsel %vm6652_vm5, %v2737_v0, %v2739_v40  ;;  %v2741_v28 = vsel %vm6653_vm9, %v2739_v40, %v2737_v0 }
 0x5bf   :  { %v2742_v53 = vsel %vm6551_vm4, %v2740_v24, 0.0  ;;  %v2743_v60 = vsel %vm6656_vm6, %v2741_v28, 0.0 }
 0x5c0   :  { %v2744_v16 = vadd.f32 %v2742_v53, %v2680_v14  ;;  %v2745_v57 = vadd.f32 %v2743_v60, %v2681_v2 }
 0x5c2   :  { %v2746_v56 = vadd.f32 %v2744_v16, %v6657_v7  ;;  %v2747_v54 = vadd.f32 %v2745_v57, %v6657_v7 }
 0x5c4   :  { %v2750_v41 = vcombine.low %v2746_v56, %v2747_v54 }
 0x5c6   :  { %v2752_v62 = vadd.f32 %v3053_v55, %v2750_v41 }
 0x5c8   :  { %2779 = vst [vmem:[%s5831_s7 + $0x8] sm:$0xff] %v2752_v62 }

</bundles_post_ra>
